<compile_context>
chip_gen: v7x
topology: tpu7x:2x2x1
jax: 0.10.0
libtpu: 0.0.40
codegen_flags: <defaults>
</compile_context>

<pallas_src>
import functools

import jax
import jax.numpy as jnp
from jax.experimental import pallas as pl
from jax.experimental.pallas import tpu as pltpu

COMPUTE_DTYPE = jnp.bfloat16   # matmul operand / intermediate activation dtype
NUMBER_F = 32


# ---------------------------------------------------------------------------
# Tiling / compiler helpers
# ---------------------------------------------------------------------------
def _pick_tile_h(H, W, max_pixels=8192):
    """Largest divisor of H such that a (TH, W) tile stays comfortably in VMEM."""
    start = min(H, max(1, max_pixels // max(W, 1)))
    for cand in range(start, 0, -1):
        if H % cand == 0:
            return cand
    return 1


def _compiler_params():
    return pltpu.CompilerParams(
        dimension_semantics=("parallel", "parallel"),
        vmem_limit_bytes=48 * 1024 * 1024,
    )


# ---------------------------------------------------------------------------
# In-kernel helpers
# ---------------------------------------------------------------------------
def _zero_pad_columns(pad_ref, W):
    """Zero the left/right halo columns of the padded band scratch."""
    TH2, _, C = pad_ref.shape
    z = jnp.zeros((TH2, 1, C), pad_ref.dtype)
    pad_ref[:, 0:1, :] = z
    pad_ref[:, W + 1:W + 2, :] = z


def _accumulate_conv(acc, x_ref, w_ref, pad_ref, row0, TH, W, H):
    """acc += 3x3 'same' conv of rows [row0, row0+TH) of x_ref, as ONE matmul.

    x_ref:   (H, W, C)   full-height activation block (f32 or bf16)
    w_ref:   (9*C, Cout) bf16 weights flattened in (kh, kw, cin) order
    pad_ref: (TH+2, W+2, C) bf16 VMEM scratch; edge columns already zeroed
    """
    C = x_ref.shape[-1]
    cdt = pad_ref.dtype

    top_i = jnp.maximum(row0 - 1, 0)
    bot_i = jnp.minimum(row0 + TH, H - 1)
    top_m = (row0 > 0).astype(jnp.float32)          # zero halo above image
    bot_m = ((row0 + TH) < H).astype(jnp.float32)   # zero halo below image

    pad_ref[0:1, 1:W + 1, :] = (
        x_ref[pl.ds(top_i, 1), :, :].astype(jnp.float32) * top_m).astype(cdt)
    pad_ref[1:TH + 1, 1:W + 1, :] = x_ref[pl.ds(row0, TH), :, :].astype(cdt)
    pad_ref[TH + 1:TH + 2, 1:W + 1, :] = (
        x_ref[pl.ds(bot_i, 1), :, :].astype(jnp.float32) * bot_m).astype(cdt)

    # im2col: 9 shifted views -> (TH*W, 9*C) patch, single MXU matmul.
    cols = [pad_ref[dy:dy + TH, dx:dx + W, :].reshape(TH * W, C)
            for dy in range(3) for dx in range(3)]
    patch = jnp.concatenate(cols, axis=-1)
    return acc + jnp.dot(patch, w_ref[...], preferred_element_type=jnp.float32)


# ---------------------------------------------------------------------------
# Conv (ReLU) kernel: 1 or 2 inputs, fused-K im2col matmul, row-band tiled
# ---------------------------------------------------------------------------
def _conv_relu_kernel(*refs, n_in, TH, W, H):
    x_refs = refs[:n_in]
    w_refs = refs[n_in:2 * n_in]
    b_ref = refs[2 * n_in]
    o_ref = refs[2 * n_in + 1]
    pad_ref = refs[2 * n_in + 2]

    row0 = pl.multiple_of(pl.program_id(1) * TH, TH)
    _zero_pad_columns(pad_ref, W)

    Cout = o_ref.shape[-1]
    acc = jnp.zeros((TH * W, Cout), jnp.float32)
    for x_ref, w_ref in zip(x_refs, w_refs):
        acc = _accumulate_conv(acc, x_ref, w_ref, pad_ref, row0, TH, W, H)

    y = jnp.maximum(acc + b_ref[...], 0.0)            # bias + ReLU in f32
    o_ref[...] = y.reshape(TH, W, Cout).astype(o_ref.dtype)


def conv3x3_relu(xs, ws, b):
    """3x3 stride-1 'same' conv + bias + ReLU over a (possibly virtual) concat
    of the inputs `xs` (weights pre-split along Cin in `ws`)."""
    N, H, W, Cin = xs[0].shape
    assert all(x.shape[-1] == Cin for x in xs)
    Cout = ws[0].shape[-1]
    TH = _pick_tile_h(H, W)
    nt = H // TH
    n_in = len(xs)

    in_specs = []
    for x in xs:
        c = x.shape[-1]
        in_specs.append(pl.BlockSpec((None, H, W, c), lambda n, t: (n, 0, 0, 0)))
    for w in ws:
        in_specs.append(pl.BlockSpec(w.shape, lambda n, t: (0, 0)))
    in_specs.append(pl.BlockSpec((1, Cout), lambda n, t: (0, 0)))

    kern = functools.partial(_conv_relu_kernel, n_in=n_in, TH=TH, W=W, H=H)
    return pl.pallas_call(
        kern,
        out_shape=jax.ShapeDtypeStruct((N, H, W, Cout), COMPUTE_DTYPE),
        grid=(N, nt),
        in_specs=in_specs,
        out_specs=pl.BlockSpec((None, TH, W, Cout), lambda n, t: (n, t, 0, 0)),
        scratch_shapes=[pltpu.VMEM((TH + 2, W + 2, Cin), COMPUTE_DTYPE)],
        compiler_params=_compiler_params(),
    )(*xs, *ws, b.reshape(1, Cout))


# ---------------------------------------------------------------------------
# conv7 (tanh) + fused curve enhancement (8 quadratic steps)
# ---------------------------------------------------------------------------
def _conv7_enhance_kernel(x0_ref, xa_ref, xb_ref, wa_ref, wb_ref, b_ref,
                          e1_ref, e_ref, xr_ref, pad_ref, *, TH, W, H, divx):
    row0 = pl.multiple_of(pl.program_id(1) * TH, TH)
    _zero_pad_columns(pad_ref, W)

    acc = jnp.zeros((TH * W, 24), jnp.float32)
    acc = _accumulate_conv(acc, xa_ref, wa_ref, pad_ref, row0, TH, W, H)
    acc = _accumulate_conv(acc, xb_ref, wb_ref, pad_ref, row0, TH, W, H)
    xr = jnp.tanh(acc + b_ref[...])                          # (TH*W, 24) f32
    xr_ref[...] = xr.reshape(TH, W, 24).astype(xr_ref.dtype)

    v = x0_ref[...].reshape(TH * W, 3).astype(jnp.float32)

    def curve(vv, r):
        vv = vv * divx
        return vv + r * (vv * vv - vv)

    for i in range(4):
        v = curve(v, xr[:, 3 * i:3 * i + 3])
    e1 = v * divx                                            # enhance_image_1
    e1_ref[...] = e1.reshape(TH, W, 3).astype(e1_ref.dtype)
    for i in range(4, 8):
        v = curve(v, xr[:, 3 * i:3 * i + 3])                 # enhance_image
    e_ref[...] = v.reshape(TH, W, 3).astype(e_ref.dtype)


def conv7_enhance(x, xa, xb, wa, wb, b, divx):
    N, H, W, _ = x.shape
    Cin = xa.shape[-1]
    TH = _pick_tile_h(H, W)
    nt = H // TH

    in_specs = [
        pl.BlockSpec((None, TH, W, 3), lambda n, t: (n, t, 0, 0)),     # x tile
        pl.BlockSpec((None, H, W, Cin), lambda n, t: (n, 0, 0, 0)),    # x1
        pl.BlockSpec((None, H, W, Cin), lambda n, t: (n, 0, 0, 0)),    # x6
        pl.BlockSpec(wa.shape, lambda n, t: (0, 0)),
        pl.BlockSpec(wb.shape, lambda n, t: (0, 0)),
        pl.BlockSpec((1, 24), lambda n, t: (0, 0)),
    ]
    out_shape = (
        jax.ShapeDtypeStruct((N, H, W, 3), jnp.float32),     # enhance_image_1
        jax.ShapeDtypeStruct((N, H, W, 3), jnp.float32),     # enhance_image
        jax.ShapeDtypeStruct((N, H, W, 24), jnp.float32),    # r (== x_r)
    )
    out_specs = (
        pl.BlockSpec((None, TH, W, 3), lambda n, t: (n, t, 0, 0)),
        pl.BlockSpec((None, TH, W, 3), lambda n, t: (n, t, 0, 0)),
        pl.BlockSpec((None, TH, W, 24), lambda n, t: (n, t, 0, 0)),
    )
    kern = functools.partial(_conv7_enhance_kernel, TH=TH, W=W, H=H, divx=divx)
    return pl.pallas_call(
        kern,
        out_shape=out_shape,
        grid=(N, nt),
        in_specs=in_specs,
        out_specs=out_specs,
        scratch_shapes=[pltpu.VMEM((TH + 2, W + 2, Cin), COMPUTE_DTYPE)],
        compiler_params=_compiler_params(),
    )(x, xa, xb, wa, wb, b.reshape(1, 24))


# ---------------------------------------------------------------------------
# Parameters (synthetic, HWIO) and wrapper-side weight prep
# ---------------------------------------------------------------------------
def init_params(key, number_f=NUMBER_F):
    shapes = [
        (3, 3, 3, number_f),                # e_conv1
        (3, 3, number_f, number_f),         # e_conv2
        (3, 3, number_f, number_f),         # e_conv3
        (3, 3, number_f, number_f),         # e_conv4
        (3, 3, 2 * number_f, number_f),     # e_conv5
        (3, 3, 2 * number_f, number_f),     # e_conv6
        (3, 3, 2 * number_f, 24),           # e_conv7
    ]
    params = {}
    keys = jax.random.split(key, 2 * len(shapes))
    for i, shp in enumerate(shapes):
        params[f"w{i+1}"] = 0.1 * jax.random.normal(keys[2 * i], shp, jnp.float32)
        params[f"b{i+1}"] = 0.1 * jax.random.normal(keys[2 * i + 1], (shp[-1],),
                                                    jnp.float32)
    return params


def _flatten_w(w):
    kh, kw, cin, cout = w.shape
    return w.reshape(kh * kw * cin, cout).astype(COMPUTE_DTYPE)


def prepare_params(params, number_f=NUMBER_F):
    """Reshape weights to (9*Cin, Cout) bf16; split concat-layer weights along Cin."""
    pp = {}
    for i in range(1, 5):
        pp[f"w{i}"] = [_flatten_w(params[f"w{i}"])]
        pp[f"b{i}"] = params[f"b{i}"]
    for i in range(5, 8):
        w = params[f"w{i}"]
        pp[f"w{i}"] = [_flatten_w(w[:, :, :number_f, :]),
                       _flatten_w(w[:, :, number_f:, :])]
        pp[f"b{i}"] = params[f"b{i}"]
    return pp


# ---------------------------------------------------------------------------
# Forward pass (NCHW in / NCHW out, matching the PyTorch module)
# ---------------------------------------------------------------------------
def forward(params, x_nchw, divx=0.95):
    p = prepare_params(params)
    x = jnp.transpose(x_nchw, (0, 2, 3, 1)).astype(jnp.float32)   # -> NHWC

    x1 = conv3x3_relu([x], p["w1"], p["b1"])
    x2 = conv3x3_relu([x1], p["w2"], p["b2"])
    x3 = conv3x3_relu([x2], p["w3"], p["b3"])
    x4 = conv3x3_relu([x3], p["w4"], p["b4"])
    x5 = conv3x3_relu([x3, x4], p["w5"], p["b5"])       # virtual concat
    x6 = conv3x3_relu([x2, x5], p["w6"], p["b6"])       # virtual concat
    e1, e, xr = conv7_enhance(x, x1, x6, p["w7"][0], p["w7"][1], p["b7"], divx)

    to_nchw = lambda a: jnp.transpose(a, (0, 3, 1, 2))
    # r = cat([r1..r8], dim=1) is exactly x_r in channel order.
    return to_nchw(e1), to_nchw(e), to_nchw(xr)


# ---------------------------------------------------------------------------
# Pure-JAX reference (mirrors the bf16 matmul-operand cast, f32 accumulate)
# ---------------------------------------------------------------------------
def forward_ref(params, x_nchw, divx=0.95):
    cdt = COMPUTE_DTYPE

    def conv(x, w, b, act):
        y = jax.lax.conv_general_dilated(
            x.astype(cdt), w.astype(cdt), (1, 1), ((1, 1), (1, 1)),
            dimension_numbers=("NHWC", "HWIO", "NHWC"),
            preferred_element_type=jnp.float32)
        y = y + b[None, None, None, :]
        return jnp.maximum(y, 0.0) if act == "relu" else jnp.tanh(y)

    x = jnp.transpose(x_nchw, (0, 2, 3, 1)).astype(jnp.float32)
    x1 = conv(x, params["w1"], params["b1"], "relu")
    x2 = conv(x1, params["w2"], params["b2"], "relu")
    x3 = conv(x2, params["w3"], params["b3"], "relu")
    x4 = conv(x3, params["w4"], params["b4"], "relu")
    x5 = conv(jnp.concatenate([x3, x4], -1), params["w5"], params["b5"], "relu")
    x6 = conv(jnp.concatenate([x2, x5], -1), params["w6"], params["b6"], "relu")
    xr = conv(jnp.concatenate([x1, x6], -1), params["w7"], params["b7"], "tanh")

    def curve(v, r):
        v = v * divx
        return v + r * (v * v - v)

    v = x
    for i in range(4):
        v = curve(v, xr[..., 3 * i:3 * i + 3])
    e1 = v * divx
    for i in range(4, 8):
        v = curve(v, xr[..., 3 * i:3 * i + 3])
    to_nchw = lambda a: jnp.transpose(a, (0, 3, 1, 2))
    return to_nchw(e1), to_nchw(v), to_nchw(xr)


if __name__ == "__main__":
    key = jax.random.PRNGKey(0)
    k_x, k_p = jax.random.split(key)
    x = jax.random.uniform(k_x, (2, 3, 16, 16), jnp.float32)   # NCHW input
    params = init_params(k_p)

    e1, e, r = jax.block_until_ready(forward(params, x))
    e1_ref, e_ref, r_ref = forward_ref(params, x)

    assert e1.shape == (2, 3, 16, 16)
    assert e.shape == (2, 3, 16, 16)
    assert r.shape == (2, 24, 16, 16)
    assert jnp.allclose(e1, e1_ref, atol=1e-2, rtol=1e-2)
    assert jnp.allclose(e, e_ref, atol=1e-2, rtol=1e-2)
    assert jnp.allclose(r, r_ref, atol=1e-2, rtol=1e-2)

    print("KERNEL_OK")
</pallas_src>

<mosaic_0001>
module attributes {stable_mosaic.version = 11 : i64} {
  func.func @_conv_relu_kernel(%arg0: i32, %arg1: i32, %arg2: memref<1x16x16x3xf32, #tpu.memory_space<vmem>>, %arg3: memref<27x32xbf16, #tpu.memory_space<vmem>>, %arg4: memref<1x32xf32, #tpu.memory_space<vmem>>, %arg5: memref<1x16x16x32xbf16, #tpu.memory_space<vmem>>, %arg6: memref<18x18x3xbf16, #tpu.memory_space<vmem>>) attributes {dimension_semantics = [#tpu.dimension_semantics<parallel>, #tpu.dimension_semantics<parallel>], iteration_bounds = array<i64: 2, 1>, scalar_prefetch = 0 : i64, scratch_operands = 1 : i64, tpu.core_type = #tpu.core_type<tc>, window_params = [{transform_indices = @transform_0, window_bounds = array<i64: 1, 16, 16, 3>}, {pipeline_mode = #tpu.pipeline_mode<synchronous>, transform_indices = @transform_1, window_bounds = array<i64: 27, 32>}, {pipeline_mode = #tpu.pipeline_mode<synchronous>, transform_indices = @transform_2, window_bounds = array<i64: 1, 32>}, {transform_indices = @transform_3, window_bounds = array<i64: 1, 16, 16, 32>}]} {
    %c16_i32 = arith.constant 16 : i32
    %0 = arith.muli %arg1, %c16_i32 : i32
    %1 = tpu.assume_multiple %0, 16 : i32
    %cst = arith.constant 0.000000e+00 : bf16
    %2 = vector.broadcast %cst : bf16 to vector<18x1x3xbf16>
    %c0 = arith.constant 0 : index
    %c0_0 = arith.constant 0 : index
    %c0_1 = arith.constant 0 : index
    %3 = vector.load %arg6[%c0, %c0_0, %c0_1] : memref<18x18x3xbf16, #tpu.memory_space<vmem>>, vector<18x1x3xbf16>
    tpu.vector_store %arg6[%c0, %c0_0, %c0_1], %2 {strides = array<i32>} : memref<18x18x3xbf16, #tpu.memory_space<vmem>>, vector<18x1x3xbf16>,
    %c0_2 = arith.constant 0 : index
    %c17 = arith.constant 17 : index
    %c0_3 = arith.constant 0 : index
    %4 = vector.load %arg6[%c0_2, %c17, %c0_3] : memref<18x18x3xbf16, #tpu.memory_space<vmem>>, vector<18x1x3xbf16>
    tpu.vector_store %arg6[%c0_2, %c17, %c0_3], %2 {strides = array<i32>} : memref<18x18x3xbf16, #tpu.memory_space<vmem>>, vector<18x1x3xbf16>,
    %cst_4 = arith.constant 0.000000e+00 : f32
    %5 = vector.broadcast %cst_4 : f32 to vector<256x32xf32>
    %c1_i32 = arith.constant 1 : i32
    %6 = arith.subi %1, %c1_i32 : i32
    %c0_i32 = arith.constant 0 : i32
    %7 = arith.maxsi %6, %c0_i32 : i32
    %c16_i32_5 = arith.constant 16 : i32
    %8 = arith.addi %1, %c16_i32_5 : i32
    %c15_i32 = arith.constant 15 : i32
    %9 = arith.minsi %8, %c15_i32 : i32
    %c0_i32_6 = arith.constant 0 : i32
    %10 = arith.cmpi sgt, %1, %c0_i32_6 : i32
    %11 = arith.extui %10 : i1 to i32
    %12 = arith.sitofp %11 : i32 to f32
    %c16_i32_7 = arith.constant 16 : i32
    %13 = arith.addi %1, %c16_i32_7 : i32
    %c16_i32_8 = arith.constant 16 : i32
    %14 = arith.cmpi slt, %13, %c16_i32_8 : i32
    %15 = arith.extui %14 : i1 to i32
    %16 = arith.sitofp %15 : i32 to f32
    %c0_9 = arith.constant 0 : index
    %17 = arith.index_cast %7 : i32 to index
    %c0_10 = arith.constant 0 : index
    %c0_11 = arith.constant 0 : index
    %18 = vector.load %arg2[%c0_9, %17, %c0_10, %c0_11] : memref<1x16x16x3xf32, #tpu.memory_space<vmem>>, vector<1x1x16x3xf32>
    %19 = vector.shape_cast %18 : vector<1x1x16x3xf32> to vector<1x16x3xf32>
    %20 = vector.broadcast %12 : f32 to vector<1x16x3xf32>
    %21 = arith.mulf %19, %20 : vector<1x16x3xf32>
    %22 = arith.truncf %21 : vector<1x16x3xf32> to vector<1x16x3xbf16>
    %c0_12 = arith.constant 0 : index
    %c1 = arith.constant 1 : index
    %c0_13 = arith.constant 0 : index
    %23 = vector.load %arg6[%c0_12, %c1, %c0_13] : memref<18x18x3xbf16, #tpu.memory_space<vmem>>, vector<1x16x3xbf16>
    tpu.vector_store %arg6[%c0_12, %c1, %c0_13], %22 {strides = array<i32>} : memref<18x18x3xbf16, #tpu.memory_space<vmem>>, vector<1x16x3xbf16>,
    %c0_14 = arith.constant 0 : index
    %24 = arith.index_cast %1 : i32 to index
    %c0_15 = arith.constant 0 : index
    %c0_16 = arith.constant 0 : index
    %25 = vector.load %arg2[%c0_14, %24, %c0_15, %c0_16] : memref<1x16x16x3xf32, #tpu.memory_space<vmem>>, vector<1x16x16x3xf32>
    %26 = vector.shape_cast %25 : vector<1x16x16x3xf32> to vector<16x16x3xf32>
    %27 = arith.truncf %26 : vector<16x16x3xf32> to vector<16x16x3xbf16>
    %c1_17 = arith.constant 1 : index
    %c1_18 = arith.constant 1 : index
    %c0_19 = arith.constant 0 : index
    %28 = vector.load %arg6[%c1_17, %c1_18, %c0_19] : memref<18x18x3xbf16, #tpu.memory_space<vmem>>, vector<16x16x3xbf16>
    tpu.vector_store %arg6[%c1_17, %c1_18, %c0_19], %27 {strides = array<i32>} : memref<18x18x3xbf16, #tpu.memory_space<vmem>>, vector<16x16x3xbf16>,
    %c0_20 = arith.constant 0 : index
    %29 = arith.index_cast %9 : i32 to index
    %c0_21 = arith.constant 0 : index
    %c0_22 = arith.constant 0 : index
    %30 = vector.load %arg2[%c0_20, %29, %c0_21, %c0_22] : memref<1x16x16x3xf32, #tpu.memory_space<vmem>>, vector<1x1x16x3xf32>
    %31 = vector.shape_cast %30 : vector<1x1x16x3xf32> to vector<1x16x3xf32>
    %32 = vector.broadcast %16 : f32 to vector<1x16x3xf32>
    %33 = arith.mulf %31, %32 : vector<1x16x3xf32>
    %34 = arith.truncf %33 : vector<1x16x3xf32> to vector<1x16x3xbf16>
    %c17_23 = arith.constant 17 : index
    %c1_24 = arith.constant 1 : index
    %c0_25 = arith.constant 0 : index
    %35 = vector.load %arg6[%c17_23, %c1_24, %c0_25] : memref<18x18x3xbf16, #tpu.memory_space<vmem>>, vector<1x16x3xbf16>
    tpu.vector_store %arg6[%c17_23, %c1_24, %c0_25], %34 {strides = array<i32>} : memref<18x18x3xbf16, #tpu.memory_space<vmem>>, vector<1x16x3xbf16>,
    %c0_26 = arith.constant 0 : index
    %c0_27 = arith.constant 0 : index
    %c0_28 = arith.constant 0 : index
    %36 = vector.load %arg6[%c0_26, %c0_27, %c0_28] : memref<18x18x3xbf16, #tpu.memory_space<vmem>>, vector<16x16x3xbf16>
    %37 = vector.shape_cast %36 : vector<16x16x3xbf16> to vector<256x3xbf16>
    %c0_29 = arith.constant 0 : index
    %c1_30 = arith.constant 1 : index
    %c0_31 = arith.constant 0 : index
    %38 = vector.load %arg6[%c0_29, %c1_30, %c0_31] : memref<18x18x3xbf16, #tpu.memory_space<vmem>>, vector<16x16x3xbf16>
    %39 = vector.shape_cast %38 : vector<16x16x3xbf16> to vector<256x3xbf16>
    %c0_32 = arith.constant 0 : index
    %c2 = arith.constant 2 : index
    %c0_33 = arith.constant 0 : index
    %40 = vector.load %arg6[%c0_32, %c2, %c0_33] : memref<18x18x3xbf16, #tpu.memory_space<vmem>>, vector<16x16x3xbf16>
    %41 = vector.shape_cast %40 : vector<16x16x3xbf16> to vector<256x3xbf16>
    %c1_34 = arith.constant 1 : index
    %c0_35 = arith.constant 0 : index
    %c0_36 = arith.constant 0 : index
    %42 = vector.load %arg6[%c1_34, %c0_35, %c0_36] : memref<18x18x3xbf16, #tpu.memory_space<vmem>>, vector<16x16x3xbf16>
    %43 = vector.shape_cast %42 : vector<16x16x3xbf16> to vector<256x3xbf16>
    %c1_37 = arith.constant 1 : index
    %c1_38 = arith.constant 1 : index
    %c0_39 = arith.constant 0 : index
    %44 = vector.load %arg6[%c1_37, %c1_38, %c0_39] : memref<18x18x3xbf16, #tpu.memory_space<vmem>>, vector<16x16x3xbf16>
    %45 = vector.shape_cast %44 : vector<16x16x3xbf16> to vector<256x3xbf16>
    %c1_40 = arith.constant 1 : index
    %c2_41 = arith.constant 2 : index
    %c0_42 = arith.constant 0 : index
    %46 = vector.load %arg6[%c1_40, %c2_41, %c0_42] : memref<18x18x3xbf16, #tpu.memory_space<vmem>>, vector<16x16x3xbf16>
    %47 = vector.shape_cast %46 : vector<16x16x3xbf16> to vector<256x3xbf16>
    %c2_43 = arith.constant 2 : index
    %c0_44 = arith.constant 0 : index
    %c0_45 = arith.constant 0 : index
    %48 = vector.load %arg6[%c2_43, %c0_44, %c0_45] : memref<18x18x3xbf16, #tpu.memory_space<vmem>>, vector<16x16x3xbf16>
    %49 = vector.shape_cast %48 : vector<16x16x3xbf16> to vector<256x3xbf16>
    %c2_46 = arith.constant 2 : index
    %c1_47 = arith.constant 1 : index
    %c0_48 = arith.constant 0 : index
    %50 = vector.load %arg6[%c2_46, %c1_47, %c0_48] : memref<18x18x3xbf16, #tpu.memory_space<vmem>>, vector<16x16x3xbf16>
    %51 = vector.shape_cast %50 : vector<16x16x3xbf16> to vector<256x3xbf16>
    %c2_49 = arith.constant 2 : index
    %c2_50 = arith.constant 2 : index
    %c0_51 = arith.constant 0 : index
    %52 = vector.load %arg6[%c2_49, %c2_50, %c0_51] : memref<18x18x3xbf16, #tpu.memory_space<vmem>>, vector<16x16x3xbf16>
    %53 = vector.shape_cast %52 : vector<16x16x3xbf16> to vector<256x3xbf16>
    %54 = tpu.concatenate %37, %39, %41, %43, %45, %47, %49, %51, %53 in 1 : vector<256x3xbf16>, vector<256x3xbf16>, vector<256x3xbf16>, vector<256x3xbf16>, vector<256x3xbf16>, vector<256x3xbf16>, vector<256x3xbf16>, vector<256x3xbf16>, vector<256x3xbf16> -> vector<256x27xbf16>
    %c0_52 = arith.constant 0 : index
    %c0_53 = arith.constant 0 : index
    %55 = vector.load %arg3[%c0_52, %c0_53] : memref<27x32xbf16, #tpu.memory_space<vmem>>, vector<27x32xbf16>
    %cst_54 = arith.constant dense<0.000000e+00> : vector<256x32xf32>
    %56 = tpu.matmul %54, %55, %cst_54 {dimension_numbers = #tpu.dot_dimension_numbers<[1], [0], [0], [1], [0, 0, 1, 1], [], []>} : vector<256x27xbf16>, vector<27x32xbf16>, vector<256x32xf32> -> vector<256x32xf32>
    %57 = arith.addf %5, %56 : vector<256x32xf32>
    %c0_55 = arith.constant 0 : index
    %c0_56 = arith.constant 0 : index
    %58 = vector.load %arg4[%c0_55, %c0_56] : memref<1x32xf32, #tpu.memory_space<vmem>>, vector<1x32xf32>
    %59 = vector.broadcast %58 : vector<1x32xf32> to vector<256x32xf32>
    %60 = arith.addf %57, %59 : vector<256x32xf32>
    %cst_57 = arith.constant 0.000000e+00 : f32
    %61 = vector.broadcast %cst_57 : f32 to vector<256x32xf32>
    %62 = arith.maximumf %60, %61 : vector<256x32xf32>
    %63 = vector.shape_cast %62 : vector<256x32xf32> to vector<16x16x32xf32>
    %64 = arith.truncf %63 : vector<16x16x32xf32> to vector<16x16x32xbf16>
    %c0_58 = arith.constant 0 : index
    %c0_59 = arith.constant 0 : index
    %c0_60 = arith.constant 0 : index
    %c0_61 = arith.constant 0 : index
    %65 = vector.load %arg5[%c0_58, %c0_59, %c0_60, %c0_61] : memref<1x16x16x32xbf16, #tpu.memory_space<vmem>>, vector<1x16x16x32xbf16>
    %66 = vector.shape_cast %65 : vector<1x16x16x32xbf16> to vector<16x16x32xbf16>
    %67 = vector.shape_cast %64 : vector<16x16x32xbf16> to vector<1x16x16x32xbf16>
    tpu.vector_store %arg5[%c0_58, %c0_59, %c0_60, %c0_61], %67 {strides = array<i32>} : memref<1x16x16x32xbf16, #tpu.memory_space<vmem>>, vector<1x16x16x32xbf16>,
    return
  }
  func.func @transform_0(%arg0: i32, %arg1: i32) -> (i32, i32, i32, i32) {
    %c0_i32 = arith.constant 0 : i32
    %c0_i32_0 = arith.constant 0 : i32
    %c0_i32_1 = arith.constant 0 : i32
    %c0_i32_2 = arith.constant 0 : i32
    return %arg0, %c0_i32, %c0_i32_0, %c0_i32_1 : i32, i32, i32, i32
  }
  func.func @transform_1(%arg0: i32, %arg1: i32) -> (i32, i32) {
    %c0_i32 = arith.constant 0 : i32
    %c0_i32_0 = arith.constant 0 : i32
    %c0_i32_1 = arith.constant 0 : i32
    return %c0_i32, %c0_i32_0 : i32, i32
  }
  func.func @transform_2(%arg0: i32, %arg1: i32) -> (i32, i32) {
    %c0_i32 = arith.constant 0 : i32
    %c0_i32_0 = arith.constant 0 : i32
    %c0_i32_1 = arith.constant 0 : i32
    return %c0_i32, %c0_i32_0 : i32, i32
  }
  func.func @transform_3(%arg0: i32, %arg1: i32) -> (i32, i32, i32, i32) {
    %c0_i32 = arith.constant 0 : i32
    %c0_i32_0 = arith.constant 0 : i32
    %c0_i32_1 = arith.constant 0 : i32
    return %arg0, %arg1, %c0_i32, %c0_i32_0 : i32, i32, i32, i32
  }
}

</mosaic_0001>

<bundles_post_ra>
// kernel: tpu_custom_call.1
= control target key start
LH: loop header
LB: loop body
LE: loop exit
PB: predicated region body
PF: predicated region fallthrough
CT: control target
= control target key end

     0   :  { %8 = vsyncpa [#allocation4], 0  ;;  %s7437_s0 = inlined_call_operand.vmem [shape: f32[2,16,16,3], index: 0, kind: input, shape index: {}]   ;;  %s7438_s1 = inlined_call_operand.vmem [shape: bf16[27,32], index: 1, kind: input, shape index: {}]   ;;  %s7439_s2 = inlined_call_operand.vmem [shape: f32[1,32], index: 2, kind: input, shape index: {}]   ;;  %s7440_s3 = inlined_call_operand.hbm [shape: bf16[2,16,16,32], index: 3, kind: output, shape index: {}]  }
   0x1   :  { %10 = vsyncpa [#allocation4 + $0x1], 0  ;;  %s4985_s12 = smov 0   ;;  %s4987_s13 = smov 0  }
   0x2   :  { %s4989_s14 = smov 0   ;;  %s4991_s15 = smov 0  }
   0x3   :  { %s4993_s16 = smov 0   ;;  %s4995_s17 = smov 0  }
   0x4 LB: > { %s4319_s18 = sadd.s32 4294967295, %s4951_s17   ;;  %s4320_s19 = sadd.s32 4294967294, %s4951_s17   ;;  %s4951_s17 = sphi %s4995_s17, %s16_s17   ;;  %s4947_s16 = sphi %s4993_s16, %s7511_s16   ;;  %s4943_s15 = sphi %s4991_s15, %s7510_s15   ;;  %s4939_s14 = sphi %s4989_s14, %s7509_s14   ;;  %s4935_s13 = sphi %s4987_s13, %s7508_s13   ;;  %s4931_s12 = sphi %s4985_s12, %s7507_s12  }
   0x5   : > { %s28_s20 = sadd.s32 1, %s4947_s16  ;;  %s105_s21 = sadd.s32 1, %s4939_s14 }
   0x6   : > { %p30_p0 = scmp.ge.s32.totalorder %s28_s20, 2  ;;  %p115_p1 = scmp.ne.s32.totalorder %s4939_s14, %s4935_s13 }
   0x7   : > { %p116_p2 = scmp.eq.s32.totalorder %s4319_s18, 1  ;;  %p121_p3 = scmp.ne.s32.totalorder %s4935_s13, %s4931_s12 }
   0x8   : > { %s7513_s20 = smov (%p30_p0, %s28_s20), 0  ;;  %p122_p5 = scmp.eq.s32.totalorder %s4320_s19, 1 }
   0x9   : > { %p5025_p4 = por %p116_p2, %p115_p1  ;;  %s100_s23 = ssub.s32 %s4947_s16, %s7513_s20 }
   0xa   : > { %p4323_p6 = scmp.ge.s32.totalorder %s4951_s17, 1  ;;  %p103_p7 = scmp.eq.s32.totalorder %s100_s23, 0 }
   0xb   : > { %p5032_p8 = por %p122_p5, %p121_p3  ;;  %p154_p9 = scmp.lt.s32.totalorder %s4951_s17, 3 }
   0xc   : > { %s5038_s25 = scalar_select %p103_p7, %s4939_s14, %s105_s21  }
   0xd   : > { %p155_p10 = pnand %p4323_p6, %p154_p9 }
   0xf   : > { %158 = sbr.rel (%p155_p10) target bundleno = 795 (0x31b), region = 32 }
  0x16   : > { %p178_p11 = scmp.lt.s32.totalorder %s4943_s15, 1  ;;  %vm186_vm0 = vcmask 16384   ;;  %vm187_vm1 = vsmask.f32 256  ;;  %v216_v0 = vld [vmem:[#allocation2 + $0x6c] sm:$0x1] }
  0x17   : > { %vm5042_vm2 = vmand %vm186_vm0, %vm187_vm1  ;;  %vm243_vm3 = vsmask.f32 7938  ;;  %v192_v4 = vld [vmem:[#allocation2 + $0xc] sm:$0x1]  ;;  %v219_v5 = vld [vmem:[#allocation2 + $0x78] sm:$0x1] }
  0x18   : > { %s179_s26 = scalar_select %p178_p11, %s4943_s15, 1  ;;  %v217_v2 = vsel %vm5042_vm2, 0, %v216_v0  ;;  %vm5050_vm4 = vmand %vm186_vm0, %vm243_vm3  ;;  %v193_v6 = vsel %vm5042_vm2, 0, %v192_v4  ;;  %v220_v7 = vsel %vm5042_vm2, 0, %v219_v5  ;;  %v195_v8 = vld [vmem:[#allocation2 + $0x18] sm:$0x1] }
  0x19   : > { %218 = vst [vmem:[#allocation2 + $0x6c] sm:$0x1] %v217_v2  ;;  %v213_v9 = vld [vmem:[#allocation2 + $0x60] sm:$0x1]  ;;  %194 = vst [vmem:[#allocation2 + $0xc] sm:$0x1] %v193_v6 }
  0x1a   : > { %s4613_s27 = sshll.u32 %s179_s26, 8  ;;  %221 = vst [vmem:[#allocation2 + $0x78] sm:$0x1] %v220_v7  ;;  %v196_v10 = vsel %vm5042_vm2, 0, %v195_v8  ;;  %v214_v11 = vsel %vm5042_vm2, 0, %v213_v9  ;;  %vm346_vm6 = vcmask 19456  }
  0x1b   : > { %v269_v12 = vld [vmem:[#allocation2 + $0x68] sm:$0x1]  ;;  %s5065_s30 = scalar_lea.vmem %s7437_s0, %s4613_s27  ;;  %197 = vst [vmem:[#allocation2 + $0x18] sm:$0x1] %v196_v10  ;;  %215 = vst [vmem:[#allocation2 + $0x60] sm:$0x1] %v214_v11 }
  0x1c   : > { %v270_v13 = vsel %vm5050_vm4, 0, %v269_v12  ;;  %v248_v14 = vld [vmem:[#allocation2 + $0x14] sm:$0x1]  ;;  %vm324_vm5 = vsmask.f32 4368  ;;  %v374_v15 = vld [vmem:[%s5065_s30 + $0x80] sm:$0xff]  ;;  %vm5091_vm8 = vmand %vm346_vm6, %vm243_vm3 }
  0x1d   : > { %v375_v16 = vld [vmem:[%s5065_s30 + $0x88] sm:$0xff]  ;;  %v358_v17 = vld [vmem:[%s5065_s30] sm:$0xff]  ;;  %271 = vst [vmem:[#allocation2 + $0x68] sm:$0x1] %v270_v13  ;;  %v249_v18 = vsel %vm5050_vm4, 0, %v248_v14  ;;  %v4632_v19 = vpack.c.bf16 %v374_v15, %v374_v15  ;;  %v376_v23 = vld [vmem:[%s5065_s30 + $0x90] sm:$0xff] }
  0x1e   : > { %v4633_v20 = vpack.c.bf16 %v375_v16, %v375_v16  ;;  %v359_v21 = vld [vmem:[%s5065_s30 + $0x8] sm:$0xff]  ;;  %v4616_v22 = vpack.c.bf16 %v358_v17, %v358_v17  ;;  %v377_v24 = vld [vmem:[%s5065_s30 + $0x98] sm:$0xff]  ;;  %250 = vst [vmem:[#allocation2 + $0x14] sm:$0x1] %v249_v18  ;;  %v4634_v26 = vpack.c.bf16 %v376_v23, %v376_v23  ;;  %v5077_v28 = vmul.f32 0.0, %v358_v17  ;;  %vm5081_vm7 = vmor %vm187_vm1, %vm324_vm5  ;;  %s4953_s4 = smov 9  }
  0x1f   : > { %v4617_v25 = vpack.c.bf16 %v359_v21, %v359_v21  ;;  %v4635_v27 = vpack.c.bf16 %v377_v24, %v377_v24  ;;  %v623_v29 = vshrl.u32 %v4632_v19, 16  ;;  %v626_v30 = vshll.u32 %v4632_v19, 16  ;;  %v360_v53 = vld [vmem:[%s5065_s30 + $0x10] sm:$0xff]  ;;  %v361_v54 = vld [vmem:[%s5065_s30 + $0x18] sm:$0xff]  ;;  %s4954_s5 = smov 6   ;;  %s4955_s6 = smov 15  }
  0x20   : > { %v631_v31 = vshrl.u32 %v4633_v20, 16  ;;  %v634_v32 = vshll.u32 %v4633_v20, 16  ;;  %v487_v33 = vshrl.u32 %v4616_v22, 16  ;;  %v490_v34 = vshll.u32 %v4616_v22, 16  ;;  %v863_v43 = vld [vmem:[#allocation2 + $0x6c] sm:$0xf] }
  0x21   : > { %v495_v35 = vshrl.u32 %v4617_v25, 16  ;;  %v498_v36 = vshll.u32 %v4617_v25, 16  ;;  %v625_v38 = vrot.slane %v623_v29, 7  ;;  %v640_v40 = vshrl.u32 %v4634_v26, 16  ;;  %v807_v51 = vld [vmem:[#allocation2 + $0xc] sm:$0xf] }
  0x22   : > { %v5085_v39 = vrot.slane %v631_v31, 7  ;;  %v5087_v41 = vmul.f32 0.0, %v359_v21  ;;  %v489_v44 = vrot.slane %v487_v33, 7  ;;  %v643_v46 = vshll.u32 %v4634_v26, 16  ;;  %v870_v2 = vld [vmem:[#allocation2 + $0x78] sm:$0xf] }
  0x23   : > { %v497_v45 = vrot.slane %v495_v35, 7  ;;  %v648_v47 = vshrl.u32 %v4635_v27, 16  ;;  %v628_v48 = vor.u32 %v626_v30, %v625_v38  ;;  %v629_v49 = vrot.slane %v625_v38, 4  ;;  %v372_v6 = vld [vmem:[%s5065_s30 + $0x70] sm:$0xff]  ;;  %v373_v7 = vld [vmem:[%s5065_s30 + $0x78] sm:$0xff]  ;;  %s4956_s7 = smov 3  }
  0x24   : > { %v636_v50 = vor.u32 %v634_v32, %v5085_v39  ;;  %v651_v52 = vshll.u32 %v4635_v27, 16  ;;  %v492_v55 = vor.u32 %v490_v34, %v489_v44  ;;  %v493_v56 = vrot.slane %v489_v44, 4  ;;  %v272_v13 = vld [vmem:[#allocation2 + $0x74] sm:$0x1]  ;;  %s4957_s8 = smov 12   ;;  %s4958_s9 = smov 18  }
  0x25   : > { %v500_v57 = vor.u32 %v498_v36, %v497_v45  ;;  %v502_v58 = vrot.slane %v497_v45, 4  ;;  %v864_v60 = vsel %vm5091_vm8, %v628_v48, %v863_v43  ;;  %v642_v61 = vrot.slane %v640_v40, 7  ;;  %v811_v12 = vld [vmem:[#allocation2 + $0x14] sm:$0x1]  ;;  %v814_v40 = vld [vmem:[#allocation2 + $0x18] sm:$0xf] }
  0x26   : > { %v637_v59 = vsel %vm5081_vm7, %v629_v49, %v636_v50  ;;  %v5102_v62 = vrot.slane %v648_v47, 7  ;;  %865 = vst [vmem:[#allocation2 + $0x6c] sm:$0xf] %v864_v60  ;;  %v808_v0 = vsel %vm5091_vm8, %v492_v55, %v807_v51  ;;  %v4618_v4 = vpack.c.bf16 %v360_v53, %v360_v53  ;;  %s4959_s10 = smov 21   ;;  %s4960_s11 = smov 24  }
  0x27   : > { %866 = vst.msk [vmem:[#allocation2 + $0x70] sm:$0xf] %vm346_vm6, %v637_v59  ;;  %v501_v63 = vsel %vm5081_vm7, %v493_v56, %v500_v57  ;;  %v4619_v5 = vpack.c.bf16 %v361_v54, %v361_v54  ;;  %v638_v8 = vrot.slane %v5085_v39, 4  ;;  %809 = vst [vmem:[#allocation2 + $0xc] sm:$0xf] %v808_v0  ;;  %v645_v9 = vor.u32 %v643_v46, %v642_v61  ;;  %s175_s26 = sand.u32 1, %s4935_s13  }
  0x28   : > { %810 = vst.msk [vmem:[#allocation2 + $0x10] sm:$0xf] %vm346_vm6, %v501_v63  ;;  %v646_v10 = vrot.slane %v642_v61, 4  ;;  %v653_v11 = vor.u32 %v651_v52, %v5102_v62  ;;  %v504_v14 = vshrl.u32 %v4618_v4, 16  ;;  %v507_v15 = vshll.u32 %v4618_v4, 16  ;;  %s7226_s29 = sshll.u32 %s175_s26, 7 }
  0x29   : > { %v512_v16 = vshrl.u32 %v4619_v5, 16  ;;  %v515_v17 = vshll.u32 %v4619_v5, 16  ;;  %v871_v19 = vsel %vm5091_vm8, %v645_v9, %v870_v2  ;;  %v5118_v20 = vpack.c.bf16 %v372_v6, %v372_v6  ;;  %v856_v2 = vld [vmem:[#allocation2 + $0x60] sm:$0xf]  ;;  %v860_v9 = vld [vmem:[#allocation2 + $0x68] sm:$0x1] }
  0x2a   : > { %v654_v18 = vsel %vm5081_vm7, %v646_v10, %v653_v11  ;;  %v5120_v21 = vpack.c.bf16 %v373_v7, %v373_v7  ;;  %872 = vst [vmem:[#allocation2 + $0x78] sm:$0xf] %v871_v19  ;;  %v506_v22 = vrot.slane %v504_v14, 7  ;;  %v812_v24 = vsel %vm5042_vm2, %v502_v58, %v811_v12 }
  0x2b   : > { %873 = vst.msk [vmem:[#allocation2 + $0x7c] sm:$0xf] %vm346_vm6, %v654_v18  ;;  %v5123_v23 = vrot.slane %v512_v16, 7  ;;  %v273_v25 = vsel %vm5050_vm4, 0, %v272_v13  ;;  %v655_v26 = vrot.slane %v5102_v62, 4  ;;  %v606_v27 = vshrl.u32 %v5118_v20, 16 }
  0x2c   : > { %v609_v29 = vshll.u32 %v5118_v20, 16  ;;  %v614_v30 = vshrl.u32 %v5120_v21, 16  ;;  %vm1459_vm9 = vcmask 1042432   ;;  %vm1460_vm10 = vcmask 1046532   ;;  %813 = vst [vmem:[#allocation2 + $0x14] sm:$0x1] %v812_v24 }
  0x2d   : > { %274 = vst [vmem:[#allocation2 + $0x74] sm:$0x1] %v273_v25  ;;  %v510_v31 = vrot.slane %v506_v22, 4  ;;  %v517_v32 = vor.u32 %v515_v17, %v5123_v23  ;;  %v519_v33 = vrot.slane %v5123_v23, 4  ;;  %v617_v34 = vshll.u32 %v5120_v21, 16  ;;  %vm5186_vm11 = vmor %vm1459_vm9, %vm1460_vm10 }
  0x2e   : > { %v1590_v35 = vld [vmem:[#allocation2 + $0x6c] sm:$0xf]  ;;  %v5136_v36 = vld [vmem:[#allocation2 + $0x70] sm:$0xf]  ;;  %v509_v38 = vor.u32 %v507_v15, %v506_v22  ;;  %v608_v43 = vrot.slane %v606_v27, 7  ;;  %v616_v44 = vrot.slane %v614_v30, 7  ;;  %v5140_v45 = vpack.c.bf16 %v5077_v28, %v5077_v28 }
  0x2f   : > { %v1824_v46 = vshll.u32 %v5136_v36, 16  ;;  %v1828_v47 = vshrl.u32 %v5136_v36, 16  ;;  %v4469_v48 = vcombine.low %v1590_v35, %v5136_v36  ;;  %v1815_v49 = vshrl.u32 %v1590_v35, 16  ;;  %v1574_v50 = vld [vmem:[#allocation2 + $0xc] sm:$0xf] }
  0x30   : > { %v1818_v51 = vshll.u32 %v1590_v35, 16  ;;  %v5145_v52 = vld [vmem:[#allocation2 + $0x10] sm:$0xf]  ;;  %v1623_v53 = vshrl.u32 %v1574_v50, 16  ;;  %v1626_v54 = vshll.u32 %v1574_v50, 16  ;;  %v518_v55 = vsel %vm5081_vm7, %v510_v31, %v517_v32 }
  0x31   : > { %v5149_v56 = vrot.slane %v1828_v47, 4  ;;  %3095 = vrot.lane.b32.xlu1 %v4469_v48, %s4953_s4  ;;  %v1817_v28 = vrot.slane %v1815_v49, 4  ;;  %v1632_v57 = vshll.u32 %v5145_v52, 16  ;;  %v1636_v58 = vshrl.u32 %v5145_v52, 16  ;;  %817 = vst.msk [vmem:[#allocation2 + $0x1c] sm:$0xf] %vm346_vm6, %v518_v55 }
  0x32   : > { %v1820_v59 = vrot.slane %v1818_v51, 5  ;;  %v4461_v60 = vcombine.low %v1574_v50, %v5145_v52  ;;  %v1625_v61 = vrot.slane %v1623_v53, 4  ;;  %v1628_v63 = vrot.slane %v1626_v54, 5  ;;  %v1592_v0 = vld [vmem:[#allocation2 + $0x78] sm:$0xf] }
  0x33   : > { %v5156_v4 = vld [vmem:[#allocation2 + $0x7c] sm:$0xf]  ;;  %v1839_v5 = vshrl.u32 %v1592_v0, 16  ;;  %v1842_v6 = vshll.u32 %v1592_v0, 16  ;;  %v815_v7 = vsel %vm5091_vm8, %v509_v38, %v814_v40  ;;  %v5160_v10 = vld [vmem:[#allocation2 + $0x10] sm:$0xf]  ;;  %v5164_v11 = vpack.c.bf16 %v5087_v41, %v5087_v41 }
  0x34   : > { %v1821_v12 = vor.u32 %v1820_v59, %v1817_v28  ;;  %v5166_v13 = vrot.slane %v1636_v58, 4  ;;  %3079 = vrot.lane.b32.xlu0 %v4461_v60, %s4953_s4  ;;  %v1629_v14 = vor.u32 %v1628_v63, %v1625_v61  ;;  %v4470_v15 = vcombine.low %v1592_v0, %v5156_v4  ;;  %816 = vst [vmem:[#allocation2 + $0x18] sm:$0xf] %v815_v7  ;;  %v5170_v16 = vld [vmem:[#allocation2 + $0x14] sm:$0x1] }
  0x35   : > { %v1396_v17 = vld [vmem:[#allocation2 + $0xc] sm:$0xe]  ;;  %v5172_v18 = vrot.slane %v1839_v5, 4  ;;  %v1852_v19 = vshrl.u32 %v5156_v4, 16  ;;  %v611_v20 = vor.u32 %v609_v29, %v608_v43  ;;  %v612_v21 = vrot.slane %v608_v43, 4 }
  0x36   : > { %v867_v41 = vld [vmem:[#allocation2 + $0x74] sm:$0x1]  ;;  %v5175_v22 = vrot.slane %v1821_v12, 4  ;;  %v5177_v24 = vrot.slane %v1842_v6, 5  ;;  %3097 = vrot.lane.b32.xlu1 %v4470_v15, %s4953_s4  ;;  %v619_v25 = vor.u32 %v617_v34, %v616_v44  ;;  %v621_v27 = vrot.slane %v616_v44, 4 }
  0x37   : > { %v5180_v30 = vld [vmem:[#allocation2 + $0x70] sm:$0xf]  ;;  %v857_v31 = vsel %vm5091_vm8, %v611_v20, %v856_v2  ;;  %v4366_v29 = vrot.slane %v1396_v17, 9  ;;  %v1471_v35 = vrot.slane %v5160_v10, 5  ;;  %v1474_v38 = vrot.slane %v5170_v16, 5 }
  0x38   : > { %v1404_v40 = vld [vmem:[#allocation2 + $0x6c] sm:$0xe]  ;;  %v5192_v43 = vld [vmem:[#allocation2 + $0x1c] sm:$0xf]  ;;  %v620_v34 = vsel %vm5081_vm7, %v612_v21, %v619_v25  ;;  %858 = vst [vmem:[#allocation2 + $0x60] sm:$0xf] %v857_v31  ;;  %v861_v44 = vsel %vm5042_vm2, %v621_v27, %v860_v9  ;;  %v868_v47 = vsel %vm5042_vm2, %v638_v8, %v867_v41 }
  0x39   : > { %v4374_v48 = vrot.slane %v1404_v40, 9  ;;  %v5202_v49 = vld [vmem:[#allocation2 + $0x14] sm:$0x1]  ;;  %v5204_v50 = vrot.slane %v1629_v14, 4  ;;  %v1660_v51 = vshrl.u32 %v5192_v43, 16  ;;  %v1473_v53 = vrot.slane %v1471_v35, 4 }
  0x3a   : > { %859 = vst.msk [vmem:[#allocation2 + $0x64] sm:$0xf] %vm346_vm6, %v620_v34  ;;  %862 = vst [vmem:[#allocation2 + $0x68] sm:$0x1] %v861_v44  ;;  %v1527_v54 = vrot.slane %v5180_v30, 5  ;;  %v1472_v39 = vsel %vm5186_vm11, %v4366_v29, %v1471_v35  ;;  %v2072_v58 = vrot.slane %v5145_v52, 5 }
  0x3b   : > { %869 = vst [vmem:[#allocation2 + $0x74] sm:$0x1] %v868_v47  ;;  %v2006_v55 = vld [vmem:[#allocation2 + $0xc] sm:$0xe]  ;;  %v189_v28 = vld [vmem:[#allocation2] sm:$0x1]  ;;  %v1475_v63 = vsel %vm5186_vm11, %v1473_v53, %v1474_v38 }
  0x3c   : > { %v4381_v8 = vrot.slane %v2006_v55, 9  ;;  %v2014_v59 = vld [vmem:[#allocation2 + $0x6c] sm:$0xe]  ;;  %v2128_v60 = vrot.slane %v5136_v36, 5  ;;  %v1576_v61 = vld [vmem:[#allocation2 + $0x18] sm:$0xf]  ;;  %v5217_v0 = vsel %vm5186_vm11, %v4374_v48, %v1527_v54  ;;  %v4446_v15 = vcombine.low %v1472_v39, %v1475_v63 }
  0x3d   : > { %v1529_v2 = vrot.slane %v1527_v54, 4  ;;  %v2075_v5 = vrot.slane %v5202_v49, 5  ;;  %v245_v6 = vld [vmem:[#allocation2 + $0x8] sm:$0x1]  ;;  %v1647_v7 = vshrl.u32 %v1576_v61, 16  ;;  %v1650_v9 = vshll.u32 %v1576_v61, 16 }
  0x3e   : > { %v4462_v12 = vcombine.low %v1576_v61, %v5192_v43  ;;  %v4389_v14 = vrot.slane %v2014_v59, 9  ;;  %v2073_v17 = vsel %vm5186_vm11, %v4381_v8, %v2072_v58  ;;  %v2074_v20 = vrot.slane %v2072_v58, 4  ;;  %v5232_v29 = vld [vmem:[#allocation2 + $0x78] sm:$0xf]  ;;  %v5234_v35 = vld [vmem:[#allocation2 + $0x7c] sm:$0xf] }
  0x3f   : > { %v2130_v21 = vrot.slane %v2128_v60, 4  ;;  %v5223_v41 = vrot.slane %v1647_v7, 4  ;;  %v5225_v25 = vrot.slane %v1650_v9, 5  ;;  %v190_v27 = vsel %vm5042_vm2, 0, %v189_v28  ;;  %v1403_v38 = vld [vmem:[#allocation2 + $0x60] sm:$0xe] }
  0x40   : > { %3081 = vrot.lane.b32.xlu0 %v4462_v12, %s4953_s4  ;;  %v246_v31 = vsel %vm5050_vm4, 0, %v245_v6  ;;  %v2076_v40 = vsel %vm5186_vm11, %v2074_v20, %v2075_v5  ;;  %191 = vst [vmem:[#allocation2] sm:$0x1] %v190_v27  ;;  %v327_v34 = vshrl.u32 %v5140_v45, 16  ;;  %v330_v44 = vshll.u32 %v5140_v45, 16 }
  0x41   : > { %247 = vst [vmem:[#allocation2 + $0x8] sm:$0x1] %v246_v31  ;;  %v335_v47 = vshrl.u32 %v5164_v11, 16  ;;  %v5241_v48 = vld [vmem:[#allocation2 + $0x64] sm:$0xf]  ;;  %v4373_v54 = vrot.slane %v1403_v38, 9  ;;  %v4493_v55 = vcombine.low %v2073_v17, %v2076_v40  ;;  %v5247_v28 = vsel %vm5186_vm11, %v4389_v14, %v2128_v60 }
  0x42   : > { %v5243_v53 = vld [vmem:[#allocation2 + $0x68] sm:$0x1]  ;;  %v338_v39 = vshll.u32 %v5164_v11, 16  ;;  %v1520_v8 = vrot.slane %v5241_v48, 5  ;;  %v5252_v59 = vld [vmem:[#allocation2 + $0x74] sm:$0x1]  ;;  %v1653_v61 = vor.u32 %v5225_v25, %v5223_v41  ;;  %v1845_v63 = vor.u32 %v5177_v24, %v5172_v18 }
  0x43   : > { %v1523_v58 = vrot.slane %v5243_v53, 5  ;;  %v5254_v45 = vld [vmem:[#allocation2 + $0x74] sm:$0x1]  ;;  %v1530_v60 = vrot.slane %v5252_v59, 5  ;;  %v329_v5 = vrot.slane %v327_v34, 7  ;;  %v337_v6 = vrot.slane %v335_v47, 7 }
  0x44   : > { %2985 = vrot.lane.b32.xlu0 %v4446_v15, %s4954_s5  ;;  %v2131_v11 = vrot.slane %v5254_v45, 5  ;;  %v1521_v7 = vsel %vm5186_vm11, %v4373_v54, %v1520_v8  ;;  %v1522_v9 = vrot.slane %v1520_v8, 4  ;;  %v962_v12 = vld [vmem:[#allocation2 + $0xc] sm:$0xf]  ;;  %vm1008_vm12 = vsmask.f32 3328 }
  0x45   : > { %v4517_v14 = vcombine.low %v5232_v29, %v5234_v35  ;;  %v1531_v17 = vsel %vm5186_vm11, %v1529_v2, %v1530_v60  ;;  %v332_v20 = vor.u32 %v330_v44, %v329_v5  ;;  %v333_v27 = vrot.slane %v329_v5, 4  ;;  %v976_v34 = vld [vmem:[#allocation2 + $0x60] sm:$0xf]  ;;  %v2015_v25 = vld [vmem:[#allocation2 + $0x78] sm:$0xe] }
  0x46   : > { %v5271_v15 = vsel %vm5186_vm11, %v2130_v21, %v2131_v11  ;;  %v1524_v31 = vsel %vm5186_vm11, %v1522_v9, %v1523_v58  ;;  %v4454_v38 = vcombine.low %v5217_v0, %v1531_v17  ;;  %v340_v40 = vor.u32 %v338_v39, %v337_v6  ;;  %v978_v17 = vld [vmem:[#allocation2 + $0x6c] sm:$0xf]  ;;  %v275_v36 = vld [vmem:[#allocation2 + $0x80] sm:$0x1] }
  0x47   : > { %vm1009_vm13 = vsmask.f32 7440  ;;  %v4453_v47 = vcombine.low %v1521_v7, %v1524_v31  ;;  %v4501_v2 = vcombine.low %v5247_v28, %v5271_v15  ;;  %v342_v54 = vrot.slane %v337_v6, 4  ;;  %v348_v21 = vld [vmem:[#allocation2] sm:$0xf] }
  0x48   : > { %3239 = vrot.lane.b32.xlu0 %v4493_v55, %s4955_s6  ;;  %v353_v8 = vld [vmem:[#allocation2 + $0x8] sm:$0x1]  ;;  %v1036_v44 = vshrl.u32 %v962_v12, 16  ;;  %v341_v60 = vsel %vm5081_vm7, %v333_v27, %v340_v40  ;;  %v349_v0 = vsel %vm5091_vm8, %v332_v20, %v348_v21  ;;  %v1039_v39 = vshll.u32 %v962_v12, 16  ;;  %vm5298_vm14 = vmor %vm1008_vm12, %vm1009_vm13 }
  0x49   : > { %v1045_v58 = vshll.u32 %v5160_v10, 16  ;;  %2999 = vrot.lane.b32.xlu1 %v4453_v47, %s4954_s5  ;;  %350 = vst [vmem:[#allocation2] sm:$0xf] %v349_v0  ;;  %352 = vst.msk [vmem:[#allocation2 + $0x4] sm:$0xf] %vm346_vm6, %v341_v60  ;;  %v354_v55 = vsel %vm5042_vm2, %v342_v54, %v353_v8  ;;  %v1049_v11 = vshrl.u32 %v5160_v10, 16 }
  0x4a   : > { %v1038_v28 = vrot.slane %v1036_v44, 4  ;;  %v1055_v5 = vshll.u32 %v5170_v16, 16  ;;  %355 = vst [vmem:[#allocation2 + $0x8] sm:$0x1] %v354_v55  ;;  %v1041_v6 = vrot.slane %v1039_v39, 5  ;;  %v1204_v9 = vshrl.u32 %v976_v34, 16 }
  0x4b   : > { %v1047_v7 = vrot.slane %v1045_v58, 5  ;;  %v1207_v12 = vshll.u32 %v976_v34, 16  ;;  %v1051_v15 = vrot.slane %v1049_v11, 4  ;;  %v1213_v27 = vshll.u32 %v5241_v48, 16  ;;  %v5293_v10 = vld [vmem:[#allocation2 + $0x18] sm:$0xf] }
  0x4c   : > { %v1057_v20 = vrot.slane %v1055_v5, 5  ;;  %v1217_v31 = vshrl.u32 %v5241_v48, 16  ;;  %v1042_v40 = vor.u32 %v1041_v6, %v1038_v28  ;;  %v1206_v47 = vrot.slane %v1204_v9, 4  ;;  %v5302_v48 = vld [vmem:[#allocation2 + $0x1c] sm:$0xf] }
  0x4d   : > { %v1209_v54 = vrot.slane %v1207_v12, 5  ;;  %v1223_v21 = vshll.u32 %v5243_v53, 16  ;;  %3001 = vrot.lane.b32.xlu1 %v4454_v38, %s4954_s5  ;;  %v1052_v34 = vor.u32 %v1051_v15, %v1047_v7  ;;  %v1215_v8 = vrot.slane %v1213_v27, 5 }
  0x4e   : > { %v1219_v44 = vrot.slane %v1217_v31, 4  ;;  %v1228_v60 = vshrl.u32 %v978_v17, 16  ;;  %v1043_v0 = vrot.slane %v1042_v40, 4  ;;  %v1231_v53 = vshll.u32 %v978_v17, 16 }
  0x4f   : > { %v1210_v39 = vor.u32 %v1209_v54, %v1206_v47  ;;  %v1225_v58 = vrot.slane %v1223_v21, 5  ;;  %v1053_v55 = vrot.slane %v1052_v34, 4  ;;  %v1237_v38 = vshll.u32 %v5180_v30, 16 }
  0x50   : > { %v1220_v28 = vor.u32 %v1219_v44, %v1215_v8  ;;  %v1230_v11 = vrot.slane %v1228_v60, 4  ;;  %v5305_v5 = vld [vmem:[#allocation2 + $0x4] sm:$0xf]  ;;  %v1395_v6 = vld [vmem:[#allocation2] sm:$0xe]  ;;  %v1048_v9 = vsel %vm5298_vm14, %v1043_v0, %v1047_v7  ;;  %v1233_v15 = vrot.slane %v1231_v53, 5 }
  0x51   : > { %v1211_v12 = vrot.slane %v1210_v39, 4  ;;  %3255 = vrot.lane.b32.xlu1 %v4501_v2, %s4955_s6  ;;  %v5312_v31 = vld [vmem:[#allocation2 + $0x8] sm:$0x1]  ;;  %v4365_v17 = vrot.slane %v1395_v6, 9  ;;  %v1464_v40 = vrot.slane %v5305_v5, 5  ;;  %v1058_v47 = vsel %vm5298_vm14, %v1053_v55, %v1057_v20 }
  0x52   : > { %v1221_v54 = vrot.slane %v1220_v28, 4  ;;  %v1467_v21 = vrot.slane %v5312_v31, 5  ;;  %v4430_v34 = vcombine.low %v1048_v9, %v1058_v47  ;;  %v1234_v44 = vor.u32 %v1233_v15, %v1230_v11  ;;  %v251_v53 = vld [vmem:[#allocation2 + $0x20] sm:$0x1] }
  0x53   : > { %v1216_v7 = vsel %vm5298_vm14, %v1211_v12, %v1215_v8  ;;  %v1465_v60 = vsel %vm5186_vm11, %v4365_v17, %v1464_v40  ;;  %v1466_v2 = vrot.slane %v1464_v40, 4  ;;  %v1239_v39 = vrot.slane %v1237_v38, 5  ;;  %v378_v47 = vld [vmem:[%s5065_s30 + $0xa0] sm:$0xff] }
  0x54   : > { %v1226_v0 = vsel %vm5298_vm14, %v1221_v54, %v1225_v58  ;;  %v1235_v27 = vrot.slane %v1234_v44, 4  ;;  %v1241_v20 = vshrl.u32 %v5180_v30, 16  ;;  %v1247_v55 = vshll.u32 %v5252_v59, 16 }
  0x55   : > { %v4437_v6 = vcombine.low %v1216_v7, %v1226_v0  ;;  %v1468_v28 = vsel %vm5186_vm11, %v1466_v2, %v1467_v21  ;;  %2905 = vrot.lane.b32.xlu1 %v4430_v34, %s4956_s7  ;;  %v1634_v8 = vrot.slane %v1632_v57, 5  ;;  %v1642_v11 = vshll.u32 %v5202_v49, 16  ;;  %v2007_v34 = vld [vmem:[#allocation2 + $0x18] sm:$0xe] }
  0x56   : > { %v1826_v58 = vrot.slane %v1824_v46, 5  ;;  %v4445_v38 = vcombine.low %v1465_v60, %v1468_v28  ;;  %v1240_v30 = vsel %vm5298_vm14, %v1235_v27, %v1239_v39  ;;  %v1243_v9 = vrot.slane %v1241_v20, 4 }
  0x57   : > { %v1249_v59 = vrot.slane %v1247_v55, 5  ;;  %v1635_v12 = vsel %vm5298_vm14, %v5204_v50, %v1634_v8  ;;  %v1639_v15 = vor.u32 %v5166_v13, %v1634_v8  ;;  %v1644_v52 = vrot.slane %v1642_v11, 5 }
  0x58   : > { %v1827_v57 = vsel %vm5298_vm14, %v5175_v22, %v1826_v58  ;;  %2983 = vrot.lane.b32.xlu0 %v4445_v38, %s4954_s5  ;;  %v1244_v46 = vor.u32 %v1243_v9, %v1239_v39  ;;  %v1831_v49 = vor.u32 %v5149_v56, %v1826_v58  ;;  %v1834_v27 = vshll.u32 %v5254_v45, 16  ;;  %v960_v39 = vld [vmem:[#allocation2] sm:$0xf] }
  0x59   : > { %v252_v17 = vsel %vm5050_vm4, 0, %v251_v53  ;;  %v1640_v40 = vrot.slane %v1639_v15, 4  ;;  %v5351_v13 = vrot.slane %v1653_v61, 4  ;;  %v1656_v22 = vshll.u32 %v5192_v43, 16 }
  0x5a   : > { %253 = vst [vmem:[#allocation2 + $0x20] sm:$0x1] %v252_v17  ;;  %v1662_v50 = vrot.slane %v1660_v51, 4  ;;  %v1245_v54 = vrot.slane %v1244_v46, 4  ;;  %v1832_v56 = vrot.slane %v1831_v49, 4  ;;  %v1836_v21 = vrot.slane %v1834_v27, 5 }
  0x5b   : > { %v276_v45 = vsel %vm5050_vm4, 0, %v275_v36  ;;  %v1645_v7 = vsel %vm5298_vm14, %v1640_v40, %v1644_v52  ;;  %v5361_v44 = vrot.slane %v1656_v22, 5  ;;  %v5366_v41 = vrot.slane %v1845_v63, 4 }
  0x5c   : > { %277 = vst [vmem:[#allocation2 + $0x80] sm:$0x1] %v276_v45  ;;  %v1848_v51 = vshll.u32 %v5156_v4, 16  ;;  %2919 = vrot.lane.b32.xlu0 %v4437_v6, %s4956_s7  ;;  %v1250_v61 = vsel %vm5298_vm14, %v1245_v54, %v1249_v59  ;;  %v4477_v60 = vcombine.low %v1635_v12, %v1645_v7  ;;  %v1837_v2 = vsel %vm5298_vm14, %v1832_v56, %v1836_v21  ;;  %v379_v56 = vld [vmem:[%s5065_s30 + $0xa8] sm:$0xff] }
  0x5d   : > { %v1854_v0 = vrot.slane %v1852_v19, 4  ;;  %v4438_v53 = vcombine.low %v1240_v30, %v1250_v61  ;;  %v4485_v18 = vcombine.low %v1827_v57, %v1837_v2  ;;  %v1663_v24 = vor.u32 %v1662_v50, %v5361_v44 }
  0x5e   : > { %v5377_v63 = vpack.c.bf16 %v378_v47, %v378_v47  ;;  %v5379_v20 = vrot.slane %v1848_v51, 5  ;;  %v4382_v6 = vrot.slane %v2007_v34, 9  ;;  %v2079_v55 = vrot.slane %v5192_v43, 5 }
  0x5f   : > { %v4390_v28 = vrot.slane %v2015_v25, 9  ;;  %2921 = vrot.lane.b32.xlu1 %v4438_v53, %s4956_s7  ;;  %v1659_v19 = vsel %vm5298_vm14, %v5351_v13, %v5361_v44  ;;  %v2135_v8 = vrot.slane %v5156_v4, 5  ;;  %v1012_v11 = vshrl.u32 %v960_v39, 16  ;;  %v198_v25 = vld [vmem:[#allocation2 + $0x24] sm:$0x1] }
  0x60   : > { %v1015_v58 = vshll.u32 %v960_v39, 16  ;;  %3159 = vrot.lane.b32.xlu0 %v4477_v60, %s4957_s8  ;;  %v5389_v30 = vrot.slane %v1663_v24, 4  ;;  %v1851_v43 = vsel %vm5298_vm14, %v5366_v41, %v5379_v20  ;;  %v1855_v9 = vor.u32 %v1854_v0, %v5379_v20  ;;  %v362_v39 = vld [vmem:[%s5065_s30 + $0x20] sm:$0xff] }
  0x61   : > { %v818_v38 = vld [vmem:[#allocation2 + $0x20] sm:$0x1]  ;;  %v5398_v59 = vsel %vm5186_vm11, %v4382_v6, %v2079_v55  ;;  %v2081_v12 = vrot.slane %v2079_v55, 4  ;;  %v5406_v15 = vsel %vm5186_vm11, %v4390_v28, %v2135_v8  ;;  %v1014_v52 = vrot.slane %v1012_v11, 4 }
  0x62   : > { %v819_v4 = vsel %vm5042_vm2, %v519_v33, %v818_v38  ;;  %v2137_v36 = vrot.slane %v2135_v8, 4  ;;  %v1017_v46 = vrot.slane %v1015_v58, 5  ;;  %v1021_v49 = vshll.u32 %v5305_v5, 16 }
  0x63   : > { %820 = vst [vmem:[#allocation2 + $0x20] sm:$0x1] %v819_v4  ;;  %v874_v57 = vld [vmem:[#allocation2 + $0x80] sm:$0x1]  ;;  %v1025_v27 = vshrl.u32 %v5305_v5, 16  ;;  %3175 = vrot.lane.b32.xlu1 %v4485_v18, %s4957_s8  ;;  %v1031_v33 = vshll.u32 %v5312_v31, 16  ;;  %v4637_v2 = vpack.c.bf16 %v379_v56, %v379_v56 }
  0x64   : > { %v875_v23 = vsel %vm5042_vm2, %v655_v26, %v874_v57  ;;  %v2424_v17 = vshrl.u32 %v5232_v29, 16  ;;  %v2427_v40 = vshll.u32 %v5232_v29, 16  ;;  %v5418_v22 = vrot.slane %v1855_v9, 4  ;;  %v222_v5 = vld [vmem:[#allocation2 + $0x84] sm:$0x1] }
  0x65   : > { %876 = vst [vmem:[#allocation2 + $0x80] sm:$0x1] %v875_v23  ;;  %v1018_v50 = vor.u32 %v1017_v46, %v1014_v52  ;;  %v1023_v47 = vrot.slane %v1021_v49, 5  ;;  %v1027_v54 = vrot.slane %v1025_v27, 4  ;;  %v1033_v21 = vrot.slane %v1031_v33, 5  ;;  %v363_v52 = vld [vmem:[%s5065_s30 + $0x28] sm:$0xff] }
  0x66   : > { %v5421_v62 = vrot.slane %v2424_v17, 4  ;;  %v2437_v26 = vshrl.u32 %v5234_v35, 16  ;;  %v2232_v31 = vshrl.u32 %v5293_v10, 16  ;;  %v5425_v7 = vrot.slane %v2427_v40, 5 }
  0x67   : > { %v1019_v45 = vrot.slane %v1018_v50, 4  ;;  %v1028_v34 = vor.u32 %v1027_v54, %v1023_v47  ;;  %v2235_v51 = vshll.u32 %v5293_v10, 16  ;;  %v2245_v61 = vshrl.u32 %v5302_v48, 16 }
  0x68   : > { %v223_v60 = vsel %vm5042_vm2, 0, %v222_v5  ;;  %v657_v0 = vshrl.u32 %v5377_v63, 16  ;;  %v5435_v24 = vrot.slane %v2232_v31, 4  ;;  %v660_v6 = vshll.u32 %v5377_v63, 16 }
  0x69   : > { %v1024_v53 = vsel %vm5298_vm14, %v1019_v45, %v1023_v47  ;;  %v1029_v18 = vrot.slane %v1028_v34, 4  ;;  %224 = vst [vmem:[#allocation2 + $0x84] sm:$0x1] %v223_v60  ;;  %v665_v8 = vshrl.u32 %v4637_v2, 16  ;;  %v668_v11 = vshll.u32 %v4637_v2, 16 }
  0x6a   : > { %v1607_v55 = vld [vmem:[#allocation2 + $0x20] sm:$0x1]  ;;  %v659_v28 = vrot.slane %v657_v0, 7  ;;  %v199_v58 = vsel %vm5042_vm2, 0, %v198_v25  ;;  %v4620_v57 = vpack.c.bf16 %v362_v39, %v362_v39  ;;  %v2237_v49 = vrot.slane %v2235_v51, 5 }
  0x6b   : > { %v1666_v38 = vshll.u32 %v1607_v55, 16  ;;  %v2082_v9 = vrot.slane %v1607_v55, 5  ;;  %v1034_v4 = vsel %vm5298_vm14, %v1029_v18, %v1033_v21  ;;  %200 = vst [vmem:[#allocation2 + $0x24] sm:$0x1] %v199_v58  ;;  %v5443_v63 = vrot.slane %v665_v8, 7 }
  0x6c   : > { %v1615_v46 = vld [vmem:[#allocation2 + $0x80] sm:$0x1]  ;;  %v662_v27 = vor.u32 %v660_v6, %v659_v28  ;;  %v663_v23 = vrot.slane %v659_v28, 4  ;;  %v5448_v54 = vcombine.low %v1024_v53, %v1034_v4  ;;  %v4621_v56 = vpack.c.bf16 %v363_v52, %v363_v52 }
  0x6d   : > { %v1668_v33 = vrot.slane %v1666_v38, 5  ;;  %v1858_v17 = vshll.u32 %v1615_v46, 16  ;;  %v2083_v40 = vsel %vm5186_vm11, %v2081_v12, %v2082_v9  ;;  %v2138_v50 = vrot.slane %v1615_v46, 5  ;;  %v5470_v13 = vld [vmem:[#allocation2 + $0x80] sm:$0x1] }
  0x6e   : > { %v4494_v47 = vcombine.low %v5398_v59, %v2083_v40  ;;  %v670_v5 = vor.u32 %v668_v11, %v5443_v63  ;;  %v521_v34 = vshrl.u32 %v4620_v57, 16  ;;  %v524_v60 = vshll.u32 %v4620_v57, 16  ;;  %v254_v38 = vld [vmem:[#allocation2 + $0x2c] sm:$0x1] }
  0x6f   : > { %v1669_v21 = vsel %vm5298_vm14, %v5389_v30, %v1668_v33  ;;  %v1860_v31 = vrot.slane %v1858_v17, 5  ;;  %v2139_v45 = vsel %vm5186_vm11, %v2137_v36, %v2138_v50  ;;  %v529_v0 = vshrl.u32 %v4621_v56, 16 }
  0x70   : > { %v4478_v59 = vcombine.low %v1659_v19, %v1669_v21  ;;  %v4502_v12 = vcombine.low %v5406_v15, %v2139_v45  ;;  %v671_v51 = vsel %vm5081_vm7, %v663_v23, %v670_v5  ;;  %v877_v25 = vld [vmem:[#allocation2 + $0x84] sm:$0xf]  ;;  %v523_v2 = vrot.slane %v521_v34, 7 }
  0x71   : > { %v1861_v30 = vsel %vm5298_vm14, %v5418_v22, %v1860_v31  ;;  %v878_v36 = vsel %vm5091_vm8, %v662_v27, %v877_v25  ;;  %880 = vst.msk [vmem:[#allocation2 + $0x88] sm:$0xf] %vm346_vm6, %v671_v51  ;;  %v532_v19 = vshll.u32 %v4621_v56, 16  ;;  %v2430_v22 = vor.u32 %v5425_v7, %v5421_v62  ;;  %v2615_v51 = vld [vmem:[#allocation2 + $0x18] sm:$0xe] }
  0x72   : > { %3161 = vrot.lane.b32.xlu0 %v4478_v59, %s4957_s8  ;;  %v4486_v44 = vcombine.low %v1851_v43, %v1861_v30  ;;  %879 = vst [vmem:[#allocation2 + $0x84] sm:$0xf] %v878_v36  ;;  %v821_v15 = vld [vmem:[#allocation2 + $0x24] sm:$0xf]  ;;  %v2433_v39 = vshll.u32 %v5234_v35, 16  ;;  %v526_v53 = vor.u32 %v524_v60, %v523_v2  ;;  %v527_v18 = vrot.slane %v523_v2, 4 }
  0x73   : > { %v5481_v6 = vrot.slane %v529_v0, 7  ;;  %v2439_v55 = vrot.slane %v2437_v26, 4  ;;  %v2431_v28 = vrot.slane %v2430_v22, 4  ;;  %v2443_v20 = vshll.u32 %v5470_v13, 16  ;;  %v5487_v43 = vld [vmem:[#allocation2 + $0x20] sm:$0x1] }
  0x74   : > { %3177 = vrot.lane.b32.xlu1 %v4486_v44, %s4957_s8  ;;  %v2435_v41 = vrot.slane %v2433_v39, 5  ;;  %v2238_v8 = vor.u32 %v2237_v49, %v5435_v24  ;;  %v672_v62 = vrot.slane %v5443_v63, 4  ;;  %v822_v11 = vsel %vm5091_vm8, %v526_v53, %v821_v15  ;;  %v278_v26 = vld [vmem:[#allocation2 + $0x8c] sm:$0x1]  ;;  %v2623_v24 = vld [vmem:[#allocation2 + $0x78] sm:$0xe] }
  0x75   : > { %v534_v7 = vor.u32 %v532_v19, %v5481_v6  ;;  %v2241_v58 = vshll.u32 %v5302_v48, 16  ;;  %v536_v9 = vrot.slane %v5481_v6, 4  ;;  %823 = vst [vmem:[#allocation2 + $0x24] sm:$0xf] %v822_v11  ;;  %v2445_v52 = vrot.slane %v2443_v20, 5 }
  0x76   : > { %3241 = vrot.lane.b32.xlu0 %v4494_v47, %s4955_s6  ;;  %v2440_v4 = vor.u32 %v2439_v55, %v2435_v41  ;;  %v2239_v57 = vrot.slane %v2238_v8, 4  ;;  %v2247_v27 = vrot.slane %v2245_v61, 4  ;;  %v2251_v23 = vshll.u32 %v5487_v43, 16 }
  0x77   : > { %v535_v46 = vsel %vm5081_vm7, %v527_v18, %v534_v7  ;;  %v2243_v49 = vrot.slane %v2241_v58, 5  ;;  %v2436_v17 = vsel %vm5298_vm14, %v2431_v28, %v2435_v41  ;;  %v279_v50 = vsel %vm5050_vm4, 0, %v278_v26 }
  0x78   : > { %3257 = vrot.lane.b32.xlu1 %v4502_v12, %s4955_s6  ;;  %v5503_v33 = vld [vmem:[#allocation2 + $0x88] sm:$0xf]  ;;  %824 = vst.msk [vmem:[#allocation2 + $0x28] sm:$0xf] %vm346_vm6, %v535_v46  ;;  %v2441_v40 = vrot.slane %v2440_v4, 4  ;;  %v255_v47 = vsel %vm5050_vm4, 0, %v254_v38  ;;  %v7459_v18 = vcombine.low %v5293_v10, %v5302_v48 }
  0x79   : > { %v2201_v5 = vld [vmem:[#allocation2 + $0x84] sm:$0xf]  ;;  %v2461_v61 = vshrl.u32 %v5503_v33, 16  ;;  %v2248_v56 = vor.u32 %v2247_v27, %v2243_v49  ;;  %v2253_v21 = vrot.slane %v2251_v23, 5  ;;  %280 = vst [vmem:[#allocation2 + $0x8c] sm:$0x1] %v279_v50  ;;  %v2244_v12 = vsel %vm5298_vm14, %v2239_v57, %v2243_v49 }
  0x7a   : > { %256 = vst [vmem:[#allocation2 + $0x2c] sm:$0x1] %v255_v47  ;;  %v4405_v31 = vrot.slane %v2623_v24, 9  ;;  %2903 = vrot.lane.b32.xlu0 %v5448_v54, %s4956_s7  ;;  %v2448_v45 = vshrl.u32 %v2201_v5, 16  ;;  %v2451_v34 = vshll.u32 %v2201_v5, 16  ;;  %v2446_v59 = vsel %vm5298_vm14, %v2441_v40, %v2445_v52 }
  0x7b   : > { %v4518_v25 = vcombine.low %v2201_v5, %v5503_v33  ;;  %v2249_v60 = vrot.slane %v2248_v56, 4  ;;  %v2457_v30 = vshll.u32 %v5503_v33, 16  ;;  %v2463_v36 = vrot.slane %v2461_v61, 4  ;;  %v980_v24 = vld [vmem:[#allocation2 + $0x78] sm:$0xf] }
  0x7c   : > { %3351 = vrot.lane.b32.xlu1 %v4517_v14, %s4958_s9  ;;  %v2450_v54 = vrot.slane %v2448_v45, 4  ;;  %v2453_v2 = vrot.slane %v2451_v34, 5  ;;  %v4533_v0 = vcombine.low %v2436_v17, %v2446_v59  ;;  %v2737_v44 = vrot.slane %v5234_v35, 5  ;;  %v2185_v19 = vld [vmem:[#allocation2 + $0x24] sm:$0xf] }
  0x7d   : > { %v2254_v15 = vsel %vm5298_vm14, %v2249_v60, %v2253_v21  ;;  %v5528_v22 = vrot.slane %v2457_v30, 5  ;;  %v2740_v39 = vrot.slane %v5470_v13, 5  ;;  %v4397_v53 = vrot.slane %v2615_v51, 9  ;;  %v5564_v27 = vld [vmem:[#allocation2 + $0x7c] sm:$0xf] }
  0x7e   : > { %3335 = vrot.lane.b32.xlu0 %v7459_v18, %s4958_s9  ;;  %v2256_v29 = vshrl.u32 %v2185_v19, 16  ;;  %v2259_v14 = vshll.u32 %v2185_v19, 16  ;;  %v2454_v55 = vor.u32 %v2453_v2, %v2450_v54  ;;  %v2681_v28 = vrot.slane %v5302_v48, 5  ;;  %v5566_v23 = vld [vmem:[#allocation2 + $0x80] sm:$0x1] }
  0x7f   : > { %v5536_v35 = vld [vmem:[#allocation2 + $0x28] sm:$0xf]  ;;  %v4525_v41 = vcombine.low %v2244_v12, %v2254_v15  ;;  %v2464_v20 = vor.u32 %v2463_v36, %v5528_v22  ;;  %v5541_v8 = vsel %vm5186_vm11, %v4405_v31, %v2737_v44  ;;  %v2739_v13 = vrot.slane %v2737_v44, 4  ;;  %v964_v34 = vld [vmem:[#allocation2 + $0x18] sm:$0xf] }
  0x80   : > { %3353 = vrot.lane.b32.xlu1 %v4518_v25, %s4958_s9  ;;  %v2258_v7 = vrot.slane %v2256_v29, 4  ;;  %v2261_v10 = vrot.slane %v2259_v14, 5  ;;  %v2269_v11 = vshrl.u32 %v5536_v35, 16  ;;  %v4510_v58 = vcombine.low %v2185_v19, %v5536_v35  ;;  %v881_v26 = vld [vmem:[#allocation2 + $0x8c] sm:$0x1] }
  0x81   : > { %v882_v48 = vsel %vm5042_vm2, %v672_v62, %v881_v26  ;;  %v5550_v38 = vrot.slane %v2454_v55, 4  ;;  %v825_v4 = vld [vmem:[#allocation2 + $0x2c] sm:$0x1]  ;;  %v2265_v52 = vshll.u32 %v5536_v35, 16  ;;  %v5555_v57 = vsel %vm5186_vm11, %v4397_v53, %v2681_v28  ;;  %v5590_v25 = vld [vmem:[#allocation2 + $0x1c] sm:$0xf] }
  0x82   : > { %3337 = vrot.lane.b32.xlu0 %v4510_v58, %s4958_s9  ;;  %883 = vst [vmem:[#allocation2 + $0x8c] sm:$0x1] %v882_v48  ;;  %v5558_v46 = vrot.slane %v2464_v20, 4  ;;  %v826_v63 = vsel %vm5042_vm2, %v536_v9, %v825_v4  ;;  %v2262_v62 = vor.u32 %v2261_v10, %v2258_v7  ;;  %v2271_v49 = vrot.slane %v2269_v11, 4  ;;  %v5592_v60 = vld [vmem:[#allocation2 + $0x20] sm:$0x1] }
  0x83   : > { %v2460_v17 = vsel %vm5298_vm14, %v5550_v38, %v5528_v22  ;;  %827 = vst [vmem:[#allocation2 + $0x2c] sm:$0x1] %v826_v63  ;;  %v5572_v40 = vrot.slane %v2265_v52, 5  ;;  %v5576_v6 = vsel %vm5186_vm11, %v2739_v13, %v2740_v39  ;;  %v2683_v50 = vrot.slane %v2681_v28, 4  ;;  %v2624_v22 = vld [vmem:[#allocation2 + $0x84] sm:$0xe] }
  0x84   : > { %3431 = vrot.lane.b32.xlu1 %v4533_v0, %s4959_s10  ;;  %v2263_v9 = vrot.slane %v2262_v62, 4  ;;  %v2684_v47 = vrot.slane %v5487_v43, 5  ;;  %v1252_v5 = vshrl.u32 %v980_v24, 16  ;;  %v1255_v61 = vshll.u32 %v980_v24, 16 }
  0x85   : > { %v2272_v56 = vor.u32 %v2271_v49, %v5572_v40  ;;  %v1261_v21 = vshll.u32 %v5564_v27, 16  ;;  %v1265_v31 = vshrl.u32 %v5564_v27, 16  ;;  %v1271_v45 = vshll.u32 %v5566_v23, 16 }
  0x86   : > { %3415 = vrot.lane.b32.xlu0 %v4525_v41, %s4959_s10  ;;  %v2268_v59 = vsel %vm5298_vm14, %v2263_v9, %v5572_v40  ;;  %v4549_v43 = vcombine.low %v5541_v8, %v5576_v6  ;;  %v1254_v12 = vrot.slane %v1252_v5, 4  ;;  %v1257_v51 = vrot.slane %v1255_v61, 5 }
  0x87   : > { %v2273_v30 = vrot.slane %v2272_v56, 4  ;;  %v5596_v36 = vsel %vm5186_vm11, %v2683_v50, %v2684_v47  ;;  %v1263_v54 = vrot.slane %v1261_v21, 5  ;;  %v1267_v2 = vrot.slane %v1265_v31, 4  ;;  %v2616_v47 = vld [vmem:[#allocation2 + $0x24] sm:$0xe] }
  0x88   : > { %v1258_v0 = vor.u32 %v1257_v51, %v1254_v12  ;;  %v1273_v44 = vrot.slane %v1271_v45, 5  ;;  %v1060_v19 = vshrl.u32 %v964_v34, 16  ;;  %v1063_v15 = vshll.u32 %v964_v34, 16  ;;  %v982_v21 = vld [vmem:[#allocation2 + $0x84] sm:$0xf] }
  0x89   : > { %v2224_v39 = vld [vmem:[#allocation2 + $0x8c] sm:$0x1]  ;;  %v1268_v53 = vor.u32 %v1267_v2, %v1263_v54  ;;  %v1069_v18 = vshll.u32 %v5590_v25, 16  ;;  %v1073_v29 = vshrl.u32 %v5590_v25, 16  ;;  %v1079_v14 = vshll.u32 %v5592_v60, 16 }
  0x8a   : > { %v2467_v55 = vshll.u32 %v2224_v39, 16  ;;  %v5601_v28 = vld [vmem:[#allocation2 + $0x2c] sm:$0x1]  ;;  %v1259_v41 = vrot.slane %v1258_v0, 4  ;;  %v1062_v20 = vrot.slane %v1060_v19, 4  ;;  %v1065_v13 = vrot.slane %v1063_v15, 5 }
  0x8b   : > { %v2275_v7 = vshll.u32 %v5601_v28, 16  ;;  %v1269_v10 = vrot.slane %v1268_v53, 4  ;;  %v1071_v11 = vrot.slane %v1069_v18, 5  ;;  %v1075_v58 = vrot.slane %v1073_v29, 4  ;;  %v5622_v12 = vld [vmem:[#allocation2 + $0x88] sm:$0xf] }
  0x8c   : > { %v2469_v26 = vrot.slane %v2467_v55, 5  ;;  %v4541_v48 = vcombine.low %v5555_v57, %v5596_v36  ;;  %v1264_v38 = vsel %vm5298_vm14, %v1259_v41, %v1263_v54  ;;  %v1066_v4 = vor.u32 %v1065_v13, %v1062_v20  ;;  %v1405_v53 = vld [vmem:[#allocation2 + $0x78] sm:$0xe]  ;;  %v5638_v55 = vld [vmem:[#allocation2 + $0x28] sm:$0xf] }
  0x8d   : > { %v2277_v52 = vrot.slane %v2275_v7, 5  ;;  %v1076_v24 = vor.u32 %v1075_v58, %v1071_v11  ;;  %v1081_v63 = vrot.slane %v1079_v14, 5  ;;  %v4406_v62 = vrot.slane %v2624_v22, 9  ;;  %v5646_v20 = vld [vmem:[#allocation2 + $0x2c] sm:$0x1] }
  0x8e   : > { %v2470_v49 = vsel %vm5298_vm14, %v5558_v46, %v2469_v26  ;;  %v1274_v40 = vsel %vm5298_vm14, %v1269_v10, %v1273_v44  ;;  %v1067_v50 = vrot.slane %v1066_v4, 4  ;;  %v2744_v9 = vrot.slane %v5503_v33, 5  ;;  %v966_v44 = vld [vmem:[#allocation2 + $0x24] sm:$0xf] }
  0x8f   : > { %v4534_v57 = vcombine.low %v2460_v17, %v2470_v49  ;;  %v2278_v5 = vsel %vm5298_vm14, %v2273_v30, %v2277_v52  ;;  %v1077_v61 = vrot.slane %v1076_v24, 4  ;;  %v2747_v56 = vrot.slane %v2224_v39, 5 }
  0x90   : > { %v4526_v31 = vcombine.low %v2268_v59, %v2278_v5  ;;  %v1072_v45 = vsel %vm5298_vm14, %v1067_v50, %v1071_v11  ;;  %v5620_v46 = vsel %vm5186_vm11, %v4406_v62, %v2744_v9  ;;  %v2746_v34 = vrot.slane %v2744_v9, 4  ;;  %v5628_v59 = vld [vmem:[#allocation2 + $0x8c] sm:$0x1]  ;;  %v1397_v50 = vld [vmem:[#allocation2 + $0x18] sm:$0xe] }
  0x91   : > { %3433 = vrot.lane.b32.xlu1 %v4534_v57, %s4959_s10  ;;  %v4439_v33 = vcombine.low %v1264_v38, %v1274_v40  ;;  %v1082_v17 = vsel %vm5298_vm14, %v1077_v61, %v1081_v63  ;;  %v4398_v51 = vrot.slane %v2616_v47, 9  ;;  %v2688_v30 = vrot.slane %v5536_v35, 5 }
  0x92   : > { %3417 = vrot.lane.b32.xlu0 %v4526_v31, %s4959_s10  ;;  %v2748_v36 = vsel %vm5186_vm11, %v2746_v34, %v2747_v56  ;;  %v2691_v54 = vrot.slane %v5601_v28, 5  ;;  %v1276_v2 = vshrl.u32 %v982_v21, 16  ;;  %v1279_v0 = vshll.u32 %v982_v21, 16 }
  0x93   : > { %v4431_v19 = vcombine.low %v1072_v45, %v1082_v17  ;;  %v4550_v15 = vcombine.low %v5620_v46, %v2748_v36  ;;  %v2690_v22 = vrot.slane %v2688_v30, 4  ;;  %v1285_v39 = vshll.u32 %v5622_v12, 16  ;;  %v1406_v45 = vld [vmem:[#allocation2 + $0x84] sm:$0xe] }
  0x94   : > { %v1278_v35 = vrot.slane %v1276_v2, 4  ;;  %v1281_v18 = vrot.slane %v1279_v0, 5  ;;  %v1289_v29 = vshrl.u32 %v5622_v12, 16  ;;  %v1295_v14 = vshll.u32 %v5628_v59, 16  ;;  %v1398_v17 = vld [vmem:[#allocation2 + $0x24] sm:$0xe] }
  0x95   : > { %3511 = vrot.lane.b32.xlu1 %v4549_v43, %s4960_s11  ;;  %v2689_v28 = vsel %vm5186_vm11, %v4398_v51, %v2688_v30  ;;  %v1287_v41 = vrot.slane %v1285_v39, 5  ;;  %v1084_v13 = vshrl.u32 %v966_v44, 16  ;;  %v1087_v7 = vshll.u32 %v966_v44, 16  ;;  %v5674_v0 = vld [vmem:[#allocation2 + $0x84] sm:$0xf] }
  0x96   : > { %3495 = vrot.lane.b32.xlu0 %v4541_v48, %s4960_s11  ;;  %v2692_v10 = vsel %vm5186_vm11, %v2690_v22, %v2691_v54  ;;  %v1282_v11 = vor.u32 %v1281_v18, %v1278_v35  ;;  %v1291_v58 = vrot.slane %v1289_v29, 4  ;;  %v1297_v26 = vrot.slane %v1295_v14, 5  ;;  %v5684_v29 = vld [vmem:[#allocation2 + $0x24] sm:$0xf] }
  0x97   : > { %v1086_v38 = vrot.slane %v1084_v13, 4  ;;  %v1089_v4 = vrot.slane %v1087_v7, 5  ;;  %v1093_v8 = vshll.u32 %v5638_v55, 16  ;;  %v1097_v6 = vshrl.u32 %v5638_v55, 16 }
  0x98   : > { %v1283_v43 = vrot.slane %v1282_v11, 4  ;;  %v1292_v52 = vor.u32 %v1291_v58, %v1287_v41  ;;  %v1103_v24 = vshll.u32 %v5646_v20, 16  ;;  %v4375_v63 = vrot.slane %v1405_v53, 9 }
  0x99   : > { %2923 = vrot.lane.b32.xlu1 %v4439_v33, %s4956_s7  ;;  %v1090_v48 = vor.u32 %v1089_v4, %v1086_v38  ;;  %v1095_v62 = vrot.slane %v1093_v8, 5  ;;  %v1099_v49 = vrot.slane %v1097_v6, 4  ;;  %v1534_v40 = vrot.slane %v5564_v27, 5  ;;  %v380_v4 = vld [vmem:[%s5065_s30 + $0xb0] sm:$0xff]  ;;  %v381_v8 = vld [vmem:[%s5065_s30 + $0xb8] sm:$0xff] }
  0x9a   : > { %2907 = vrot.lane.b32.xlu0 %v4431_v19, %s4956_s7  ;;  %v4542_v9 = vcombine.low %v2689_v28, %v2692_v10  ;;  %v1288_v47 = vsel %vm5298_vm14, %v1283_v43, %v1287_v41  ;;  %v1293_v57 = vrot.slane %v1292_v52, 4  ;;  %v1537_v5 = vrot.slane %v5566_v23, 5  ;;  %v5687_v41 = vld [vmem:[#allocation2 + $0x88] sm:$0xf]  ;;  %v225_v10 = vld [vmem:[#allocation2 + $0x90] sm:$0x1] }
  0x9b   : > { %v1091_v61 = vrot.slane %v1090_v48, 4  ;;  %v1100_v56 = vor.u32 %v1099_v49, %v1095_v62  ;;  %v1105_v21 = vrot.slane %v1103_v24, 5  ;;  %v1536_v31 = vrot.slane %v1534_v40, 4  ;;  %v364_v48 = vld [vmem:[%s5065_s30 + $0x30] sm:$0xff] }
  0x9c   : > { %v1298_v46 = vsel %vm5298_vm14, %v1293_v57, %v1297_v26  ;;  %v4367_v34 = vrot.slane %v1397_v50, 9  ;;  %v1478_v27 = vrot.slane %v5590_v25, 5  ;;  %v1481_v33 = vrot.slane %v5592_v60, 5  ;;  %v5698_v26 = vld [vmem:[#allocation2 + $0x28] sm:$0xf] }
  0x9d   : > { %3513 = vrot.lane.b32.xlu1 %v4550_v15, %s4960_s11  ;;  %v4440_v51 = vcombine.low %v1288_v47, %v1298_v46  ;;  %v1096_v23 = vsel %vm5298_vm14, %v1091_v61, %v1095_v62  ;;  %v1101_v30 = vrot.slane %v1100_v56, 4  ;;  %v1535_v36 = vsel %vm5186_vm11, %v4375_v63, %v1534_v40  ;;  %v201_v63 = vld [vmem:[#allocation2 + $0x30] sm:$0x1]  ;;  %v365_v62 = vld [vmem:[%s5065_s30 + $0x38] sm:$0xff] }
  0x9e   : > { %3497 = vrot.lane.b32.xlu0 %v4542_v9, %s4960_s11  ;;  %v1538_v54 = vsel %vm5186_vm11, %v1536_v31, %v1537_v5  ;;  %v1479_v25 = vsel %vm5186_vm11, %v4367_v34, %v1478_v27  ;;  %v1480_v60 = vrot.slane %v1478_v27, 4  ;;  %v4376_v2 = vrot.slane %v1406_v45, 9 }
  0x9f   : > { %v1106_v44 = vsel %vm5298_vm14, %v1101_v30, %v1105_v21  ;;  %v1541_v19 = vrot.slane %v5622_v12, 5  ;;  %v1544_v15 = vrot.slane %v5628_v59, 5  ;;  %v4368_v22 = vrot.slane %v1398_v17, 9 }
  0xa0   : > { %v4432_v39 = vcombine.low %v1096_v23, %v1106_v44  ;;  %v1482_v53 = vsel %vm5186_vm11, %v1480_v60, %v1481_v33  ;;  %v1485_v35 = vrot.slane %v5638_v55, 5  ;;  %v1488_v18 = vrot.slane %v5646_v20, 5 }
  0xa1   : > { %2925 = vrot.lane.b32.xlu1 %v4440_v51, %s4956_s7  ;;  %v4455_v14 = vcombine.low %v1535_v36, %v1538_v54  ;;  %v4447_v28 = vcombine.low %v1479_v25, %v1482_v53  ;;  %v1543_v12 = vrot.slane %v1541_v19, 4  ;;  %v1863_v59 = vshrl.u32 %v5674_v0, 16  ;;  %v5720_v36 = vld [vmem:[#allocation2 + $0x8c] sm:$0x1] }
  0xa2   : > { %2909 = vrot.lane.b32.xlu0 %v4432_v39, %s4956_s7  ;;  %v1542_v55 = vsel %vm5186_vm11, %v4376_v2, %v1541_v19  ;;  %v1486_v20 = vsel %vm5186_vm11, %v4368_v22, %v1485_v35  ;;  %v1487_v13 = vrot.slane %v1485_v35, 4  ;;  %v1866_v7 = vshll.u32 %v5674_v0, 16 }
  0xa3   : > { %v1545_v11 = vsel %vm5186_vm11, %v1543_v12, %v1544_v15  ;;  %v1865_v58 = vrot.slane %v1863_v59, 4  ;;  %v1671_v38 = vshrl.u32 %v5684_v29, 16  ;;  %v1876_v52 = vshrl.u32 %v5687_v41, 16  ;;  %v281_v12 = vld [vmem:[#allocation2 + $0x98] sm:$0x1] }
  0xa4   : > { %v1489_v6 = vsel %vm5186_vm11, %v1487_v13, %v1488_v18  ;;  %v1868_v43 = vrot.slane %v1866_v7, 5  ;;  %v4471_v24 = vcombine.low %v5674_v0, %v5687_v41  ;;  %v4456_v49 = vcombine.low %v1542_v55, %v1545_v11  ;;  %v257_v59 = vld [vmem:[#allocation2 + $0x38] sm:$0x1] }
  0xa5   : > { %3003 = vrot.lane.b32.xlu1 %v4455_v14, %s4954_s5  ;;  %v4448_v40 = vcombine.low %v1486_v20, %v1489_v6  ;;  %v1673_v50 = vrot.slane %v1671_v38, 4  ;;  %v1674_v9 = vshll.u32 %v5684_v29, 16  ;;  %v4463_v47 = vcombine.low %v5684_v29, %v5698_v26 }
  0xa6   : > { %2987 = vrot.lane.b32.xlu0 %v4447_v28, %s4954_s5  ;;  %v226_v57 = vsel %vm5042_vm2, 0, %v225_v10  ;;  %v4638_v5 = vpack.c.bf16 %v380_v4, %v380_v4  ;;  %v4639_v61 = vpack.c.bf16 %v381_v8, %v381_v8  ;;  %v202_v56 = vsel %vm5042_vm2, 0, %v201_v63  ;;  %v5737_v10 = vld [vmem:[#allocation2 + $0x2c] sm:$0x1] }
  0xa7   : > { %227 = vst [vmem:[#allocation2 + $0x90] sm:$0x1] %v226_v57  ;;  %v4622_v21 = vpack.c.bf16 %v364_v48, %v364_v48  ;;  %v4623_v31 = vpack.c.bf16 %v365_v62, %v365_v62  ;;  %v1869_v45 = vor.u32 %v1868_v43, %v1865_v58  ;;  %203 = vst [vmem:[#allocation2 + $0x30] sm:$0x1] %v202_v56  ;;  %v1676_v54 = vrot.slane %v1674_v9, 5 }
  0xa8   : > { %v674_v46 = vshrl.u32 %v4638_v5, 16  ;;  %v677_v34 = vshll.u32 %v4638_v5, 16  ;;  %v682_v27 = vshrl.u32 %v4639_v61, 16  ;;  %v685_v33 = vshll.u32 %v4639_v61, 16  ;;  %v2016_v43 = vld [vmem:[#allocation2 + $0x84] sm:$0xe] }
  0xa9   : > { %3005 = vrot.lane.b32.xlu1 %v4456_v49, %s4954_s5  ;;  %v538_v17 = vshrl.u32 %v4622_v21, 16  ;;  %v541_v51 = vshll.u32 %v4622_v21, 16  ;;  %v546_v23 = vshrl.u32 %v4623_v31, 16  ;;  %v549_v30 = vshll.u32 %v4623_v31, 16  ;;  %v2008_v62 = vld [vmem:[#allocation2 + $0x24] sm:$0xe] }
  0xaa   : > { %2989 = vrot.lane.b32.xlu0 %v4448_v40, %s4954_s5  ;;  %v676_v25 = vrot.slane %v674_v46, 7  ;;  %v5723_v60 = vrot.slane %v682_v27, 7  ;;  %v1872_v2 = vshll.u32 %v5687_v41, 16  ;;  %v1684_v0 = vshrl.u32 %v5698_v26, 16  ;;  %v228_v56 = vld [vmem:[#allocation2 + $0x9c] sm:$0x1] }
  0xab   : > { %v540_v44 = vrot.slane %v538_v17, 7  ;;  %v5727_v19 = vrot.slane %v546_v23, 7  ;;  %v1878_v15 = vrot.slane %v1876_v52, 4  ;;  %v1882_v35 = vshll.u32 %v5720_v36, 16 }
  0xac   : > { %v679_v22 = vor.u32 %v677_v34, %v676_v25  ;;  %v680_v39 = vrot.slane %v676_v25, 4  ;;  %v687_v53 = vor.u32 %v685_v33, %v5723_v60  ;;  %v1870_v28 = vrot.slane %v1869_v45, 4 }
  0xad   : > { %3099 = vrot.lane.b32.xlu1 %v4471_v24, %s4953_s4  ;;  %v543_v18 = vor.u32 %v541_v51, %v540_v44  ;;  %v544_v29 = vrot.slane %v540_v44, 4  ;;  %v551_v14 = vor.u32 %v549_v30, %v5727_v19  ;;  %v689_v20 = vrot.slane %v5723_v60, 4 }
  0xae   : > { %3083 = vrot.lane.b32.xlu0 %v4463_v47, %s4953_s4  ;;  %v688_v55 = vsel %vm5081_vm7, %v680_v39, %v687_v53  ;;  %v884_v13 = vld [vmem:[#allocation2 + $0x90] sm:$0xf]  ;;  %v1874_v7 = vrot.slane %v1872_v2, 5  ;;  %v1677_v11 = vor.u32 %v1676_v54, %v1673_v50  ;;  %v1680_v8 = vshll.u32 %v5698_v26, 16 }
  0xaf   : > { %v885_v58 = vsel %vm5091_vm8, %v679_v22, %v884_v13  ;;  %887 = vst.msk [vmem:[#allocation2 + $0x94] sm:$0xf] %vm346_vm6, %v688_v55  ;;  %v552_v38 = vsel %vm5081_vm7, %v544_v29, %v551_v14  ;;  %v828_v4 = vld [vmem:[#allocation2 + $0x30] sm:$0xf]  ;;  %v1686_v6 = vrot.slane %v1684_v0, 4  ;;  %v1884_v63 = vrot.slane %v1882_v35, 5 }
  0xb0   : > { %886 = vst [vmem:[#allocation2 + $0x90] sm:$0xf] %v885_v58  ;;  %v829_v52 = vsel %vm5091_vm8, %v543_v18, %v828_v4  ;;  %831 = vst.msk [vmem:[#allocation2 + $0x34] sm:$0xf] %vm346_vm6, %v552_v38  ;;  %v1879_v24 = vor.u32 %v1878_v15, %v1874_v7  ;;  %v1678_v48 = vrot.slane %v1677_v11, 4  ;;  %v1682_v49 = vrot.slane %v1680_v8, 5 }
  0xb1   : > { %830 = vst [vmem:[#allocation2 + $0x30] sm:$0xf] %v829_v52  ;;  %v1690_v40 = vshll.u32 %v5737_v10, 16  ;;  %v282_v50 = vsel %vm5050_vm4, 0, %v281_v12  ;;  %v258_v9 = vsel %vm5050_vm4, 0, %v257_v59  ;;  %v4391_v57 = vrot.slane %v2016_v43, 9  ;;  %v5789_v12 = vpop.permute.xlu1 %3095  ;;  %v5799_v43 = vpop.permute.xlu0 %3079 }
  0xb2   : > { %v1880_v47 = vrot.slane %v1879_v24, 4  ;;  %283 = vst [vmem:[#allocation2 + $0x98] sm:$0x1] %v282_v50  ;;  %259 = vst [vmem:[#allocation2 + $0x38] sm:$0x1] %v258_v9  ;;  %v2142_v5 = vrot.slane %v5687_v41, 5  ;;  %v1875_v21 = vsel %vm5298_vm14, %v1870_v28, %v1874_v7  ;;  %v1687_v31 = vor.u32 %v1686_v6, %v1682_v49 }
  0xb3   : > { %v2145_v61 = vrot.slane %v5720_v36, 5  ;;  %v1692_v45 = vrot.slane %v1690_v40, 5  ;;  %v4383_v46 = vrot.slane %v2008_v62, 9  ;;  %v553_v34 = vrot.slane %v5727_v19, 4  ;;  %v382_v28 = vld [vmem:[%s5065_s30 + $0xc0] sm:$0xff] }
  0xb4   : > { %v1885_v27 = vsel %vm5298_vm14, %v1880_v47, %v1884_v63  ;;  %v2144_v33 = vrot.slane %v2142_v5, 4  ;;  %v2086_v17 = vrot.slane %v5698_v26, 5  ;;  %v1683_v41 = vsel %vm5298_vm14, %v1678_v48, %v1682_v49  ;;  %v4829_v52 = vld [vmem:[%s7438_s1] sm:$0xff]  }
  0xb5   : > { %v1688_v51 = vrot.slane %v1687_v31, 4  ;;  %v5765_v23 = vsel %vm5186_vm11, %v4391_v57, %v2142_v5  ;;  %v229_v30 = vsel %vm5042_vm2, 0, %v228_v56  ;;  %v4487_v54 = vcombine.low %v1875_v21, %v1885_v27  ;;  %4701 = vmatprep.subr.bf16.mxu0 %v4829_v52  ;;  %4737 = vmatprep.subr.bf16.mxu1 %v4829_v52 }
  0xb6   : > { %v5769_v36 = vld [vmem:[#allocation2 + $0x94] sm:$0xf]  ;;  %v5773_v25 = vsel %vm5186_vm11, %v2144_v33, %v2145_v61  ;;  %v2088_v26 = vrot.slane %v2086_v17, 4  ;;  %v2089_v2 = vrot.slane %v5737_v10, 5  ;;  %230 = vst [vmem:[#allocation2 + $0x9c] sm:$0x1] %v229_v30  ;;  %v5784_v39 = vsel %vm5186_vm11, %v4383_v46, %v2086_v17  ;;  %4702 = vmatpush3.bf16.msra.mxu0 %v4829_v52  ;;  %4739 = vmatpush3.bf16.msra.mxu1 %v4829_v52  ;;  %v5819_v46 = vpop.permute.xlu1 %3097 }
  0xb7   : > { %v1596_v0 = vld [vmem:[#allocation2 + $0x90] sm:$0xf]  ;;  %v1900_v44 = vshrl.u32 %v5769_v36, 16  ;;  %v5777_v19 = vld [vmem:[#allocation2 + $0x34] sm:$0xf]  ;;  %v1693_v15 = vsel %vm5298_vm14, %v1688_v51, %v1692_v45  ;;  %v1896_v22 = vshll.u32 %v5769_v36, 16  ;;  %v5810_v9 = vpack.c.bf16 %v382_v28, %v382_v28 }
  0xb8   : > { %v1887_v53 = vshrl.u32 %v1596_v0, 16  ;;  %v1890_v35 = vshll.u32 %v1596_v0, 16  ;;  %v4472_v18 = vcombine.low %v1596_v0, %v5769_v36  ;;  %v1580_v29 = vld [vmem:[#allocation2 + $0x30] sm:$0xf]  ;;  %v1708_v14 = vshrl.u32 %v5777_v19, 16 }
  0xb9   : > { %v1695_v59 = vshrl.u32 %v1580_v29, 16  ;;  %v1698_v55 = vshll.u32 %v1580_v29, 16  ;;  %v4464_v13 = vcombine.low %v1580_v29, %v5777_v19  ;;  %v4479_v7 = vcombine.low %v1683_v41, %v1693_v15  ;;  %v888_v10 = vld [vmem:[#allocation2 + $0x98] sm:$0x1]  ;;  %v2017_v6 = vld [vmem:[#allocation2 + $0x90] sm:$0xe] }
  0xba   : > { %v832_v11 = vld [vmem:[#allocation2 + $0x38] sm:$0x1]  ;;  %v1889_v58 = vrot.slane %v1887_v53, 4  ;;  %v1892_v38 = vrot.slane %v1890_v35, 5  ;;  %3101 = vrot.lane.b32.xlu1 %v4472_v18, %s4953_s4  ;;  %v889_v4 = vsel %vm5042_vm2, %v689_v20, %v888_v10  ;;  %v5797_v8 = vrot.slane %v1896_v22, 5 }
  0xbb   : > { %v1697_v24 = vrot.slane %v1695_v59, 4  ;;  %v1700_v63 = vrot.slane %v1698_v55, 5  ;;  %3085 = vrot.lane.b32.xlu0 %v4464_v13, %s4953_s4  ;;  %890 = vst [vmem:[#allocation2 + $0x98] sm:$0x1] %v889_v4  ;;  %v1902_v48 = vrot.slane %v1900_v44, 4  ;;  %v833_v60 = vsel %vm5042_vm2, %v553_v34, %v832_v11  ;;  %v383_v4 = vld [vmem:[%s5065_s30 + $0xc8] sm:$0xff] }
  0xbc   : > { %v2009_v62 = vld [vmem:[#allocation2 + $0x30] sm:$0xe]  ;;  %v1893_v20 = vor.u32 %v1892_v38, %v1889_v58  ;;  %834 = vst [vmem:[#allocation2 + $0x38] sm:$0x1] %v833_v60  ;;  %v1704_v49 = vshll.u32 %v5777_v19, 16  ;;  %v1710_v40 = vrot.slane %v1708_v14, 4  ;;  %v5815_v5 = vsel %vm5186_vm11, %v2088_v26, %v2089_v2  ;;  %v5833_v26 = vpop.permute.xlu0 %3081 }
  0xbd   : > { %v5808_v50 = vld [vmem:[#allocation2 + $0x90] sm:$0xf]  ;;  %v1903_v47 = vor.u32 %v1902_v48, %v5797_v8  ;;  %v1701_v57 = vor.u32 %v1700_v63, %v1697_v24  ;;  %v4392_v61 = vrot.slane %v2017_v6, 9  ;;  %v2149_v31 = vrot.slane %v5769_v36, 5  ;;  %v5845_v15 = vld [vmem:[#allocation2 + $0x94] sm:$0xf] }
  0xbe   : > { %3179 = vrot.lane.b32.xlu1 %v4487_v54, %s4957_s8  ;;  %v1894_v56 = vrot.slane %v1893_v20, 4  ;;  %v1706_v21 = vrot.slane %v1704_v49, 5  ;;  %v4384_v45 = vrot.slane %v2009_v62, 9  ;;  %v4503_v27 = vcombine.low %v5765_v23, %v5773_v25  ;;  %v5831_v54 = vld [vmem:[#allocation2 + $0x30] sm:$0xf] }
  0xbf   : > { %3163 = vrot.lane.b32.xlu0 %v4479_v7, %s4957_s8  ;;  %v1702_v34 = vrot.slane %v1701_v57, 4  ;;  %v2093_v33 = vrot.slane %v5777_v19, 5  ;;  %v2472_v17 = vshrl.u32 %v5808_v50, 16  ;;  %v1904_v51 = vrot.slane %v1903_v47, 4  ;;  %v5847_v22 = vld [vmem:[#allocation2 + $0x34] sm:$0xf] }
  0xc0   : > { %v1899_v41 = vsel %vm5298_vm14, %v1894_v56, %v5797_v8  ;;  %v1711_v30 = vor.u32 %v1710_v40, %v1706_v21  ;;  %v4495_v36 = vcombine.low %v5784_v39, %v5815_v5  ;;  %v5839_v0 = vsel %vm5186_vm11, %v4392_v61, %v2149_v31  ;;  %v5858_v8 = vpop.permute.xlu1 %2999  ;;  %v204_v48 = vld [vmem:[#allocation2 + $0x3c] sm:$0x1]  ;;  %v5871_v40 = vpop.permute.xlu0 %2985 }
  0xc1   : > { %v1707_v2 = vsel %vm5298_vm14, %v1702_v34, %v1706_v21  ;;  %v2151_v44 = vrot.slane %v2149_v31, 4  ;;  %v5843_v19 = vsel %vm5186_vm11, %v4384_v45, %v2093_v33  ;;  %v2095_v18 = vrot.slane %v2093_v33, 4  ;;  %v366_v21 = vld [vmem:[%s5065_s30 + $0x40] sm:$0xff]  ;;  %v367_v31 = vld [vmem:[%s5065_s30 + $0x48] sm:$0xff] }
  0xc2   : > { %v1617_v53 = vld [vmem:[#allocation2 + $0x98] sm:$0x1]  ;;  %v1712_v35 = vrot.slane %v1711_v30, 4  ;;  %v5849_v29 = vrot.slane %v2472_v17, 4  ;;  %v2475_v14 = vshll.u32 %v5808_v50, 16  ;;  %v2280_v13 = vshrl.u32 %v5831_v54, 16 }
  0xc3   : > { %v1906_v28 = vshll.u32 %v1617_v53, 16  ;;  %v1609_v59 = vld [vmem:[#allocation2 + $0x38] sm:$0x1]  ;;  %v2152_v55 = vrot.slane %v1617_v53, 5  ;;  %v2283_v7 = vshll.u32 %v5831_v54, 16  ;;  %v2485_v58 = vshrl.u32 %v5845_v15, 16 }
  0xc4   : > { %v1714_v10 = vshll.u32 %v1609_v59, 16  ;;  %v2096_v11 = vrot.slane %v1609_v59, 5  ;;  %v4519_v38 = vcombine.low %v5808_v50, %v5845_v15  ;;  %v2477_v24 = vrot.slane %v2475_v14, 5  ;;  %v891_v14 = vld [vmem:[#allocation2 + $0x9c] sm:$0xf]  ;;  %v5891_v59 = vpop.permute.xlu1 %3001 }
  0xc5   : > { %v1908_v6 = vrot.slane %v1906_v28, 5  ;;  %v5862_v52 = vsel %vm5186_vm11, %v2151_v44, %v2152_v55  ;;  %v2293_v63 = vshrl.u32 %v5847_v22, 16  ;;  %v5867_v20 = vrot.slane %v2280_v13, 4  ;;  %v5896_v13 = vld [vmem:[#allocation2 + $0x98] sm:$0x1] }
  0xc6   : > { %v1716_v60 = vrot.slane %v1714_v10, 5  ;;  %v4504_v62 = vcombine.low %v5839_v0, %v5862_v52  ;;  %v5869_v49 = vrot.slane %v2283_v7, 5  ;;  %v5877_v57 = vsel %vm5186_vm11, %v2095_v18, %v2096_v11 }
  0xc7   : > { %v1909_v47 = vsel %vm5298_vm14, %v1904_v51, %v1908_v6  ;;  %v4641_v61 = vpack.c.bf16 %v383_v4, %v383_v4  ;;  %v691_v56 = vshrl.u32 %v5810_v9, 16  ;;  %v694_v33 = vshll.u32 %v5810_v9, 16 }
  0xc8   : > { %v4488_v45 = vcombine.low %v1899_v41, %v1909_v47  ;;  %v1717_v34 = vsel %vm5298_vm14, %v1712_v35, %v1716_v60  ;;  %v205_v17 = vsel %vm5042_vm2, 0, %v204_v48  ;;  %v4511_v18 = vcombine.low %v5831_v54, %v5847_v22  ;;  %v5899_v48 = vpop.permute.xlu0 %3239 }
  0xc9   : > { %v4480_v30 = vcombine.low %v1707_v2, %v1717_v34  ;;  %v693_v51 = vrot.slane %v691_v56, 7  ;;  %v699_v44 = vshrl.u32 %v4641_v61, 16  ;;  %v702_v53 = vshll.u32 %v4641_v61, 16  ;;  %206 = vst [vmem:[#allocation2 + $0x3c] sm:$0x1] %v205_v17 }
  0xca   : > { %3181 = vrot.lane.b32.xlu1 %v4488_v45, %s4957_s8  ;;  %v4624_v41 = vpack.c.bf16 %v366_v21, %v366_v21  ;;  %v4625_v28 = vpack.c.bf16 %v367_v31, %v367_v31  ;;  %v2481_v35 = vshll.u32 %v5845_v15, 16  ;;  %v2478_v7 = vor.u32 %v2477_v24, %v5849_v29  ;;  %v284_v45 = vld [vmem:[#allocation2 + $0xa4] sm:$0x1] }
  0xcb   : > { %3165 = vrot.lane.b32.xlu0 %v4480_v30, %s4957_s8  ;;  %v696_v9 = vor.u32 %v694_v33, %v693_v51  ;;  %v697_v2 = vrot.slane %v693_v51, 4  ;;  %v5894_v55 = vrot.slane %v699_v44, 7  ;;  %v4496_v60 = vcombine.low %v5843_v19, %v5877_v57  ;;  %v5919_v57 = vld [vmem:[#allocation2 + $0x38] sm:$0x1]  ;;  %v5926_v30 = vpop.permute.xlu1 %3255 }
  0xcc   : > { %v555_v10 = vshrl.u32 %v4624_v41, 16  ;;  %v558_v11 = vshll.u32 %v4624_v41, 16  ;;  %v563_v4 = vshrl.u32 %v4625_v28, 16  ;;  %v566_v6 = vshll.u32 %v4625_v28, 16  ;;  %v5938_v28 = vpop.permute.xlu0 %2983 }
  0xcd   : > { %v704_v47 = vor.u32 %v702_v53, %v5894_v55  ;;  %v892_v61 = vsel %vm5091_vm8, %v696_v9, %v891_v14  ;;  %v2487_v56 = vrot.slane %v2485_v58, 4  ;;  %v2483_v21 = vrot.slane %v2481_v35, 5 }
  0xce   : > { %3259 = vrot.lane.b32.xlu1 %v4503_v27, %s4955_s6  ;;  %893 = vst [vmem:[#allocation2 + $0x9c] sm:$0xf] %v892_v61  ;;  %v557_v29 = vrot.slane %v555_v10, 7  ;;  %v5910_v24 = vrot.slane %v563_v4, 7  ;;  %v2491_v31 = vshll.u32 %v5896_v13, 16  ;;  %v2479_v58 = vrot.slane %v2478_v7, 4 }
  0xcf   : > { %3243 = vrot.lane.b32.xlu0 %v4495_v36, %s4955_s6  ;;  %v705_v19 = vsel %vm5081_vm7, %v697_v2, %v704_v47  ;;  %v2286_v23 = vor.u32 %v5869_v49, %v5867_v20  ;;  %v2289_v25 = vshll.u32 %v5847_v22, 16  ;;  %v260_v27 = vld [vmem:[#allocation2 + $0x44] sm:$0x1]  ;;  %v2295_v5 = vrot.slane %v2293_v63, 4  ;;  %v2625_v36 = vld [vmem:[#allocation2 + $0x90] sm:$0xe] }
  0xd0   : > { %894 = vst.msk [vmem:[#allocation2 + $0xa0] sm:$0xf] %vm346_vm6, %v705_v19  ;;  %v560_v34 = vor.u32 %v558_v11, %v557_v29  ;;  %v561_v33 = vrot.slane %v557_v29, 4  ;;  %v568_v17 = vor.u32 %v566_v6, %v5910_v24  ;;  %v835_v39 = vld [vmem:[#allocation2 + $0x3c] sm:$0xf]  ;;  %v706_v51 = vrot.slane %v5894_v55, 4 }
  0xd1   : > { %v2488_v44 = vor.u32 %v2487_v56, %v2483_v21  ;;  %v2493_v53 = vrot.slane %v2491_v31, 5  ;;  %v2287_v14 = vrot.slane %v2286_v23, 4  ;;  %v2291_v63 = vrot.slane %v2289_v25, 5  ;;  %v2617_v11 = vld [vmem:[#allocation2 + $0x30] sm:$0xe]  ;;  %v5960_v31 = vpop.permute.xlu1 %2905 }
  0xd2   : > { %3261 = vrot.lane.b32.xlu1 %v4504_v62, %s4955_s6  ;;  %v569_v20 = vsel %vm5081_vm7, %v561_v33, %v568_v17  ;;  %v836_v49 = vsel %vm5091_vm8, %v560_v34, %v835_v39  ;;  %v2299_v41 = vshll.u32 %v5919_v57, 16  ;;  %v285_v0 = vsel %vm5050_vm4, 0, %v284_v45 }
  0xd3   : > { %3245 = vrot.lane.b32.xlu0 %v4496_v60, %s4955_s6  ;;  %837 = vst [vmem:[#allocation2 + $0x3c] sm:$0xf] %v836_v49  ;;  %838 = vst.msk [vmem:[#allocation2 + $0x40] sm:$0xf] %vm346_vm6, %v569_v20  ;;  %v2489_v35 = vrot.slane %v2488_v44, 4  ;;  %v261_v52 = vsel %vm5050_vm4, 0, %v260_v27  ;;  %v2484_v2 = vsel %vm5298_vm14, %v2479_v58, %v2483_v21  ;;  %v2296_v7 = vor.u32 %v2295_v5, %v2291_v63  ;;  %v5974_v27 = vpop.permute.xlu0 %2919 }
  0xd4   : > { %v4407_v62 = vrot.slane %v2625_v36, 9  ;;  %v570_v9 = vrot.slane %v5910_v24, 4  ;;  %286 = vst [vmem:[#allocation2 + $0xa4] sm:$0x1] %v285_v0  ;;  %262 = vst [vmem:[#allocation2 + $0x44] sm:$0x1] %v261_v52  ;;  %v2292_v24 = vsel %vm5298_vm14, %v2287_v14, %v2291_v63 }
  0xd5   : > { %v2751_v10 = vrot.slane %v5845_v15, 5  ;;  %v2205_v4 = vld [vmem:[#allocation2 + $0x9c] sm:$0xf]  ;;  %v2494_v6 = vsel %vm5298_vm14, %v2489_v35, %v2493_v53  ;;  %v2301_v60 = vrot.slane %v2299_v41, 5  ;;  %v2754_v47 = vrot.slane %v5896_v13, 5 }
  0xd6   : > { %v2695_v61 = vrot.slane %v5847_v22, 5  ;;  %3355 = vrot.lane.b32.xlu1 %v4519_v38, %s4958_s9  ;;  %v2496_v56 = vshrl.u32 %v2205_v4, 16  ;;  %v2499_v29 = vshll.u32 %v2205_v4, 16  ;;  %v2297_v21 = vrot.slane %v2296_v7, 4  ;;  %v984_v53 = vld [vmem:[#allocation2 + $0x90] sm:$0xf] }
  0xd7   : > { %3339 = vrot.lane.b32.xlu0 %v4511_v18, %s4958_s9  ;;  %v5966_v13 = vld [vmem:[#allocation2 + $0xa0] sm:$0xf]  ;;  %v4535_v45 = vcombine.low %v2484_v2, %v2494_v6  ;;  %v5970_v50 = vsel %vm5186_vm11, %v4407_v62, %v2751_v10  ;;  %v2753_v15 = vrot.slane %v2751_v10, 4  ;;  %v4399_v38 = vrot.slane %v2617_v11, 9  ;;  %v5998_v2 = vpop.permute.xlu1 %2921 }
  0xd8   : > { %v2498_v19 = vrot.slane %v2496_v56, 4  ;;  %v2501_v58 = vrot.slane %v2499_v29, 5  ;;  %v2509_v23 = vshrl.u32 %v5966_v13, 16  ;;  %v4520_v25 = vcombine.low %v2205_v4, %v5966_v13  ;;  %v6003_v4 = vld [vmem:[#allocation2 + $0x94] sm:$0xf]  ;;  %v6017_v56 = vpop.permute.xlu0 %3159 }
  0xd9   : > { %v2302_v54 = vsel %vm5298_vm14, %v2297_v21, %v2301_v60  ;;  %v2505_v22 = vshll.u32 %v5966_v13, 16  ;;  %v5981_v18 = vsel %vm5186_vm11, %v2753_v15, %v2754_v47  ;;  %v2697_v34 = vrot.slane %v2695_v61, 4 }
  0xda   : > { %3357 = vrot.lane.b32.xlu1 %v4520_v25, %s4958_s9  ;;  %v2189_v33 = vld [vmem:[#allocation2 + $0x3c] sm:$0xf]  ;;  %v5984_v17 = vld [vmem:[#allocation2 + $0x40] sm:$0xf]  ;;  %v4527_v39 = vcombine.low %v2292_v24, %v2302_v54  ;;  %v2502_v5 = vor.u32 %v2501_v58, %v2498_v19  ;;  %v2511_v36 = vrot.slane %v2509_v23, 4  ;;  %v2698_v44 = vrot.slane %v5919_v57, 5 }
  0xdb   : > { %v2304_v14 = vshrl.u32 %v2189_v33, 16  ;;  %v2307_v20 = vshll.u32 %v2189_v33, 16  ;;  %v2317_v49 = vshrl.u32 %v5984_v17, 16  ;;  %v4512_v63 = vcombine.low %v2189_v33, %v5984_v17  ;;  %v895_v41 = vld [vmem:[#allocation2 + $0xa4] sm:$0x1] }
  0xdc   : > { %v896_v35 = vsel %vm5042_vm2, %v706_v51, %v895_v41  ;;  %v5993_v0 = vrot.slane %v2502_v5, 4  ;;  %v5995_v52 = vrot.slane %v2505_v22, 5  ;;  %v839_v62 = vld [vmem:[#allocation2 + $0x44] sm:$0x1]  ;;  %v2313_v57 = vshll.u32 %v5984_v17, 16 }
  0xdd   : > { %v2306_v7 = vrot.slane %v2304_v14, 4  ;;  %v2309_v10 = vrot.slane %v2307_v20, 5  ;;  %3341 = vrot.lane.b32.xlu0 %v4512_v63, %s4958_s9  ;;  %897 = vst [vmem:[#allocation2 + $0xa4] sm:$0x1] %v896_v35  ;;  %v840_v55 = vsel %vm5042_vm2, %v570_v9, %v839_v62  ;;  %v2319_v11 = vrot.slane %v2317_v49, 4  ;;  %v6039_v14 = vpop.permute.xlu1 %3175 }
  0xde   : > { %3435 = vrot.lane.b32.xlu1 %v4535_v45, %s4959_s10  ;;  %v2512_v51 = vor.u32 %v2511_v36, %v5995_v52  ;;  %841 = vst [vmem:[#allocation2 + $0x44] sm:$0x1] %v840_v55  ;;  %v6007_v6 = vrot.slane %v2313_v57, 5  ;;  %v6011_v60 = vsel %vm5186_vm11, %v4399_v38, %v2695_v61  ;;  %v6015_v47 = vsel %vm5186_vm11, %v2697_v34, %v2698_v44  ;;  %v968_v45 = vld [vmem:[#allocation2 + $0x30] sm:$0xf] }
  0xdf   : > { %v2310_v9 = vor.u32 %v2309_v10, %v2306_v7  ;;  %v1300_v24 = vshrl.u32 %v984_v53, 16  ;;  %v1303_v21 = vshll.u32 %v984_v53, 16  ;;  %v2508_v15 = vsel %vm5298_vm14, %v5993_v0, %v5995_v52  ;;  %v6026_v38 = vld [vmem:[#allocation2 + $0x98] sm:$0x1]  ;;  %v6033_v34 = vld [vmem:[#allocation2 + $0x34] sm:$0xf] }
  0xe0   : > { %v2320_v61 = vor.u32 %v2319_v11, %v6007_v6  ;;  %v1309_v19 = vshll.u32 %v6003_v4, 16  ;;  %v1313_v58 = vshrl.u32 %v6003_v4, 16  ;;  %v2513_v23 = vrot.slane %v2512_v51, 4  ;;  %v6037_v44 = vld [vmem:[#allocation2 + $0x38] sm:$0x1] }
  0xe1   : > { %3419 = vrot.lane.b32.xlu0 %v4527_v39, %s4959_s10  ;;  %v1302_v54 = vrot.slane %v1300_v24, 4  ;;  %v1305_v22 = vrot.slane %v1303_v21, 5  ;;  %v2311_v33 = vrot.slane %v2310_v9, 4  ;;  %v1108_v53 = vshrl.u32 %v968_v45, 16  ;;  %v2626_v41 = vld [vmem:[#allocation2 + $0x9c] sm:$0xe] }
  0xe2   : > { %v6035_v5 = vrot.slane %v1309_v19, 5  ;;  %v1315_v36 = vrot.slane %v1313_v58, 4  ;;  %v2321_v20 = vrot.slane %v2320_v61, 4  ;;  %v1319_v39 = vshll.u32 %v6026_v38, 16 }
  0xe3   : > { %v1306_v49 = vor.u32 %v1305_v22, %v1302_v54  ;;  %v1111_v63 = vshll.u32 %v968_v45, 16  ;;  %v1110_v52 = vrot.slane %v1108_v53, 4  ;;  %v1117_v62 = vshll.u32 %v6033_v34, 16 }
  0xe4   : > { %v2226_v35 = vld [vmem:[#allocation2 + $0xa4] sm:$0x1]  ;;  %v1316_v0 = vor.u32 %v1315_v36, %v6035_v5  ;;  %v1121_v57 = vshrl.u32 %v6033_v34, 16  ;;  %v6045_v7 = vpop.permute.xlu0 %3161  ;;  %v1127_v9 = vshll.u32 %v6037_v44, 16  ;;  %v2316_v24 = vsel %vm5298_vm14, %v2311_v33, %v6007_v6 }
  0xe5   : > { %v2515_v10 = vshll.u32 %v2226_v35, 16  ;;  %v6047_v55 = vld [vmem:[#allocation2 + $0x44] sm:$0x1]  ;;  %v1307_v11 = vrot.slane %v1306_v49, 4  ;;  %v1113_v51 = vrot.slane %v1111_v63, 5  ;;  %v1119_v45 = vrot.slane %v1117_v62, 5 }
  0xe6   : > { %v2323_v21 = vshll.u32 %v6047_v55, 16  ;;  %v1123_v61 = vrot.slane %v1121_v57, 4  ;;  %v1317_v58 = vrot.slane %v1316_v0, 4  ;;  %v1321_v54 = vrot.slane %v1319_v39, 5  ;;  %v6054_v49 = vpop.permute.xlu1 %3177  ;;  %v2618_v57 = vld [vmem:[#allocation2 + $0x3c] sm:$0xe] }
  0xe7   : > { %v2517_v19 = vrot.slane %v2515_v10, 5  ;;  %v1114_v22 = vor.u32 %v1113_v51, %v1110_v52  ;;  %v1129_v25 = vrot.slane %v1127_v9, 5  ;;  %v4408_v29 = vrot.slane %v2626_v41, 9  ;;  %v986_v51 = vld [vmem:[#allocation2 + $0x9c] sm:$0xf] }
  0xe8   : > { %v2325_v36 = vrot.slane %v2323_v21, 5  ;;  %v1124_v53 = vor.u32 %v1123_v61, %v1119_v45  ;;  %v1312_v6 = vsel %vm5298_vm14, %v1307_v11, %v6035_v5  ;;  %v2758_v62 = vrot.slane %v5966_v13, 5  ;;  %v6062_v0 = vpop.permute.xlu0 %3241  ;;  %v6070_v21 = vld [vmem:[#allocation2 + $0xa0] sm:$0xf] }
  0xe9   : > { %v2518_v63 = vsel %vm5298_vm14, %v2513_v23, %v2517_v19  ;;  %v1115_v33 = vrot.slane %v1114_v22, 4  ;;  %v2761_v10 = vrot.slane %v2226_v35, 5  ;;  %v1322_v23 = vsel %vm5298_vm14, %v1317_v58, %v1321_v54  ;;  %v970_v54 = vld [vmem:[#allocation2 + $0x3c] sm:$0xf] }
  0xea   : > { %v4536_v39 = vcombine.low %v2508_v15, %v2518_v63  ;;  %v2326_v52 = vsel %vm5298_vm14, %v2321_v20, %v2325_v36  ;;  %v1125_v41 = vrot.slane %v1124_v53, 4  ;;  %v2760_v11 = vrot.slane %v2758_v62, 4  ;;  %v6087_v53 = vpop.permute.xlu1 %3257 }
  0xeb   : > { %v4528_v9 = vcombine.low %v2316_v24, %v2326_v52  ;;  %v1120_v5 = vsel %vm5298_vm14, %v1115_v33, %v1119_v45  ;;  %v6077_v15 = vsel %vm5186_vm11, %v4408_v29, %v2758_v62  ;;  %v4400_v20 = vrot.slane %v2618_v57, 9  ;;  %v6080_v24 = vld [vmem:[#allocation2 + $0xa4] sm:$0x1]  ;;  %v6091_v57 = vld [vmem:[#allocation2 + $0x40] sm:$0xf] }
  0xec   : > { %3437 = vrot.lane.b32.xlu1 %v4536_v39, %s4959_s10  ;;  %v1130_v13 = vsel %vm5298_vm14, %v1125_v41, %v1129_v25  ;;  %v2702_v35 = vrot.slane %v5984_v17, 5  ;;  %v2762_v45 = vsel %vm5186_vm11, %v2760_v11, %v2761_v10  ;;  %v2705_v61 = vrot.slane %v6047_v55, 5  ;;  %v6093_v39 = vpop.permute.xlu0 %2903  ;;  %v6100_v41 = vld [vmem:[#allocation2 + $0x44] sm:$0x1] }
  0xed   : > { %3421 = vrot.lane.b32.xlu0 %v4528_v9, %s4959_s10  ;;  %v1324_v19 = vshrl.u32 %v986_v51, 16  ;;  %v1327_v58 = vshll.u32 %v986_v51, 16  ;;  %v4441_v25 = vcombine.low %v1312_v6, %v1322_v23  ;;  %v4433_v22 = vcombine.low %v1120_v5, %v1130_v13 }
  0xee   : > { %v2704_v36 = vrot.slane %v2702_v35, 4  ;;  %v1333_v29 = vshll.u32 %v6070_v21, 16  ;;  %v1337_v33 = vshrl.u32 %v6070_v21, 16  ;;  %v1343_v62 = vshll.u32 %v6080_v24, 16 }
  0xef   : > { %v1326_v17 = vrot.slane %v1324_v19, 4  ;;  %v1329_v63 = vrot.slane %v1327_v58, 5  ;;  %v7460_v55 = vcombine.low %v5970_v50, %v5981_v18  ;;  %v4552_v6 = vcombine.low %v6077_v15, %v2762_v45 }
  0xf0   : > { %v1335_v52 = vrot.slane %v1333_v29, 5  ;;  %v1132_v10 = vshrl.u32 %v970_v54, 16  ;;  %v1135_v51 = vshll.u32 %v970_v54, 16  ;;  %v7461_v9 = vcombine.low %v6011_v60, %v6015_v47  ;;  %v4841_v29 = vld [vmem:[#allocation2 + $0x10] sm:$0xf] }
  0xf1   : > { %3515 = vrot.lane.b32.xlu1 %v7460_v55, %s4960_s11  ;;  %v2703_v23 = vsel %vm5186_vm11, %v4400_v20, %v2702_v35  ;;  %v2706_v5 = vsel %vm5186_vm11, %v2704_v36, %v2705_v61  ;;  %v1330_v50 = vor.u32 %v1329_v63, %v1326_v17  ;;  %v1339_v18 = vrot.slane %v1337_v33, 4  ;;  %v4842_v61 = vld [vmem:[#allocation2 + $0xc] sm:$0xf]  ;;  %v1407_v17 = vld [vmem:[#allocation2 + $0x90] sm:$0xe]  ;;  %v6114_v63 = vpop.permute.xlu1 %3351 }
  0xf2   : > { %3499 = vrot.lane.b32.xlu0 %v7461_v9, %s4960_s11  ;;  %v1134_v11 = vrot.slane %v1132_v10, 4  ;;  %v1137_v13 = vrot.slane %v1135_v51, 5  ;;  %v1141_v15 = vshll.u32 %v6091_v57, 16  ;;  %v1145_v45 = vshrl.u32 %v6091_v57, 16  ;;  %v6119_v10 = vpop.permute.xlu0 %3335 }
  0xf3   : > { %v1331_v19 = vrot.slane %v1330_v50, 4  ;;  %v1340_v58 = vor.u32 %v1339_v18, %v1335_v52  ;;  %v1345_v54 = vrot.slane %v1343_v62, 5  ;;  %v1151_v60 = vshll.u32 %v6100_v41, 16 }
  0xf4   : > { %v1138_v47 = vor.u32 %v1137_v13, %v1134_v11  ;;  %v1143_v20 = vrot.slane %v1141_v15, 5  ;;  %v1147_v35 = vrot.slane %v1145_v45, 4  ;;  %v4414_v36 = vcombine.low %v4842_v61, %v4841_v29  ;;  %v1399_v13 = vld [vmem:[#allocation2 + $0x30] sm:$0xe]  ;;  %v1408_v15 = vld [vmem:[#allocation2 + $0x9c] sm:$0xe] }
  0xf5   : > { %2927 = vrot.lane.b32.xlu1 %v4441_v25, %s4956_s7  ;;  %v4544_v33 = vcombine.low %v2703_v23, %v2706_v5  ;;  %v1336_v55 = vsel %vm5298_vm14, %v1331_v19, %v1335_v52  ;;  %v1341_v62 = vrot.slane %v1340_v58, 4  ;;  %vm3527_vm15 = vcmask 23552   ;;  %v4843_v45 = vld [vmem:[#allocation2 + $0x64] sm:$0xf]  ;;  %v4844_v19 = vld [vmem:[#allocation2 + $0x60] sm:$0xf]  ;;  %v6137_v29 = vpop.permute.xlu1 %3353 }
  0xf6   : > { %2911 = vrot.lane.b32.xlu0 %v4433_v22, %s4956_s7  ;;  %v1139_v25 = vrot.slane %v1138_v47, 4  ;;  %v1148_v51 = vor.u32 %v1147_v35, %v1143_v20  ;;  %v1153_v9 = vrot.slane %v1151_v60, 5  ;;  %vm3576_vm0 = vcmask 48128   ;;  %v1400_v35 = vld [vmem:[#allocation2 + $0x3c] sm:$0xe] }
  0xf7   : > { %v1346_v50 = vsel %vm5298_vm14, %v1341_v62, %v1345_v54  ;;  %v4377_v18 = vrot.slane %v1407_v17, 9  ;;  %v1548_v11 = vrot.slane %v6003_v4, 5  ;;  %v3533_v5 = vsel %vm3527_vm15, %v4414_v36, %v5960_v31  ;;  %v4845_v17 = vld [vmem:[#allocation2 + $0x70] sm:$0xf] }
  0xf8   : > { %v4442_v22 = vcombine.low %v1336_v55, %v1346_v50  ;;  %v1144_v52 = vsel %vm5298_vm14, %v1139_v25, %v1143_v20  ;;  %v1149_v23 = vrot.slane %v1148_v51, 4  ;;  %v4421_v58 = vcombine.low %v4844_v19, %v4843_v45 }
  0xf9   : > { %3517 = vrot.lane.b32.xlu1 %v4552_v6, %s4960_s11  ;;  %v1549_v4 = vsel %vm5186_vm11, %v4377_v18, %v1548_v11  ;;  %v1550_v54 = vrot.slane %v1548_v11, 4  ;;  %v1551_v6 = vrot.slane %v6026_v38, 5  ;;  %v4369_v47 = vrot.slane %v1399_v13, 9  ;;  %v6141_v38 = vpop.permute.xlu0 %3337  ;;  %v6168_v19 = vpop.permute.xlu1 %3431 }
  0xfa   : > { %3501 = vrot.lane.b32.xlu0 %v4544_v33, %s4960_s11  ;;  %v1154_v60 = vsel %vm5298_vm14, %v1149_v23, %v1153_v9  ;;  %v1492_v20 = vrot.slane %v6033_v34, 5  ;;  %v1495_v31 = vrot.slane %v6037_v44, 5  ;;  %v4846_v33 = vld [vmem:[#allocation2 + $0x6c] sm:$0xf]  ;;  %v4378_v62 = vrot.slane %v1408_v15, 9 }
  0xfb   : > { %v4434_v61 = vcombine.low %v1144_v52, %v1154_v60  ;;  %v1552_v36 = vsel %vm5186_vm11, %v1550_v54, %v1551_v6  ;;  %v4422_v55 = vcombine.low %v4846_v33, %v4845_v17  ;;  %v1555_v51 = vrot.slane %v6070_v21, 5  ;;  %v1598_v23 = vld [vmem:[#allocation2 + $0x9c] sm:$0xf]  ;;  %v6177_v60 = vld [vmem:[#allocation2 + $0x40] sm:$0xf] }
  0xfc   : > { %v4457_v25 = vcombine.low %v1549_v4, %v1552_v36  ;;  %v1493_v34 = vsel %vm5186_vm11, %v4369_v47, %v1492_v20  ;;  %v1494_v44 = vrot.slane %v1492_v20, 4  ;;  %v3554_v9 = vsel %vm3527_vm15, %v4421_v58, %v5974_v27  ;;  %v1582_v54 = vld [vmem:[#allocation2 + $0x3c] sm:$0xf]  ;;  %v384_v36 = vld [vmem:[%s5065_s30 + $0xd0] sm:$0xff] }
  0xfd   : > { %2929 = vrot.lane.b32.xlu1 %v4442_v22, %s4956_s7  ;;  %v1558_v50 = vrot.slane %v6080_v24, 5  ;;  %v4370_v18 = vrot.slane %v1400_v35, 9  ;;  %v1499_v11 = vrot.slane %v6091_v57, 5  ;;  %v3580_v13 = vsel %vm3576_vm0, %v3533_v5, %v5871_v40  ;;  %v385_v17 = vld [vmem:[%s5065_s30 + $0xd8] sm:$0xff] }
  0xfe   : > { %2913 = vrot.lane.b32.xlu0 %v4434_v61, %s4956_s7  ;;  %v1496_v22 = vsel %vm5186_vm11, %v1494_v44, %v1495_v31  ;;  %v1556_v52 = vsel %vm5186_vm11, %v4378_v62, %v1555_v51  ;;  %v1557_v21 = vrot.slane %v1555_v51, 4  ;;  %v1502_v24 = vrot.slane %v6100_v41, 5  ;;  %v231_v61 = vld [vmem:[#allocation2 + $0xa8] sm:$0x1] }
  0xff   : > { %v4449_v15 = vcombine.low %v1493_v34, %v1496_v22  ;;  %v1500_v27 = vsel %vm5186_vm11, %v4370_v18, %v1499_v11  ;;  %v1501_v45 = vrot.slane %v1499_v11, 4  ;;  %v3594_v57 = vsel %vm3576_vm0, %v3554_v9, %v5858_v8  ;;  %v6173_v8 = vld [vmem:[#allocation2 + $0xa0] sm:$0xf]  ;;  %v207_v62 = vld [vmem:[#allocation2 + $0x48] sm:$0x1] }
 0x100   : > { %v3557_v40 = vsel %vm3527_vm15, %v4422_v55, %v5998_v2  ;;  %v1559_v5 = vsel %vm5186_vm11, %v1557_v21, %v1558_v50  ;;  %vm7444_vm1 = vcmask 72704   ;;  %vm7443_vm3 = vcmask 97280   ;;  %v6175_v2 = vpop.permute.xlu0 %3415 }
 0x101   : > { %3007 = vrot.lane.b32.xlu1 %v4457_v25, %s4954_s5  ;;  %v4458_v58 = vcombine.low %v1556_v52, %v1559_v5  ;;  %v1503_v41 = vsel %vm5186_vm11, %v1501_v45, %v1502_v24  ;;  %v1911_v4 = vshrl.u32 %v1598_v23, 16  ;;  %v3596_v47 = vsel %vm3576_vm0, %v3557_v40, %v5891_v59  ;;  %v368_v25 = vld [vmem:[%s5065_s30 + $0x50] sm:$0xff]  ;;  %v4847_v24 = vld [vmem:[#allocation2 + $0x4] sm:$0xf] }
 0x102   : > { %2991 = vrot.lane.b32.xlu0 %v4449_v15, %s4954_s5  ;;  %v4450_v6 = vcombine.low %v1500_v27, %v1503_v41  ;;  %v3627_v20 = vsel %vm7444_vm1, %v3594_v57, %v5789_v12  ;;  %v3613_v31 = vsel %vm7444_vm1, %v3580_v13, %v5833_v26  ;;  %v1914_v35 = vshll.u32 %v1598_v23, 16  ;;  %v369_v26 = vld [vmem:[%s5065_s30 + $0x58] sm:$0xff]  ;;  %v4848_v57 = vld [vmem:[#allocation2] sm:$0xf] }
 0x103   : > { %v6190_v33 = vsel %vm7443_vm3, %v3627_v20, %v6039_v14  ;;  %v6194_v55 = vsel %vm7443_vm3, %v3613_v31, %v6045_v7  ;;  %v4473_v59 = vcombine.low %v1598_v23, %v6173_v8  ;;  %v1719_v12 = vshrl.u32 %v1582_v54, 16  ;;  %v6205_v11 = vpop.permute.xlu1 %3433 }
 0x104   : > { %v1913_v34 = vrot.slane %v1911_v4, 4  ;;  %v1924_v44 = vshrl.u32 %v6173_v8, 16  ;;  %v1722_v51 = vshll.u32 %v1582_v54, 16  ;;  %v4465_v9 = vcombine.low %v1582_v54, %v6177_v60  ;;  %v6209_v23 = vpop.permute.xlu0 %3417 }
 0x105   : > { %3009 = vrot.lane.b32.xlu1 %v4458_v58, %s4954_s5  ;;  %v1916_v14 = vrot.slane %v1914_v35, 5  ;;  %v1732_v50 = vshrl.u32 %v6177_v60, 16  ;;  %v232_v7 = vsel %vm5042_vm2, 0, %v231_v61  ;;  %v4642_v18 = vpack.c.bf16 %v384_v36, %v384_v36 }
 0x106   : > { %2993 = vrot.lane.b32.xlu0 %v4450_v6, %s4954_s5  ;;  %233 = vst [vmem:[#allocation2 + $0xa8] sm:$0x1] %v232_v7  ;;  %v4643_v13 = vpack.c.bf16 %v385_v17, %v385_v17  ;;  %v208_v22 = vsel %vm5042_vm2, 0, %v207_v62  ;;  %v4626_v52 = vpack.c.bf16 %v368_v25, %v368_v25  ;;  %v4627_v21 = vpack.c.bf16 %v369_v26, %v369_v26  ;;  %v6223_v26 = vld [vmem:[#allocation2 + $0xa4] sm:$0x1] }
 0x107   : > { %v6212_v15 = vrot.slane %v1719_v12, 4  ;;  %v708_v27 = vshrl.u32 %v4642_v18, 16  ;;  %v711_v45 = vshll.u32 %v4642_v18, 16  ;;  %209 = vst [vmem:[#allocation2 + $0x48] sm:$0x1] %v208_v22  ;;  %v4413_v40 = vcombine.low %v4848_v57, %v4847_v24 }
 0x108   : > { %v716_v5 = vshrl.u32 %v4643_v13, 16  ;;  %v719_v58 = vshll.u32 %v4643_v13, 16  ;;  %v572_v41 = vshrl.u32 %v4626_v52, 16  ;;  %v575_v4 = vshll.u32 %v4626_v52, 16  ;;  %v6230_v22 = vpop.permute.xlu0 %3495 }
 0x109   : > { %3103 = vrot.lane.b32.xlu1 %v4473_v59, %s4953_s4  ;;  %v710_v54 = vrot.slane %v708_v27, 7  ;;  %v580_v6 = vshrl.u32 %v4627_v21, 16  ;;  %v583_v20 = vshll.u32 %v4627_v21, 16  ;;  %v3530_v31 = vsel %vm3527_vm15, %v4413_v40, %v6093_v39  ;;  %v6236_v21 = vld [vmem:[#allocation2 + $0x44] sm:$0x1] }
 0x10a   : > { %3087 = vrot.lane.b32.xlu0 %v4465_v9, %s4953_s4  ;;  %v6217_v35 = vrot.slane %v716_v5, 7  ;;  %v574_v61 = vrot.slane %v572_v41, 7  ;;  %v3578_v36 = vsel %vm3576_vm0, %v3530_v31, %v5938_v28  ;;  %v1917_v17 = vor.u32 %v1916_v14, %v1913_v34  ;;  %v6225_v9 = vpop.permute.xlu1 %3511  ;;  %v263_v31 = vld [vmem:[#allocation2 + $0x50] sm:$0x1] }
 0x10b   : > { %v1724_v59 = vrot.slane %v1722_v51, 5  ;;  %v713_v12 = vor.u32 %v711_v45, %v710_v54  ;;  %v714_v62 = vrot.slane %v710_v54, 4  ;;  %v6221_v25 = vrot.slane %v580_v6, 7 }
 0x10c   : > { %v3629_v7 = vsel %vm7444_vm1, %v3596_v47, %v5819_v46  ;;  %v721_v39 = vor.u32 %v719_v58, %v6217_v35  ;;  %v577_v18 = vor.u32 %v575_v4, %v574_v61  ;;  %v578_v13 = vrot.slane %v574_v61, 4  ;;  %v287_v4 = vld [vmem:[#allocation2 + $0xb0] sm:$0x1] }
 0x10d   : > { %v898_v28 = vld [vmem:[#allocation2 + $0xa8] sm:$0xf]  ;;  %v585_v34 = vor.u32 %v583_v20, %v6221_v25  ;;  %v3611_v51 = vsel %vm7444_vm1, %v3578_v36, %v5799_v43  ;;  %v1918_v14 = vrot.slane %v1917_v17, 4  ;;  %v1920_v52 = vshll.u32 %v6173_v8, 16 }
 0x10e   : > { %v722_v46 = vsel %vm5081_vm7, %v714_v62, %v721_v39  ;;  %v899_v47 = vsel %vm5091_vm8, %v713_v12, %v898_v28  ;;  %v842_v27 = vld [vmem:[#allocation2 + $0x48] sm:$0xf]  ;;  %v1926_v45 = vrot.slane %v1924_v44, 4  ;;  %v1930_v24 = vshll.u32 %v6223_v26, 16  ;;  %v6259_v61 = vpop.permute.xlu1 %2923 }
 0x10f   : > { %900 = vst [vmem:[#allocation2 + $0xa8] sm:$0xf] %v899_v47  ;;  %901 = vst.msk [vmem:[#allocation2 + $0xac] sm:$0xf] %vm346_vm6, %v722_v46  ;;  %v586_v43 = vsel %vm5081_vm7, %v578_v13, %v585_v34  ;;  %v843_v57 = vsel %vm5091_vm8, %v577_v18, %v842_v27  ;;  %v1922_v40 = vrot.slane %v1920_v52, 5  ;;  %v1725_v5 = vor.u32 %v1724_v59, %v6212_v15 }
 0x110   : > { %vm3675_vm5 = vcmask 121856   ;;  %844 = vst [vmem:[#allocation2 + $0x48] sm:$0xf] %v843_v57  ;;  %845 = vst.msk [vmem:[#allocation2 + $0x4c] sm:$0xf] %vm346_vm6, %v586_v43  ;;  %v1728_v44 = vshll.u32 %v6177_v60, 16  ;;  %v3662_v54 = vsel %vm7443_vm3, %v3629_v7, %v6054_v49  ;;  %v3644_v59 = vsel %vm7443_vm3, %v3611_v51, %v6017_v56  ;;  %v6267_v49 = vpop.permute.xlu0 %2907 }
 0x111   : > { %v1734_v58 = vrot.slane %v1732_v50, 4  ;;  %v1738_v41 = vshll.u32 %v6236_v21, 16  ;;  %v6257_v6 = vsel %vm3675_vm5, %v6194_v55, %v6062_v0  ;;  %v1927_v20 = vor.u32 %v1926_v45, %v1922_v40 }
 0x112   : > { %v1932_v15 = vrot.slane %v1930_v24, 5  ;;  %v6263_v36 = vsel %vm3675_vm5, %v3662_v54, %v6087_v53  ;;  %v1726_v50 = vrot.slane %v1725_v5, 4  ;;  %v1730_v17 = vrot.slane %v1728_v44, 5  ;;  %v6291_v45 = vpop.permute.xlu1 %3513 }
 0x113   : > { %v723_v12 = vrot.slane %v6217_v35, 4  ;;  %v1923_v0 = vsel %vm5298_vm14, %v1918_v14, %v1922_v40  ;;  %v1928_v55 = vrot.slane %v1927_v20, 4  ;;  %v288_v62 = vsel %vm5050_vm4, 0, %v287_v4  ;;  %v2018_v4 = vld [vmem:[#allocation2 + $0x9c] sm:$0xe] }
 0x114   : > { %v587_v7 = vrot.slane %v6221_v25, 4  ;;  %v1735_v53 = vor.u32 %v1734_v58, %v1730_v17  ;;  %v1740_v39 = vrot.slane %v1738_v41, 5  ;;  %289 = vst [vmem:[#allocation2 + $0xb0] sm:$0x1] %v288_v62  ;;  %v264_v18 = vsel %vm5050_vm4, 0, %v263_v31  ;;  %v6298_v5 = vpop.permute.xlu0 %3497 }
 0x115   : > { %v1933_v56 = vsel %vm5298_vm14, %v1928_v55, %v1932_v15  ;;  %vm7442_vm9 = vcmask 146432   ;;  %v3693_v35 = vsel %vm3675_vm5, %v6190_v33, %v5926_v30  ;;  %v3677_v13 = vsel %vm3675_vm5, %v3644_v59, %v5899_v48  ;;  %265 = vst [vmem:[#allocation2 + $0x50] sm:$0x1] %v264_v18 }
 0x116   : > { %v1600_v28 = vld [vmem:[#allocation2 + $0xa8] sm:$0xf]  ;;  %v6284_v25 = vld [vmem:[#allocation2 + $0xac] sm:$0xf]  ;;  %v4489_v34 = vcombine.low %v1923_v0, %v1933_v56  ;;  %v1731_v51 = vsel %vm5298_vm14, %v1726_v50, %v1730_v17  ;;  %v1736_v14 = vrot.slane %v1735_v53, 4  ;;  %v2156_v52 = vrot.slane %v6173_v8, 5 }
 0x117   : > { %v1935_v46 = vshrl.u32 %v1600_v28, 16  ;;  %v1938_v47 = vshll.u32 %v1600_v28, 16  ;;  %v1948_v27 = vshrl.u32 %v6284_v25, 16  ;;  %v4474_v30 = vcombine.low %v1600_v28, %v6284_v25  ;;  %v1584_v33 = vld [vmem:[#allocation2 + $0x48] sm:$0xf] }
 0x118   : > { %v6293_v48 = vld [vmem:[#allocation2 + $0x4c] sm:$0xf]  ;;  %v1743_v24 = vshrl.u32 %v1584_v33, 16  ;;  %v1746_v43 = vshll.u32 %v1584_v33, 16  ;;  %v1741_v57 = vsel %vm5298_vm14, %v1736_v14, %v1740_v39  ;;  %v1944_v40 = vshll.u32 %v6284_v25, 16 }
 0x119   : > { %v1937_v8 = vrot.slane %v1935_v46, 4  ;;  %v1940_v44 = vrot.slane %v1938_v47, 5  ;;  %3105 = vrot.lane.b32.xlu1 %v4474_v30, %s4953_s4  ;;  %v1756_v58 = vshrl.u32 %v6293_v48, 16  ;;  %v4466_v41 = vcombine.low %v1584_v33, %v6293_v48  ;;  %v2010_v50 = vld [vmem:[#allocation2 + $0x3c] sm:$0xe]  ;;  %v6318_v30 = vpop.permute.xlu1 %2925 }
 0x11a   : > { %v1745_v54 = vrot.slane %v1743_v24, 4  ;;  %v1748_v20 = vrot.slane %v1746_v43, 5  ;;  %v4481_v15 = vcombine.low %v1731_v51, %v1741_v57  ;;  %v6303_v31 = vrot.slane %v1944_v40, 5  ;;  %v6324_v43 = vpop.permute.xlu0 %2909 }
 0x11b   : > { %3089 = vrot.lane.b32.xlu0 %v4466_v41, %s4953_s4  ;;  %v902_v17 = vld [vmem:[#allocation2 + $0xb0] sm:$0x1]  ;;  %v1941_v59 = vor.u32 %v1940_v44, %v1937_v8  ;;  %v1950_v0 = vrot.slane %v1948_v27, 4  ;;  %v1752_v55 = vshll.u32 %v6293_v48, 16  ;;  %v1758_v62 = vrot.slane %v1756_v58, 4  ;;  %v386_v27 = vld [vmem:[%s5065_s30 + $0xe0] sm:$0xff] }
 0x11c   : > { %v903_v53 = vsel %vm5042_vm2, %v723_v12, %v902_v17  ;;  %v846_v39 = vld [vmem:[#allocation2 + $0x50] sm:$0x1]  ;;  %v1749_v18 = vor.u32 %v1748_v20, %v1745_v54  ;;  %v4393_v56 = vrot.slane %v2018_v4, 9  ;;  %v2158_v28 = vrot.slane %v2156_v52, 4  ;;  %v2019_v58 = vld [vmem:[#allocation2 + $0xa8] sm:$0xe] }
 0x11d   : > { %3183 = vrot.lane.b32.xlu1 %v4489_v34, %s4957_s8  ;;  %904 = vst [vmem:[#allocation2 + $0xb0] sm:$0x1] %v903_v53  ;;  %v6310_v51 = vrot.slane %v1941_v59, 4  ;;  %v1951_v14 = vor.u32 %v1950_v0, %v6303_v31  ;;  %v847_v46 = vsel %vm5042_vm2, %v587_v7, %v846_v39  ;;  %v6315_v47 = vrot.slane %v1752_v55, 5 }
 0x11e   : > { %848 = vst [vmem:[#allocation2 + $0x50] sm:$0x1] %v847_v46  ;;  %v6320_v12 = vrot.slane %v1749_v18, 4  ;;  %v2159_v33 = vrot.slane %v6223_v26, 5  ;;  %v4385_v24 = vrot.slane %v2010_v50, 9  ;;  %v2100_v34 = vrot.slane %v6177_v60, 5  ;;  %v6375_v0 = vpop.permute.xlu0 %2987 }
 0x11f   : > { %3167 = vrot.lane.b32.xlu0 %v4481_v15, %s4957_s8  ;;  %v3726_v7 = vsel %vm7442_vm9, %v3693_v35, %v6114_v63  ;;  %v3710_v57 = vsel %vm7442_vm9, %v3677_v13, %v6119_v10  ;;  %v1759_v40 = vor.u32 %v1758_v62, %v6315_v47  ;;  %v2103_v8 = vrot.slane %v6236_v21, 5  ;;  %v2011_v21 = vld [vmem:[#allocation2 + $0x48] sm:$0xe]  ;;  %v6369_v15 = vpop.permute.xlu1 %3003 }
 0x120   : > { %v3728_v26 = vsel %vm7442_vm9, %v6263_v36, %v6137_v29  ;;  %v3712_v60 = vsel %vm7442_vm9, %v6257_v6, %v6141_v38  ;;  %v2102_v44 = vrot.slane %v2100_v34, 4  ;;  %v6339_v41 = vpack.c.bf16 %v386_v27, %v386_v27  ;;  %v6362_v13 = vld [vmem:[#allocation2 + $0xa8] sm:$0xf] }
 0x121   : > { %v1947_v63 = vsel %vm5298_vm14, %v6310_v51, %v6303_v31  ;;  %v6347_v10 = vsel %vm5186_vm11, %v4393_v56, %v2156_v52  ;;  %v6351_v29 = vsel %vm5186_vm11, %v2158_v28, %v2159_v33  ;;  %vm7441_vm10 = vcmask 171008  }
 0x122   : > { %v1952_v38 = vrot.slane %v1951_v14, 4  ;;  %v1755_v6 = vsel %vm5298_vm14, %v6320_v12, %v6315_v47  ;;  %v6359_v36 = vsel %vm5186_vm11, %v4385_v24, %v2100_v34  ;;  %v2163_v35 = vrot.slane %v6284_v25, 5  ;;  %v6405_v34 = vld [vmem:[#allocation2 + $0x48] sm:$0xf] }
 0x123   : > { %v1760_v52 = vrot.slane %v1759_v40, 4  ;;  %v6366_v4 = vsel %vm5186_vm11, %v2102_v44, %v2103_v8  ;;  %v4394_v54 = vrot.slane %v2019_v58, 9  ;;  %v2107_v20 = vrot.slane %v6293_v48, 5 }
 0x124   : > { %v1619_v31 = vld [vmem:[#allocation2 + $0xb0] sm:$0x1]  ;;  %v4505_v50 = vcombine.low %v6347_v10, %v6351_v29  ;;  %v3759_v17 = vsel %vm7441_vm10, %v3726_v7, %v6168_v19  ;;  %v2165_v25 = vrot.slane %v2163_v35, 4  ;;  %v4386_v59 = vrot.slane %v2011_v21, 9  ;;  %v6382_v19 = vld [vmem:[#allocation2 + $0xac] sm:$0xf] }
 0x125   : > { %v1954_v55 = vshll.u32 %v1619_v31, 16  ;;  %v1611_v62 = vld [vmem:[#allocation2 + $0x50] sm:$0x1]  ;;  %v3743_v53 = vsel %vm7441_vm10, %v3710_v57, %v6175_v2  ;;  %v2166_v39 = vrot.slane %v1619_v31, 5  ;;  %v2520_v48 = vshrl.u32 %v6362_v13, 16  ;;  %v371_v31 = vld [vmem:[%s5065_s30 + $0x68] sm:$0xff] }
 0x126   : > { %v1762_v18 = vshll.u32 %v1611_v62, 16  ;;  %v4497_v56 = vcombine.low %v6359_v36, %v6366_v4  ;;  %v2109_v28 = vrot.slane %v2107_v20, 4  ;;  %v2110_v51 = vrot.slane %v1611_v62, 5  ;;  %v234_v7 = vld [vmem:[#allocation2 + $0xb4] sm:$0x1]  ;;  %v370_v36 = vld [vmem:[%s5065_s30 + $0x60] sm:$0xff] }
 0x127   : > { %v1956_v14 = vrot.slane %v1954_v55, 5  ;;  %v6386_v46 = vsel %vm5186_vm11, %v4394_v54, %v2163_v35  ;;  %v6390_v2 = vsel %vm5186_vm11, %v2165_v25, %v2166_v39  ;;  %v2523_v47 = vshll.u32 %v6362_v13, 16  ;;  %v6424_v35 = vpop.permute.xlu0 %2989  ;;  %v6440_v39 = vld [vmem:[#allocation2 + $0x4c] sm:$0xf] }
 0x128   : > { %v1764_v27 = vrot.slane %v1762_v18, 5  ;;  %v6395_v12 = vsel %vm5186_vm11, %v4386_v59, %v2107_v20  ;;  %v6399_v33 = vsel %vm7441_vm10, %v3728_v26, %v6205_v11  ;;  %v6403_v24 = vsel %vm7441_vm10, %v3712_v60, %v6209_v23  ;;  %v387_v11 = vld [vmem:[%s5065_s30 + $0xe8] sm:$0xff]  ;;  %v6415_v26 = vpop.permute.xlu1 %3005 }
 0x129   : > { %v1957_v57 = vsel %vm5298_vm14, %v1952_v38, %v1956_v14  ;;  %v6409_v40 = vrot.slane %v2520_v48, 4  ;;  %v2533_v8 = vshrl.u32 %v6382_v19, 16  ;;  %v4521_v44 = vcombine.low %v6362_v13, %v6382_v19  ;;  %v210_v38 = vld [vmem:[#allocation2 + $0x54] sm:$0x1] }
 0x12a   : > { %v4490_v58 = vcombine.low %v1947_v63, %v1957_v57  ;;  %v1765_v23 = vsel %vm5298_vm14, %v1760_v52, %v1764_v27  ;;  %v4506_v60 = vcombine.low %v6386_v46, %v6390_v2  ;;  %v2111_v21 = vsel %vm5186_vm11, %v2109_v28, %v2110_v51 }
 0x12b   : > { %v4482_v4 = vcombine.low %v1755_v6, %v1765_v23  ;;  %v6426_v54 = vrot.slane %v2523_v47, 5  ;;  %v2328_v20 = vshrl.u32 %v6405_v34, 16  ;;  %v235_v63 = vsel %vm5042_vm2, 0, %v234_v7  ;;  %v6455_v57 = vpop.permute.xlu0 %3083 }
 0x12c   : > { %3185 = vrot.lane.b32.xlu1 %v4490_v58, %s4957_s8  ;;  %236 = vst [vmem:[#allocation2 + $0xb4] sm:$0x1] %v235_v63  ;;  %v4645_v52 = vpack.c.bf16 %v387_v11, %v387_v11  ;;  %v725_v25 = vshrl.u32 %v6339_v41, 16  ;;  %v728_v59 = vshll.u32 %v6339_v41, 16  ;;  %vm3774_vm12 = vcmask 195584  }
 0x12d   : > { %3169 = vrot.lane.b32.xlu0 %v4482_v4, %s4957_s8  ;;  %v3792_v6 = vsel %vm3774_vm12, %v3759_v17, %v6225_v9  ;;  %vm3829_vm13 = vcmask 220160   ;;  %v211_v55 = vsel %vm5042_vm2, 0, %v210_v38  ;;  %v4628_v62 = vpack.c.bf16 %v370_v36, %v370_v36  ;;  %v6446_v17 = vpop.permute.xlu1 %3099  ;;  %v6465_v38 = vld [vmem:[#allocation2 + $0xb0] sm:$0x1] }
 0x12e   : > { %v727_v48 = vrot.slane %v725_v25, 7  ;;  %v733_v18 = vshrl.u32 %v4645_v52, 16  ;;  %v736_v28 = vshll.u32 %v4645_v52, 16  ;;  %4721 = vmatprep.mubr.msk.bf16.mxu1 %vm3829_vm13, %v3792_v6  ;;  %212 = vst [vmem:[#allocation2 + $0x54] sm:$0x1] %v211_v55  ;;  %v4629_v41 = vpack.c.bf16 %v371_v31, %v371_v31 }
 0x12f   : > { %v2331_v51 = vshll.u32 %v6405_v34, 16  ;;  %v589_v14 = vshrl.u32 %v4628_v62, 16  ;;  %v592_v46 = vshll.u32 %v4628_v62, 16  ;;  %v3776_v9 = vsel %vm3774_vm12, %v3743_v53, %v6230_v22 }
 0x130   : > { %3263 = vrot.lane.b32.xlu1 %v4505_v50, %s4955_s6  ;;  %v730_v2 = vor.u32 %v728_v59, %v727_v48  ;;  %v731_v47 = vrot.slane %v727_v48, 4  ;;  %v6452_v27 = vrot.slane %v733_v18, 7  ;;  %v597_v7 = vshrl.u32 %v4629_v41, 16  ;;  %4705 = vmatprep.mubr.msk.bf16.mxu0 %vm3829_vm13, %v3776_v9  ;;  %v290_v9 = vld [vmem:[#allocation2 + $0xbc] sm:$0x1] }
 0x131   : > { %3247 = vrot.lane.b32.xlu0 %v4497_v56, %s4955_s6  ;;  %v4498_v22 = vcombine.low %v6395_v12, %v2111_v21  ;;  %v2341_v53 = vshrl.u32 %v6440_v39, 16  ;;  %v591_v11 = vrot.slane %v589_v14, 7  ;;  %v600_v58 = vshll.u32 %v4629_v41, 16  ;;  %v6483_v59 = vpop.permute.xlu1 %3101 }
 0x132   : > { %v2330_v23 = vrot.slane %v2328_v20, 4  ;;  %v4513_v10 = vcombine.low %v6405_v34, %v6440_v39  ;;  %v738_v29 = vor.u32 %v736_v28, %v6452_v27  ;;  %v6463_v50 = vrot.slane %v597_v7, 7  ;;  %v4832_v20 = vld [vmem:[%s7438_s1 + $0x8] sm:$0x3f]   ;;  %v6491_v28 = vld [vmem:[#allocation2 + $0x50] sm:$0x1] }
 0x133   : > { %v2333_v36 = vrot.slane %v2331_v51, 5  ;;  %v905_v4 = vld [vmem:[#allocation2 + $0xb4] sm:$0xf]  ;;  %v594_v63 = vor.u32 %v592_v46, %v591_v11  ;;  %v595_v56 = vrot.slane %v591_v11, 4  ;;  %vm3862_vm10 = vcmask 1044480  }
 0x134   : > { %3265 = vrot.lane.b32.xlu1 %v4506_v60, %s4955_s6  ;;  %v739_v12 = vsel %vm5081_vm7, %v731_v47, %v738_v29  ;;  %v906_v21 = vsel %vm5091_vm8, %v730_v2, %v905_v4  ;;  %v602_v34 = vor.u32 %v600_v58, %v6463_v50  ;;  %vm3863_vm9 = vcmask 1045504   ;;  %v266_v11 = vld [vmem:[#allocation2 + $0x5c] sm:$0x1]  ;;  %v6510_v29 = vld [vmem:[#allocation2 + $0x18] sm:$0xf] }
 0x135   : > { %3249 = vrot.lane.b32.xlu0 %v4498_v22, %s4955_s6  ;;  %907 = vst [vmem:[#allocation2 + $0xb4] sm:$0xf] %v906_v21  ;;  %908 = vst.msk [vmem:[#allocation2 + $0xb8] sm:$0xf] %vm346_vm6, %v739_v12  ;;  %v849_v31 = vld [vmem:[#allocation2 + $0x54] sm:$0xf]  ;;  %v2526_v60 = vor.u32 %v6426_v54, %v6409_v40  ;;  %v6493_v40 = vpop.permute.xlu0 %3085  ;;  %v2334_v46 = vor.u32 %v2333_v36, %v2330_v23  ;;  %v3794_v12 = vsel %vm3774_vm12, %v6399_v33, %v6291_v45 }
 0x136   : > { %v2529_v52 = vshll.u32 %v6382_v19, 16  ;;  %v2535_v25 = vrot.slane %v2533_v8, 4  ;;  %v603_v6 = vsel %vm5081_vm7, %v595_v56, %v602_v34  ;;  %v850_v55 = vsel %vm5091_vm8, %v594_v63, %v849_v31  ;;  %v6496_v8 = vld [vmem:[#allocation2 + $0x78] sm:$0xf]  ;;  %v6498_v54 = vld [vmem:[#allocation2 + $0x7c] sm:$0xf] }
 0x137   : > { %v4961_v62 = vmov 65535   ;;  %v2539_v18 = vshll.u32 %v6465_v38, 16  ;;  %851 = vst [vmem:[#allocation2 + $0x54] sm:$0xf] %v850_v55  ;;  %852 = vst.msk [vmem:[#allocation2 + $0x58] sm:$0xf] %vm346_vm6, %v603_v6  ;;  %v4423_v41 = vcombine.low %v6496_v8, %v6498_v54  ;;  %v3778_v21 = vsel %vm3774_vm12, %v6403_v24, %v6298_v5 }
 0x138   : > { %v3864_v48 = vsel %vm3862_vm10, 4294967295, %v4961_v62  ;;  %v2531_v14 = vrot.slane %v2529_v52, 5  ;;  %3359 = vrot.lane.b32.xlu1 %v4521_v44, %s4958_s9  ;;  %v2527_v47 = vrot.slane %v2526_v60, 4  ;;  %v2337_v7 = vshll.u32 %v6440_v39, 16  ;;  %v6512_v4 = vld [vmem:[#allocation2 + $0x1c] sm:$0xf] }
 0x139   : > { %v3865_v51 = vsel %vm3863_vm9, %v3864_v48, 0  ;;  %v2343_v22 = vrot.slane %v2341_v53, 4  ;;  %3343 = vrot.lane.b32.xlu0 %v4513_v10, %s4958_s9  ;;  %v740_v58 = vrot.slane %v6452_v27, 4  ;;  %v4415_v23 = vcombine.low %v6510_v29, %v6512_v4  ;;  %v6534_v33 = vpop.permute.xlu0 %3163  ;;  %v6595_v8 = vld [vmem:[#allocation2 + $0xac] sm:$0xf] }
 0x13a   : > { %v3867_v2 = vand.u32 %v4832_v20, %v3865_v51  ;;  %v2536_v36 = vor.u32 %v2535_v25, %v2531_v14  ;;  %v2347_v13 = vshll.u32 %v6491_v28, 16  ;;  %v2541_v44 = vrot.slane %v2539_v18, 5  ;;  %v6527_v20 = vpop.permute.xlu1 %3179  ;;  %v6599_v4 = vld [vmem:[#allocation2 + $0xb0] sm:$0x1] }
 0x13b   : > { %v2335_v63 = vrot.slane %v2334_v46, 4  ;;  %v2339_v53 = vrot.slane %v2337_v7, 5  ;;  %v291_v10 = vsel %vm5050_vm4, 0, %v290_v9  ;;  %v267_v34 = vsel %vm5050_vm4, 0, %v266_v11 }
 0x13c   : > { %4703 = vmatprep.subr.bf16.mxu0 %v3867_v2  ;;  %4738 = vmatprep.subr.bf16.mxu1 %v3867_v2  ;;  %v2537_v56 = vrot.slane %v2536_v36, 4  ;;  %292 = vst [vmem:[#allocation2 + $0xbc] sm:$0x1] %v291_v10  ;;  %v2209_v31 = vld [vmem:[#allocation2 + $0xb4] sm:$0xf]  ;;  %v604_v52 = vrot.slane %v6463_v50, 4  ;;  %v2532_v25 = vsel %vm5298_vm14, %v2527_v47, %v2531_v14 }
 0x13d   : > { %4704 = vmatpush3.bf16.msra.mxu0 %v3867_v2  ;;  %4740 = vmatpush3.bf16.msra.mxu1 %v3867_v2  ;;  %v6529_v60 = vld [vmem:[#allocation2 + $0xb8] sm:$0xf]  ;;  %v2344_v6 = vor.u32 %v2343_v22, %v2339_v53  ;;  %v2349_v45 = vrot.slane %v2347_v13, 5  ;;  %268 = vst [vmem:[#allocation2 + $0x5c] sm:$0x1] %v267_v34  ;;  %v2544_v5 = vshrl.u32 %v2209_v31, 16  ;;  %v2340_v51 = vsel %vm5298_vm14, %v2335_v63, %v2339_v53 }
 0x13e   : > { %v2547_v24 = vshll.u32 %v2209_v31, 16  ;;  %v2557_v55 = vshrl.u32 %v6529_v60, 16  ;;  %v4522_v62 = vcombine.low %v2209_v31, %v6529_v60  ;;  %v2193_v48 = vld [vmem:[#allocation2 + $0x54] sm:$0xf]  ;;  %v6538_v18 = vld [vmem:[#allocation2 + $0x58] sm:$0xf]  ;;  %v2542_v50 = vsel %vm5298_vm14, %v2537_v56, %v2541_v44 }
 0x13f   : > { %v2345_v14 = vrot.slane %v2344_v6, 4  ;;  %v2553_v46 = vshll.u32 %v6529_v60, 16  ;;  %v2546_v9 = vrot.slane %v2544_v5, 4  ;;  %v2352_v47 = vshrl.u32 %v2193_v48, 16  ;;  %v2627_v44 = vld [vmem:[#allocation2 + $0xa8] sm:$0xe] }
 0x140   : > { %4722 = vmatmul.mubr.msk.bf16.vlgmr.msra.gmra.mrb[0].mxu1 %vm3829_vm13, %v3794_v12  ;;  %4706 = vmatmul.mubr.msk.bf16.vlgmr.msra.gmra.mrb[0].mxu0 %vm3829_vm13, %v3778_v21  ;;  %v2549_v2 = vrot.slane %v2547_v24, 5  ;;  %v2355_v7 = vshll.u32 %v2193_v48, 16  ;;  %v2365_v22 = vshrl.u32 %v6538_v18, 16  ;;  %v4514_v11 = vcombine.low %v2193_v48, %v6538_v18  ;;  %v6552_v12 = vpop.permute.xlu1 %3181 }
 0x141   : > { %3361 = vrot.lane.b32.xlu1 %v4522_v62, %s4958_s9  ;;  %v4537_v36 = vcombine.low %v2532_v25, %v2542_v50  ;;  %v2350_v13 = vsel %vm5298_vm14, %v2345_v14, %v2349_v45  ;;  %v2354_v63 = vrot.slane %v2352_v47, 4  ;;  %v6555_v34 = vrot.slane %v2553_v46, 5  ;;  %v6558_v25 = vpop.permute.xlu0 %3165 }
 0x142   : > { %v2357_v53 = vrot.slane %v2355_v7, 5  ;;  %v4529_v10 = vcombine.low %v2340_v51, %v2350_v13  ;;  %v2550_v56 = vor.u32 %v2549_v2, %v2546_v9  ;;  %3345 = vrot.lane.b32.xlu0 %v4514_v11, %s4958_s9  ;;  %v2559_v31 = vrot.slane %v2557_v55, 4  ;;  %v2619_v9 = vld [vmem:[#allocation2 + $0x48] sm:$0xe] }
 0x143   : > { %v909_v21 = vld [vmem:[#allocation2 + $0xbc] sm:$0x1]  ;;  %v2361_v6 = vshll.u32 %v6538_v18, 16  ;;  %v2367_v5 = vrot.slane %v2365_v22, 4  ;;  %v4409_v50 = vrot.slane %v2627_v44, 9  ;;  %v2765_v46 = vrot.slane %v6382_v19, 5 }
 0x144   : > { %v910_v45 = vsel %vm5042_vm2, %v740_v58, %v909_v21  ;;  %v6565_v24 = vrot.slane %v2550_v56, 4  ;;  %v853_v62 = vld [vmem:[#allocation2 + $0x5c] sm:$0x1]  ;;  %v2358_v48 = vor.u32 %v2357_v53, %v2354_v63  ;;  %v2560_v55 = vor.u32 %v2559_v31, %v6555_v34  ;;  %v988_v58 = vld [vmem:[#allocation2 + $0xa8] sm:$0xf] }
 0x145   : > { %3439 = vrot.lane.b32.xlu1 %v4537_v36, %s4959_s10  ;;  %911 = vst [vmem:[#allocation2 + $0xbc] sm:$0x1] %v910_v45  ;;  %v854_v51 = vsel %vm5042_vm2, %v604_v52, %v853_v62  ;;  %v6570_v14 = vrot.slane %v2361_v6, 5  ;;  %v6580_v2 = vsel %vm3527_vm15, %v4423_v41, %v6259_v61  ;;  %v6587_v52 = vsel %vm3527_vm15, %v4415_v23, %v6267_v49  ;;  %v6601_v49 = vpop.permute.xlu1 %3259  ;;  %v972_v36 = vld [vmem:[#allocation2 + $0x48] sm:$0xf]  ;;  %v6608_v13 = vpop.permute.xlu0 %3243 }
 0x146   : > { %855 = vst [vmem:[#allocation2 + $0x5c] sm:$0x1] %v854_v51  ;;  %v6573_v27 = vrot.slane %v2358_v48, 4  ;;  %3423 = vrot.lane.b32.xlu0 %v4529_v10, %s4959_s10  ;;  %v2556_v19 = vsel %vm5298_vm14, %v6565_v24, %v6555_v34  ;;  %v2767_v61 = vrot.slane %v2765_v46, 4  ;;  %v2768_v54 = vrot.slane %v6465_v38, 5  ;;  %7462 = vst [vmem:[#allocation6_spill] sm:$0xff] %v6608_v13 }
 0x147   : > { %v2368_v47 = vor.u32 %v2367_v5, %v6570_v14  ;;  %v4401_v41 = vrot.slane %v2619_v9, 9  ;;  %v2709_v29 = vrot.slane %v6440_v39, 5  ;;  %v2561_v23 = vrot.slane %v2560_v55, 4  ;;  %v6629_v45 = vld [vmem:[#allocation2 + $0x50] sm:$0x1] }
 0x148   : > { %v6605_v7 = vsel %vm5186_vm11, %v4409_v50, %v2765_v46  ;;  %v2712_v22 = vrot.slane %v6491_v28, 5  ;;  %v1348_v11 = vshrl.u32 %v988_v58, 16  ;;  %v2364_v39 = vsel %vm5298_vm14, %v6573_v27, %v6570_v14  ;;  %v6617_v28 = vld [vmem:[#allocation2 + $0x4c] sm:$0xf]  ;;  %v6652_v13 = vld [vmem:[#allocation2 + $0x28] sm:$0xf] }
 0x149   : > { %v2369_v38 = vrot.slane %v2368_v47, 4  ;;  %v2711_v44 = vrot.slane %v2709_v29, 4  ;;  %v1351_v63 = vshll.u32 %v988_v58, 16  ;;  %v1357_v10 = vshll.u32 %v6595_v8, 16  ;;  %v6639_v58 = vpop.permute.xlu1 %3261 }
 0x14a   : > { %v1350_v53 = vrot.slane %v1348_v11, 4  ;;  %v1361_v56 = vshrl.u32 %v6595_v8, 16  ;;  %v1367_v21 = vshll.u32 %v6599_v4, 16  ;;  %v6623_v31 = vsel %vm5186_vm11, %v2767_v61, %v2768_v54  ;;  %7463 = vst [vmem:[#allocation7_spill] sm:$0xff] %v6639_v58  ;;  %v6650_v58 = vld [vmem:[#allocation2 + $0x24] sm:$0xf] }
 0x14b   : > { %v6627_v6 = vsel %vm5186_vm11, %v4401_v41, %v2709_v29  ;;  %v1353_v5 = vrot.slane %v1351_v63, 5  ;;  %v1156_v24 = vshrl.u32 %v972_v36, 16  ;;  %v6636_v50 = vsel %vm5186_vm11, %v2711_v44, %v2712_v22  ;;  %v6642_v29 = vpop.permute.xlu0 %3245 }
 0x14c   : > { %v6619_v34 = vld [vmem:[#allocation2 + $0xbc] sm:$0x1]  ;;  %v1359_v55 = vrot.slane %v1357_v10, 5  ;;  %v1363_v51 = vrot.slane %v1361_v56, 4  ;;  %v1369_v9 = vrot.slane %v1367_v21, 5  ;;  %v1159_v54 = vshll.u32 %v972_v36, 16 }
 0x14d   : > { %v2563_v62 = vshll.u32 %v6619_v34, 16  ;;  %v6632_v48 = vld [vmem:[#allocation2 + $0x5c] sm:$0x1]  ;;  %v1354_v46 = vor.u32 %v1353_v5, %v1350_v53  ;;  %v1158_v27 = vrot.slane %v1156_v24, 4  ;;  %v1165_v41 = vshll.u32 %v6617_v28, 16  ;;  %7464 = vst [vmem:[#allocation8_spill] sm:$0xff] %v6642_v29 }
 0x14e   : > { %v2371_v14 = vshll.u32 %v6632_v48, 16  ;;  %v1364_v61 = vor.u32 %v1363_v51, %v1359_v55  ;;  %v1169_v22 = vshrl.u32 %v6617_v28, 16  ;;  %v1175_v44 = vshll.u32 %v6629_v45, 16  ;;  %v4853_v24 = vld [vmem:[#allocation2 + $0x84] sm:$0xf] }
 0x14f   : > { %v2565_v47 = vrot.slane %v2563_v62, 5  ;;  %v1355_v63 = vrot.slane %v1354_v46, 4  ;;  %v1161_v56 = vrot.slane %v1159_v54, 5  ;;  %v1167_v21 = vrot.slane %v1165_v41, 5  ;;  %v4854_v62 = vld [vmem:[#allocation2 + $0x88] sm:$0xf] }
 0x150   : > { %v2373_v11 = vrot.slane %v2371_v14, 5  ;;  %v1365_v10 = vrot.slane %v1364_v61, 4  ;;  %v4424_v51 = vcombine.low %v4853_v24, %v4854_v62  ;;  %v1171_v29 = vrot.slane %v1169_v22, 4  ;;  %v2628_v14 = vld [vmem:[#allocation2 + $0xb4] sm:$0xe] }
 0x151   : > { %v2566_v53 = vsel %vm5298_vm14, %v2561_v23, %v2565_v47  ;;  %v4416_v23 = vcombine.low %v6650_v58, %v6652_v13  ;;  %v4553_v47 = vcombine.low %v6605_v7, %v6623_v31  ;;  %v2620_v61 = vld [vmem:[#allocation2 + $0x54] sm:$0xe]  ;;  %v1177_v41 = vrot.slane %v1175_v44, 5 }
 0x152   : > { %v4538_v5 = vcombine.low %v2556_v19, %v2566_v53  ;;  %v2374_v36 = vsel %vm5298_vm14, %v2369_v38, %v2373_v11  ;;  %v1162_v19 = vor.u32 %v1161_v56, %v1158_v27  ;;  %v4545_v38 = vcombine.low %v6627_v6, %v6636_v50  ;;  %v6663_v11 = vpop.permute.xlu1 %3355  ;;  %v6669_v53 = vpop.permute.xlu0 %3339 }
 0x153   : > { %v4530_v46 = vcombine.low %v2364_v39, %v2374_v36  ;;  %v1360_v39 = vsel %vm5298_vm14, %v1355_v63, %v1359_v55  ;;  %v1172_v54 = vor.u32 %v1171_v29, %v1167_v21  ;;  %v1370_v22 = vsel %vm5298_vm14, %v1365_v10, %v1369_v9  ;;  %v990_v29 = vld [vmem:[#allocation2 + $0xb4] sm:$0xf] }
 0x154   : > { %3441 = vrot.lane.b32.xlu1 %v4538_v5, %s4959_s10  ;;  %v1163_v7 = vrot.slane %v1162_v19, 4  ;;  %v4410_v31 = vrot.slane %v2628_v14, 9  ;;  %v2772_v27 = vrot.slane %v6529_v60, 5  ;;  %v2775_v6 = vrot.slane %v6619_v34, 5  ;;  %v6680_v60 = vld [vmem:[#allocation2 + $0xb8] sm:$0xf] }
 0x155   : > { %3425 = vrot.lane.b32.xlu0 %v4530_v46, %s4959_s10  ;;  %v1173_v56 = vrot.slane %v1172_v54, 4  ;;  %v4402_v50 = vrot.slane %v2620_v61, 9  ;;  %v2716_v55 = vrot.slane %v6538_v18, 5  ;;  %v6675_v63 = vsel %vm3527_vm15, %v4424_v51, %v6318_v30  ;;  %v6687_v30 = vld [vmem:[#allocation2 + $0xbc] sm:$0x1] }
 0x156   : > { %v1168_v9 = vsel %vm5298_vm14, %v1163_v7, %v1167_v21  ;;  %v2774_v44 = vrot.slane %v2772_v27, 4  ;;  %v2719_v10 = vrot.slane %v6632_v48, 5  ;;  %v4443_v5 = vcombine.low %v1360_v39, %v1370_v22  ;;  %v974_v51 = vld [vmem:[#allocation2 + $0x54] sm:$0xf]  ;;  %v6698_v61 = vld [vmem:[#allocation2 + $0x58] sm:$0xf] }
 0x157   : > { %v1178_v34 = vsel %vm5298_vm14, %v1173_v56, %v1177_v41  ;;  %v2773_v18 = vsel %vm5186_vm11, %v4410_v31, %v2772_v27  ;;  %v2718_v36 = vrot.slane %v2716_v55, 4  ;;  %v1372_v62 = vshrl.u32 %v990_v29, 16  ;;  %v6704_v7 = vld [vmem:[#allocation2 + $0x5c] sm:$0x1]  ;;  %v6706_v31 = vpop.permute.xlu0 %3341  ;;  %v1401_v21 = vld [vmem:[#allocation2 + $0x48] sm:$0xe] }
 0x158   : > { %3519 = vrot.lane.b32.xlu1 %v4553_v47, %s4960_s11  ;;  %v4435_v24 = vcombine.low %v1168_v9, %v1178_v34  ;;  %v2776_v48 = vsel %vm5186_vm11, %v2774_v44, %v2775_v6  ;;  %v2717_v14 = vsel %vm5186_vm11, %v4402_v50, %v2716_v55  ;;  %v1375_v47 = vshll.u32 %v990_v29, 16 }
 0x159   : > { %3503 = vrot.lane.b32.xlu0 %v4545_v38, %s4960_s11  ;;  %v2720_v46 = vsel %vm5186_vm11, %v2718_v36, %v2719_v10  ;;  %v1381_v19 = vshll.u32 %v6680_v60, 16  ;;  %v6700_v38 = vpop.permute.xlu1 %3357  ;;  %v4554_v39 = vcombine.low %v2773_v18, %v2776_v48  ;;  %v1374_v54 = vrot.slane %v1372_v62, 4  ;;  %v1409_v48 = vld [vmem:[#allocation2 + $0xa8] sm:$0xe] }
 0x15a   : > { %v1385_v41 = vshrl.u32 %v6680_v60, 16  ;;  %v1391_v22 = vshll.u32 %v6687_v30, 16  ;;  %v1377_v27 = vrot.slane %v1375_v47, 5  ;;  %v1180_v6 = vshrl.u32 %v974_v51, 16 }
 0x15b   : > { %v1383_v56 = vrot.slane %v1381_v19, 5  ;;  %v1183_v50 = vshll.u32 %v974_v51, 16  ;;  %v4546_v55 = vcombine.low %v2717_v14, %v2720_v46  ;;  %v1189_v9 = vshll.u32 %v6698_v61, 16 }
 0x15c   : > { %2931 = vrot.lane.b32.xlu1 %v4443_v5, %s4956_s7  ;;  %v1387_v29 = vrot.slane %v1385_v41, 4  ;;  %v1193_v44 = vshrl.u32 %v6698_v61, 16  ;;  %v1378_v10 = vor.u32 %v1377_v27, %v1374_v54  ;;  %v1182_v34 = vrot.slane %v1180_v6, 4 }
 0x15d   : > { %2915 = vrot.lane.b32.xlu0 %v4435_v24, %s4956_s7  ;;  %v1185_v18 = vrot.slane %v1183_v50, 5  ;;  %v1199_v36 = vshll.u32 %v6704_v7, 16  ;;  %v1393_v5 = vrot.slane %v1391_v22, 5  ;;  %v1191_v47 = vrot.slane %v1189_v9, 5  ;;  %v6715_v41 = vpop.permute.xlu1 %3435  ;;  %v6719_v22 = vpop.permute.xlu0 %3419 }
 0x15e   : > { %v1388_v62 = vor.u32 %v1387_v29, %v1383_v56  ;;  %v1195_v19 = vrot.slane %v1193_v44, 4  ;;  %v1509_v51 = vrot.slane %v6629_v45, 5  ;;  %v1379_v24 = vrot.slane %v1378_v10, 4 }
 0x15f   : > { %v1186_v14 = vor.u32 %v1185_v18, %v1182_v34  ;;  %v1201_v46 = vrot.slane %v1199_v36, 5  ;;  %v4379_v6 = vrot.slane %v1409_v48, 9  ;;  %v1562_v50 = vrot.slane %v6595_v8, 5  ;;  %v1410_v18 = vld [vmem:[#allocation2 + $0xb4] sm:$0xe] }
 0x160   : > { %3521 = vrot.lane.b32.xlu1 %v4554_v39, %s4960_s11  ;;  %v1389_v54 = vrot.slane %v1388_v62, 4  ;;  %v1196_v27 = vor.u32 %v1195_v19, %v1191_v47  ;;  %v1384_v29 = vsel %vm5298_vm14, %v1379_v24, %v1383_v56  ;;  %v4371_v9 = vrot.slane %v1401_v21, 9  ;;  %v1402_v36 = vld [vmem:[#allocation2 + $0x54] sm:$0xe] }
 0x161   : > { %3505 = vrot.lane.b32.xlu0 %v4546_v55, %s4960_s11  ;;  %v1187_v45 = vrot.slane %v1186_v14, 4  ;;  %v1506_v39 = vrot.slane %v6617_v28, 5  ;;  %v1563_v55 = vsel %vm5186_vm11, %v4379_v6, %v1562_v50  ;;  %v1564_v34 = vrot.slane %v1562_v50, 4 }
 0x162   : > { %v1394_v44 = vsel %vm5298_vm14, %v1389_v54, %v1393_v5  ;;  %v1197_v10 = vrot.slane %v1196_v27, 4  ;;  %v3539_v8 = vsel %vm3527_vm15, %v4416_v23, %v6324_v43  ;;  %v3598_v48 = vsel %vm3576_vm0, %v6580_v2, %v6369_v15  ;;  %v6749_v15 = vpop.permute.xlu1 %3437  ;;  %v6756_v54 = vpop.permute.xlu0 %3421 }
 0x163   : > { %v4444_v56 = vcombine.low %v1384_v29, %v1394_v44  ;;  %v1192_v21 = vsel %vm5298_vm14, %v1187_v45, %v1191_v47  ;;  %v1508_v28 = vrot.slane %v1506_v39, 4  ;;  %v7465_v5 = vrot.slane %v6599_v4, 5  ;;  %v237_v44 = vld [vmem:[#allocation2 + $0xc0] sm:$0x1] }
 0x164   : > { %v1202_v62 = vsel %vm5298_vm14, %v1197_v10, %v1201_v46  ;;  %v1507_v43 = vsel %vm5186_vm11, %v4371_v9, %v1506_v39  ;;  %v4380_v19 = vrot.slane %v1410_v18, 9  ;;  %v3582_v2 = vsel %vm3576_vm0, %v6587_v52, %v6375_v0  ;;  %v1602_v46 = vld [vmem:[#allocation2 + $0xb4] sm:$0xf] }
 0x165   : > { %v1566_v13 = vsel %vm5186_vm11, %v1564_v34, %v7465_v5  ;;  %2933 = vrot.lane.b32.xlu1 %v4444_v56, %s4956_s7  ;;  %v4436_v58 = vcombine.low %v1192_v21, %v1202_v62  ;;  %v1510_v47 = vsel %vm5186_vm11, %v1508_v28, %v1509_v51  ;;  %v1569_v4 = vrot.slane %v6680_v60, 5  ;;  %v6764_v0 = vld [vmem:[#allocation2 + $0x54] sm:$0xf] }
 0x166   : > { %v4459_v23 = vcombine.low %v1563_v55, %v1566_v13  ;;  %v1572_v24 = vrot.slane %v6687_v30, 5  ;;  %v4372_v14 = vrot.slane %v1402_v36, 9  ;;  %v3600_v27 = vsel %vm3576_vm0, %v6675_v63, %v6415_v26  ;;  %v6787_v10 = vld [vmem:[%s5065_s30 + $0xf0] sm:$0xff]  ;;  %v6802_v56 = vpop.permute.xlu1 %3515 }
 0x167   : > { %2917 = vrot.lane.b32.xlu0 %v4436_v58, %s4956_s7  ;;  %v4451_v51 = vcombine.low %v1507_v43, %v1510_v47  ;;  %v1513_v6 = vrot.slane %v6698_v61, 5  ;;  %v1516_v50 = vrot.slane %v6704_v7, 5  ;;  %v3584_v52 = vsel %vm3576_vm0, %v3539_v8, %v6424_v35  ;;  %v6775_v7 = vld [vmem:[#allocation2 + $0xb8] sm:$0xf]  ;;  %v1588_v43 = vld [vmem:[#allocation2 + $0x60] sm:$0xf] }
 0x168   : > { %v3631_v60 = vsel %vm7444_vm1, %v3598_v48, %v6446_v17  ;;  %v1570_v30 = vsel %vm5186_vm11, %v4380_v19, %v1569_v4  ;;  %v1571_v26 = vrot.slane %v1569_v4, 4  ;;  %v1959_v29 = vshrl.u32 %v1602_v46, 16  ;;  %v6800_v8 = vld [vmem:[%s5065_s30 + $0xf8] sm:$0xff]  ;;  %v6813_v48 = vpop.permute.xlu0 %3499  ;;  %v6824_v19 = vld [vmem:[#allocation2 + $0x64] sm:$0xf]  ;;  %s7240_s30 = scalar_lea.vmem [#allocation3], %s7226_s29 }
 0x169   : > { %3011 = vrot.lane.b32.xlu1 %v4459_v23, %s4954_s5  ;;  %v1514_v63 = vsel %vm5186_vm11, %v4372_v14, %v1513_v6  ;;  %v1515_v61 = vrot.slane %v1513_v6, 4  ;;  %v1962_v45 = vshll.u32 %v1602_v46, 16  ;;  %v3615_v35 = vsel %vm7444_vm1, %v3582_v2, %v6455_v57 }
 0x16a   : > { %v6781_v17 = vsel %vm7444_vm1, %v3600_v27, %v6483_v59  ;;  %v1573_v9 = vsel %vm5186_vm11, %v1571_v26, %v1572_v24  ;;  %v1767_v39 = vshrl.u32 %v6764_v0, 16  ;;  %v6791_v55 = vsel %vm7444_vm1, %v3584_v52, %v6493_v40  ;;  %v6796_v59 = vld [vmem:[#allocation2 + $0x58] sm:$0xf] }
 0x16b   : > { %2995 = vrot.lane.b32.xlu0 %v4451_v51, %s4954_s5  ;;  %v4460_v34 = vcombine.low %v1570_v30, %v1573_v9  ;;  %v1517_v57 = vsel %vm5186_vm11, %v1515_v61, %v1516_v50  ;;  %v1770_v18 = vshll.u32 %v6764_v0, 16  ;;  %v6806_v21 = vsel %vm7443_vm3, %v3631_v60, %v6527_v20 }
 0x16c   : > { %v6810_v40 = vsel %vm7443_vm3, %v3615_v35, %v6534_v33  ;;  %v4452_v28 = vcombine.low %v1514_v63, %v1517_v57  ;;  %v4475_v36 = vcombine.low %v1602_v46, %v6775_v7  ;;  %v1961_v62 = vrot.slane %v1959_v29, 4  ;;  %v6829_v46 = vld [vmem:[#allocation2 + $0xbc] sm:$0x1]  ;;  %v6834_v63 = vpop.permute.xlu1 %2927  ;;  %v6840_v35 = vpop.permute.xlu0 %2911 }
 0x16d   : > { %3013 = vrot.lane.b32.xlu1 %v4460_v34, %s4954_s5  ;;  %v1964_v5 = vrot.slane %v1962_v45, 5  ;;  %v238_v13 = vsel %vm5042_vm2, 0, %v237_v44  ;;  %v4646_v20 = vpack.c.bf16 %v6787_v10, %v6787_v10  ;;  %v1972_v58 = vshrl.u32 %v6775_v7, 16  ;;  %v6843_v34 = vld [vmem:[#allocation2 + $0x5c] sm:$0x1] }
 0x16e   : > { %v1769_v33 = vrot.slane %v1767_v39, 4  ;;  %v1780_v23 = vshrl.u32 %v6796_v59, 16  ;;  %239 = vst [vmem:[#allocation2 + $0xc0] sm:$0x1] %v238_v13  ;;  %v4647_v47 = vpack.c.bf16 %v6800_v8, %v6800_v8  ;;  %v1772_v2 = vrot.slane %v1770_v18, 5 }
 0x16f   : > { %2997 = vrot.lane.b32.xlu0 %v4452_v28, %s4954_s5  ;;  %v4467_v4 = vcombine.low %v6764_v0, %v6796_v59  ;;  %v742_v24 = vshrl.u32 %v4646_v20, 16  ;;  %v745_v14 = vshll.u32 %v4646_v20, 16  ;;  %v1791_v6 = vshrl.u32 %v1588_v43, 16  ;;  %s4240_s5 = sshll.u32 %s7240_s30, 4  ;;  %s7381_s5 = int_to_ptr.vmem [resolvable:$true] %s4240_s5 }
 0x170   : > { %v750_v27 = vshrl.u32 %v4647_v47, 16  ;;  %v753_v51 = vshll.u32 %v4647_v47, 16  ;;  %v1794_v50 = vshll.u32 %v1588_v43, 16  ;;  %v1804_v60 = vshrl.u32 %v6824_v19, 16 }
 0x171   : > { %3107 = vrot.lane.b32.xlu1 %v4475_v36, %s4953_s4  ;;  %v744_v52 = vrot.slane %v742_v24, 7  ;;  %v1965_v30 = vor.u32 %v1964_v5, %v1961_v62  ;;  %v1968_v26 = vshll.u32 %v6775_v7, 16  ;;  %v4468_v0 = vcombine.low %v1588_v43, %v6824_v19  ;;  %v293_v5 = vld [vmem:[#allocation2 + $0xc8] sm:$0x1] }
 0x172   : > { %v6836_v61 = vrot.slane %v750_v27, 7  ;;  %v1974_v29 = vrot.slane %v1972_v58, 4  ;;  %v1978_v45 = vshll.u32 %v6829_v46, 16  ;;  %v1773_v57 = vor.u32 %v1772_v2, %v1769_v33 }
 0x173   : > { %3091 = vrot.lane.b32.xlu0 %v4467_v4, %s4953_s4  ;;  %v747_v9 = vor.u32 %v745_v14, %v744_v52  ;;  %v748_v39 = vrot.slane %v744_v52, 4  ;;  %v1970_v44 = vrot.slane %v1968_v26, 5  ;;  %v1793_v28 = vrot.slane %v1791_v6, 4  ;;  %v6857_v14 = vld [vmem:[#allocation2 + $0x68] sm:$0x1]  ;;  %v6868_v26 = vpop.permute.xlu0 %3501 }
 0x174   : > { %v755_v18 = vor.u32 %v753_v51, %v6836_v61  ;;  %v1796_v36 = vrot.slane %v1794_v50, 5  ;;  %v1966_v62 = vrot.slane %v1965_v30, 4  ;;  %v1980_v43 = vrot.slane %v1978_v45, 5 }
 0x175   : > { %v912_v13 = vld [vmem:[#allocation2 + $0xc0] sm:$0xf]  ;;  %v1975_v20 = vor.u32 %v1974_v29, %v1970_v44  ;;  %v1776_v58 = vshll.u32 %v6796_v59, 16  ;;  %v1782_v47 = vrot.slane %v1780_v23, 4  ;;  %v6850_v4 = vsel %vm7443_vm3, %v6781_v17, %v6552_v12  ;;  %v6863_v17 = vpop.permute.xlu1 %3517 }
 0x176   : > { %v756_v33 = vsel %vm5081_vm7, %v748_v39, %v755_v18  ;;  %v913_v2 = vsel %vm5091_vm8, %v747_v9, %v912_v13  ;;  %v1786_v24 = vshll.u32 %v6843_v34, 16  ;;  %v1774_v27 = vrot.slane %v1773_v57, 4  ;;  %v2020_v39 = vld [vmem:[#allocation2 + $0xb4] sm:$0xe] }
 0x177   : > { %914 = vst [vmem:[#allocation2 + $0xc0] sm:$0xf] %v913_v2  ;;  %915 = vst.msk [vmem:[#allocation2 + $0xc4] sm:$0xf] %vm346_vm6, %v756_v33  ;;  %3093 = vrot.lane.b32.xlu0 %v4468_v0, %s4953_s4  ;;  %v1976_v23 = vrot.slane %v1975_v20, 4  ;;  %v1778_v51 = vrot.slane %v1776_v58, 5  ;;  %v1971_v6 = vsel %vm5298_vm14, %v1966_v62, %v1970_v44  ;;  %v1797_v50 = vor.u32 %v1796_v36, %v1793_v28 }
 0x178   : > { %v294_v12 = vsel %vm5050_vm4, 0, %v293_v5  ;;  %v1800_v52 = vshll.u32 %v6824_v19, 16  ;;  %v1806_v30 = vrot.slane %v1804_v60, 4  ;;  %v1788_v45 = vrot.slane %v1786_v24, 5  ;;  %v2012_v28 = vld [vmem:[#allocation2 + $0x54] sm:$0xe] }
 0x179   : > { %295 = vst [vmem:[#allocation2 + $0xc8] sm:$0x1] %v294_v12  ;;  %v1981_v0 = vsel %vm5298_vm14, %v1976_v23, %v1980_v43  ;;  %v1783_v29 = vor.u32 %v1782_v47, %v1778_v51  ;;  %v1810_v9 = vshll.u32 %v6857_v14, 16  ;;  %v6876_v57 = vsel %vm7443_vm3, %v6791_v55, %v6558_v25  ;;  %v6891_v33 = vpop.permute.xlu1 %2929  ;;  %v6895_v12 = vpop.permute.xlu0 %2913 }
 0x17a   : > { %v6881_v44 = vsel %vm3675_vm5, %v6806_v21, %v6601_v49  ;;  %v1798_v60 = vrot.slane %v1797_v50, 4  ;;  %v1802_v18 = vrot.slane %v1800_v52, 5  ;;  %v757_v36 = vrot.slane %v6836_v61, 4 }
 0x17b   : > { %v4491_v62 = vcombine.low %v1971_v6, %v1981_v0  ;;  %v1779_v5 = vsel %vm5298_vm14, %v1774_v27, %v1778_v51  ;;  %v1784_v13 = vrot.slane %v1783_v29, 4  ;;  %v1812_v43 = vrot.slane %v1810_v9, 5 }
 0x17c   : > { %v1807_v20 = vor.u32 %v1806_v30, %v1802_v18  ;;  %v4395_v58 = vrot.slane %v2020_v39, 9  ;;  %v2170_v25 = vrot.slane %v6775_v7, 5  ;;  %v2173_v49 = vrot.slane %v6829_v46, 5 }
 0x17d   : > { %v1789_v55 = vsel %vm5298_vm14, %v1784_v13, %v1788_v45  ;;  %v4387_v21 = vrot.slane %v2012_v28, 9  ;;  %v2114_v47 = vrot.slane %v6796_v59, 5  ;;  %v1803_v23 = vsel %vm5298_vm14, %v1798_v60, %v1802_v18  ;;  %v2013_v45 = vld [vmem:[#allocation2 + $0x60] sm:$0xe] }
 0x17e   : > { %v1604_v61 = vld [vmem:[#allocation2 + $0xc0] sm:$0xf]  ;;  %v1605_v2 = vld [vmem:[#allocation2 + $0xc4] sm:$0xf]  ;;  %v4483_v24 = vcombine.low %v1779_v5, %v1789_v55  ;;  %v1808_v27 = vrot.slane %v1807_v20, 4  ;;  %v2172_v51 = vrot.slane %v2170_v25, 4 }
 0x17f   : > { %v1983_v7 = vshrl.u32 %v1604_v61, 16  ;;  %v1986_v6 = vshll.u32 %v1604_v61, 16  ;;  %v1996_v50 = vshrl.u32 %v1605_v2, 16  ;;  %v4476_v52 = vcombine.low %v1604_v61, %v1605_v2  ;;  %v2021_v28 = vld [vmem:[#allocation2 + $0xc0] sm:$0xe]  ;;  %v7466_v5 = vld [vmem:[#allocation6_spill] sm:$0xff] }
 0x180   : > { %v916_v46 = vld [vmem:[#allocation2 + $0xc8] sm:$0x1]  ;;  %3171 = vrot.lane.b32.xlu0 %v4483_v24, %s4957_s8  ;;  %v1992_v30 = vshll.u32 %v1605_v2, 16  ;;  %v1813_v0 = vsel %vm5298_vm14, %v1808_v27, %v1812_v43  ;;  %v2117_v29 = vrot.slane %v6843_v34, 5  ;;  %v3681_v13 = vsel %vm3675_vm5, %v6810_v40, %v7466_v5  ;;  %v7467_v34 = vld [vmem:[#allocation7_spill] sm:$0xff]  ;;  %v6922_v40 = vpop.permute.xlu1 %3007 }
 0x181   : > { %v917_v59 = vsel %vm5042_vm2, %v757_v36, %v916_v46  ;;  %v1985_v9 = vrot.slane %v1983_v7, 4  ;;  %v1988_v39 = vrot.slane %v1986_v6, 5  ;;  %3109 = vrot.lane.b32.xlu1 %v4476_v52, %s4953_s4  ;;  %v1998_v60 = vrot.slane %v1996_v50, 4  ;;  %v6928_v7 = vpop.permute.xlu0 %2991  ;;  %v7468_v6 = vld [vmem:[#allocation8_spill] sm:$0xff]  ;;  %s4682_s4 = sshll.u32 %s4943_s15, 11  ;;  %s7391_s15 = scalar_lea.sflag [#allocation4], %s175_s26 }
 0x182   : > { %918 = vst [vmem:[#allocation2 + $0xc8] sm:$0x1] %v917_v59  ;;  %v4484_v18 = vcombine.low %v1803_v23, %v1813_v0  ;;  %v6907_v36 = vrot.slane %v1992_v30, 5  ;;  %v2115_v20 = vsel %vm5186_vm11, %v4387_v21, %v2114_v47  ;;  %v2116_v43 = vrot.slane %v2114_v47, 4  ;;  %v240_v5 = vld [vmem:[#allocation2 + $0xcc] sm:$0x1] }
 0x183   : > { %v3699_v55 = vsel %vm3675_vm5, %v6850_v4, %v7467_v34  ;;  %v1989_v61 = vor.u32 %v1988_v39, %v1985_v9  ;;  %v6916_v24 = vsel %vm5186_vm11, %v4395_v58, %v2170_v25  ;;  %v6920_v23 = vsel %vm5186_vm11, %v2172_v51, %v2173_v49  ;;  %v2195_v9 = vld [vmem:[#allocation2 + $0x60] sm:$0xf]  ;;  %v6962_v39 = vld [vmem:[#allocation2 + $0x64] sm:$0xf] }
 0x184   : > { %v1999_v27 = vor.u32 %v1998_v60, %v6907_v36  ;;  %3173 = vrot.lane.b32.xlu0 %v4484_v18, %s4957_s8  ;;  %v2118_v21 = vsel %vm5186_vm11, %v2116_v43, %v2117_v29  ;;  %v4396_v47 = vrot.slane %v2021_v28, 9  ;;  %v4388_v4 = vrot.slane %v2013_v45, 9  ;;  %v6964_v60 = vpop.permute.xlu1 %3009  ;;  %v6979_v34 = vld [vmem:[#allocation2 + $0xc4] sm:$0xf] }
 0x185   : > { %3187 = vrot.lane.b32.xlu1 %v4491_v62, %s4957_s8  ;;  %v4499_v58 = vcombine.low %v2115_v20, %v2118_v21  ;;  %v2177_v25 = vrot.slane %v1605_v2, 5  ;;  %v2121_v49 = vrot.slane %v6824_v19, 5  ;;  %v2124_v51 = vrot.slane %v6857_v14, 5 }
 0x186   : > { %v3683_v50 = vsel %vm3675_vm5, %v6876_v57, %v7468_v6  ;;  %vm7469_vm9 = vcmask 146432   ;;  %v1990_v59 = vrot.slane %v1989_v61, 4  ;;  %v2000_v57 = vrot.slane %v1999_v27, 4 }
 0x187   : > { %v3730_v52 = vsel %vm7469_vm9, %v6881_v44, %v6663_v11  ;;  %vm7470_vm10 = vmmov %vm7469_vm9  ;;  %v2122_v14 = vsel %vm5186_vm11, %v4388_v4, %v2121_v49  ;;  %v2123_v2 = vrot.slane %v2121_v49, 4  ;;  %v4507_v0 = vcombine.low %v6916_v24, %v6920_v23  ;;  %v6995_v49 = vld [vmem:[#allocation2 + $0x70] sm:$0xf] }
 0x188   : > { %v3714_v46 = vsel %vm7470_vm10, %v3681_v13, %v6669_v53  ;;  %vm7471_vm3 = vmmov %vm7469_vm9  ;;  %3251 = vrot.lane.b32.xlu0 %v4499_v58, %s4955_s6  ;;  %vm7473_vm9 = vcmask 171008   ;;  %v6958_v44 = vsel %vm5186_vm11, %v4396_v47, %v2177_v25  ;;  %v2179_v29 = vrot.slane %v2177_v25, 4  ;;  %v6973_v13 = vpop.permute.xlu0 %2993  ;;  %v2197_v47 = vld [vmem:[#allocation2 + $0x6c] sm:$0xf] }
 0x189   : > { %v3732_v62 = vsel %vm7471_vm3, %v3699_v55, %v6700_v38  ;;  %vm7472_vm1 = vmmov %vm7471_vm3  ;;  %v1621_v30 = vld [vmem:[#allocation2 + $0xc8] sm:$0x1]  ;;  %v3763_v11 = vsel %vm7473_vm9, %v3730_v52, %v6715_v41  ;;  %v6954_v38 = vld [vmem:[#allocation2 + $0xc0] sm:$0xf]  ;;  %v2125_v45 = vsel %vm5186_vm11, %v2123_v2, %v2124_v51  ;;  %v1995_v41 = vsel %vm5298_vm14, %v1990_v59, %v6907_v36 }
 0x18a   : > { %v3716_v19 = vsel %vm7472_vm1, %v3683_v50, %v6706_v31  ;;  %vm7474_vm10 = vmmov %vm7473_vm9  ;;  %v2002_v31 = vshll.u32 %v1621_v30, 16  ;;  %v4500_v18 = vcombine.low %v2122_v14, %v2125_v45  ;;  %v2568_v55 = vshrl.u32 %v6954_v38, 16 }
 0x18b   : > { %v3747_v53 = vsel %vm7474_vm10, %v3714_v46, %v6719_v22  ;;  %v2180_v22 = vrot.slane %v1621_v30, 5  ;;  %vm7475_vm1 = vmmov %vm7473_vm9  ;;  %v2571_v36 = vshll.u32 %v6954_v38, 16  ;;  %v2376_v61 = vshrl.u32 %v2195_v9, 16 }
 0x18c   : > { %v6971_v28 = vsel %vm7475_vm1, %v3732_v62, %v6749_v15  ;;  %v2004_v20 = vrot.slane %v2002_v31, 5  ;;  %vm7476_vm3 = vmmov %vm7475_vm1  ;;  %3253 = vrot.lane.b32.xlu0 %v4500_v18, %s4955_s6  ;;  %v2379_v27 = vshll.u32 %v2195_v9, 16  ;;  %v4515_v15 = vcombine.low %v2195_v9, %v6962_v39  ;;  %v7007_v30 = vpop.permute.xlu0 %3087 }
 0x18d   : > { %v6977_v43 = vsel %vm7476_vm3, %v3716_v19, %v6756_v54  ;;  %v3796_v21 = vsel %vm3774_vm12, %v3763_v11, %v6802_v56  ;;  %v3780_v4 = vsel %vm3774_vm12, %v3747_v53, %v6813_v48  ;;  %v241_v58 = vsel %vm5042_vm2, 0, %v240_v5  ;;  %v7013_v5 = vld [vmem:[#allocation2 + $0xc8] sm:$0x1]  ;;  %vm7484_vm9 = vmmov %vm7475_vm1 }
 0x18e   : > { %v2005_v54 = vsel %vm5298_vm14, %v2000_v57, %v2004_v20  ;;  %v924_v25 = vmul.f32 0.0, %v6787_v10  ;;  %4725 = vmatprep.mubr.msk.bf16.mxu1 %vm3829_vm13, %v3796_v21  ;;  %v2181_v56 = vsel %vm5186_vm11, %v2179_v29, %v2180_v22  ;;  %v2581_v6 = vshrl.u32 %v6979_v34, 16  ;;  %242 = vst [vmem:[#allocation2 + $0xcc] sm:$0x1] %v241_v58  ;;  %4709 = vmatprep.mubr.msk.bf16.mxu0 %vm3829_vm13, %v3780_v4  ;;  %v7002_v10 = vpop.permute.xlu1 %3103 }
 0x18f   : > { %v4492_v51 = vcombine.low %v1995_v41, %v2005_v54  ;;  %v925_v50 = vmul.f32 0.0, %v6800_v8  ;;  %v2570_v48 = vrot.slane %v2568_v55, 4  ;;  %v2573_v52 = vrot.slane %v2571_v36, 5  ;;  %v7024_v36 = vld [vmem:[#allocation2 + $0x68] sm:$0x1] }
 0x190   : > { %v4648_v46 = vpack.c.bf16 %v924_v25, %v924_v25  ;;  %v2400_v59 = vshrl.u32 %v2197_v47, 16  ;;  %v2378_v62 = vrot.slane %v2376_v61, 4  ;;  %v2381_v19 = vrot.slane %v2379_v27, 5  ;;  %3347 = vrot.lane.b32.xlu0 %v4515_v15, %s4958_s9 }
 0x191   : > { %3189 = vrot.lane.b32.xlu1 %v4492_v51, %s4957_s8  ;;  %v4649_v14 = vpack.c.bf16 %v925_v50, %v925_v50  ;;  %v4516_v2 = vcombine.low %v2197_v47, %v6995_v49  ;;  %v4508_v8 = vcombine.low %v6958_v44, %v2181_v56  ;;  %v2389_v57 = vshrl.u32 %v6962_v39, 16  ;;  %v296_v51 = vld [vmem:[#allocation2 + $0xd4] sm:$0x1]  ;;  %v7032_v56 = vpop.permute.xlu0 %3089  ;;  %s7379_s8 = scalar_lea.hbm %s7440_s3, %s4682_s4 }
 0x192   : > { %v933_v11 = vshrl.u32 %v4648_v46, 16  ;;  %v936_v53 = vshll.u32 %v4648_v46, 16  ;;  %v2403_v45 = vshll.u32 %v2197_v47, 16  ;;  %v2577_v9 = vshll.u32 %v6979_v34, 16  ;;  %v7027_v58 = vpop.permute.xlu1 %3105 }
 0x193   : > { %v941_v31 = vshrl.u32 %v4649_v14, 16  ;;  %v944_v29 = vshll.u32 %v4649_v14, 16  ;;  %v2402_v22 = vrot.slane %v2400_v59, 4  ;;  %v2413_v18 = vshrl.u32 %v6995_v49, 16 }
 0x194   : > { %v935_v41 = vrot.slane %v933_v11, 7  ;;  %v2583_v20 = vrot.slane %v2581_v6, 4  ;;  %3349 = vrot.lane.b32.xlu0 %v4516_v2, %s4958_s9  ;;  %v7022_v55 = vrot.slane %v2577_v9, 5  ;;  %v2382_v61 = vor.u32 %v2381_v19, %v2378_v62  ;;  %v7048_v19 = vld [vmem:[#allocation2 + $0x74] sm:$0x1] }
 0x195   : > { %3267 = vrot.lane.b32.xlu1 %v4507_v0, %s4955_s6  ;;  %v7019_v44 = vrot.slane %v941_v31, 7  ;;  %v2385_v27 = vshll.u32 %v6962_v39, 16  ;;  %v953_v47 = vld [vmem:[#allocation2 + $0xcc] sm:$0xf]  ;;  %v2574_v54 = vor.u32 %v2573_v52, %v2570_v48  ;;  %v2391_v4 = vrot.slane %v2389_v57, 4  ;;  %v7062_v9 = vpop.permute.xlu0 %3167 }
 0x196   : > { %v938_v15 = vor.u32 %v936_v53, %v935_v41  ;;  %v939_v21 = vrot.slane %v935_v41, 4  ;;  %v2405_v23 = vrot.slane %v2403_v45, 5  ;;  %v2584_v0 = vor.u32 %v2583_v20, %v7022_v55  ;;  %v7059_v31 = vpop.permute.xlu1 %3183  ;;  %v2621_v45 = vld [vmem:[#allocation2 + $0x60] sm:$0xe] }
 0x197   : > { %v946_v24 = vor.u32 %v944_v29, %v7019_v44  ;;  %v2587_v25 = vshll.u32 %v7013_v5, 16  ;;  %v2383_v50 = vrot.slane %v2382_v61, 4  ;;  %v2387_v46 = vrot.slane %v2385_v27, 5 }
 0x198   : > { %v954_v6 = vsel %vm5091_vm8, %v938_v15, %v953_v47  ;;  %v2395_v48 = vshll.u32 %v7024_v36, 16  ;;  %v4523_v52 = vcombine.low %v6954_v38, %v6979_v34  ;;  %v3798_v62 = vsel %vm3774_vm12, %v6971_v28, %v6863_v17 }
 0x199   : > { %3269 = vrot.lane.b32.xlu1 %v4508_v8, %s4955_s6  ;;  %v947_v59 = vsel %vm5081_vm7, %v939_v21, %v946_v24  ;;  %955 = vst [vmem:[#allocation2 + $0xcc] sm:$0xf] %v954_v6  ;;  %v3782_v42 = vsel %vm3774_vm12, %v6977_v43, %v6868_v26  ;;  %v2575_v14 = vrot.slane %v2574_v54, 4  ;;  %v2392_v2 = vor.u32 %v2391_v4, %v2387_v46 }
 0x19a   : > { %956 = vst.msk [vmem:[#allocation2 + $0xd0] sm:$0xf] %vm346_vm6, %v947_v59  ;;  %v2397_v8 = vrot.slane %v2395_v48, 5  ;;  %v297_v37 = vsel %vm5050_vm4, 0, %v296_v51  ;;  %4726 = vmatmul.mubr.msk.bf16.gmra.mrb[4].mxu1 %vm3829_vm13, %v3798_v62  ;;  %4710 = vmatmul.mubr.msk.bf16.gmra.mrb[4].mxu0 %vm3829_vm13, %v3782_v42  ;;  %v2589_v38 = vrot.slane %v2587_v25, 5  ;;  %v2406_v17 = vor.u32 %v2405_v23, %v2402_v22 }
 0x19b   : > { %298 = vst [vmem:[#allocation2 + $0xd4] sm:$0x1] %v297_v37  ;;  %v2409_v28 = vshll.u32 %v6995_v49, 16  ;;  %v2415_v26 = vrot.slane %v2413_v18, 4  ;;  %v2585_v43 = vrot.slane %v2584_v0, 4  ;;  %v2388_v57 = vsel %vm5298_vm14, %v2383_v50, %v2387_v46 }
 0x19c   : > { %v2393_v11 = vrot.slane %v2392_v2, 4  ;;  %v2419_v53 = vshll.u32 %v7048_v19, 16  ;;  %v2407_v3 = vrot.slane %v2406_v17, 4  ;;  %v948_v22 = vrot.slane %v7019_v44, 4 }
 0x19d   : > { %3363 = vrot.lane.b32.xlu1 %v4523_v52, %s4958_s9  ;;  %v2411_v29 = vrot.slane %v2409_v28, 5  ;;  %v2580_v15 = vsel %vm5298_vm14, %v2575_v14, %v7022_v55  ;;  %v2590_v21 = vsel %vm5298_vm14, %v2585_v43, %v2589_v38  ;;  %v4403_v54 = vrot.slane %v2621_v45, 9 }
 0x19e   : > { %v2398_v41 = vsel %vm5298_vm14, %v2393_v11, %v2397_v8  ;;  %v2421_v61 = vrot.slane %v2419_v53, 5  ;;  %v2723_v0 = vrot.slane %v6962_v39, 5  ;;  %v7081_v50 = vpop.permute.xlu1 %3185  ;;  %v4539_v39 = vcombine.low %v2580_v15, %v2590_v21  ;;  %v2622_v8 = vld [vmem:[#allocation2 + $0x6c] sm:$0xe]  ;;  %v2629_v11 = vld [vmem:[#allocation2 + $0xc0] sm:$0xe] }
 0x19f   : > { %v4531_v18 = vcombine.low %v2388_v57, %v2398_v41  ;;  %v2416_v20 = vor.u32 %v2415_v26, %v2411_v29  ;;  %v2412_v47 = vsel %vm5298_vm14, %v2407_v3, %v2411_v29  ;;  %v7087_v62 = vpop.permute.xlu0 %3169  ;;  %v2726_v1 = vrot.slane %v7024_v36, 5 }
 0x1a0   : > { %v2213_v27 = vld [vmem:[#allocation2 + $0xcc] sm:$0xf]  ;;  %v2724_v37 = vsel %vm5186_vm11, %v4403_v54, %v2723_v0  ;;  %v2725_v38 = vrot.slane %v2723_v0, 4  ;;  %v2779_v28 = vrot.slane %v6979_v34, 5  ;;  %v4404_v43 = vrot.slane %v2622_v8, 9 }
 0x1a1   : > { %v7074_v4 = vld [vmem:[#allocation2 + $0xd0] sm:$0xf]  ;;  %v2592_v24 = vshrl.u32 %v2213_v27, 16  ;;  %v2595_v23 = vshll.u32 %v2213_v27, 16  ;;  %3427 = vrot.lane.b32.xlu0 %v4531_v18, %s4959_s10  ;;  %v2417_v44 = vrot.slane %v2416_v20, 4  ;;  %v2730_v3 = vrot.slane %v6995_v49, 5 }
 0x1a2   : > { %v2605_v25 = vshrl.u32 %v7074_v4, 16  ;;  %v4524_v55 = vcombine.low %v2213_v27, %v7074_v4  ;;  %v957_v51 = vld [vmem:[#allocation2 + $0xd4] sm:$0x1]  ;;  %v2601_v6 = vshll.u32 %v7074_v4, 16  ;;  %v2727_v26 = vsel %vm5186_vm11, %v2725_v38, %v2726_v1  ;;  %v3264_v45 = vpop.permute.xlu1 %3263  ;;  %v4857_v8 = vld [vmem:[#allocation2 + $0x90] sm:$0xf] }
 0x1a3   : > { %v2594_v46 = vrot.slane %v2592_v24, 4  ;;  %v2597_v48 = vrot.slane %v2595_v23, 5  ;;  %v958_v52 = vsel %vm5042_vm2, %v948_v22, %v957_v51  ;;  %v2422_v59 = vsel %vm5298_vm14, %v2417_v44, %v2421_v61  ;;  %v7100_v36 = vpop.permute.xlu0 %3247 }
 0x1a4   : > { %3365 = vrot.lane.b32.xlu1 %v4524_v55, %s4958_s9  ;;  %959 = vst [vmem:[#allocation2 + $0xd4] sm:$0x1] %v958_v52  ;;  %v2603_v42 = vrot.slane %v2601_v6, 5  ;;  %v2607_v14 = vrot.slane %v2605_v25, 4  ;;  %v4532_v2 = vcombine.low %v2412_v47, %v2422_v59  ;;  %v4547_v53 = vcombine.low %v2724_v37, %v2727_v26  ;;  %v2630_v47 = vld [vmem:[#allocation2 + $0xcc] sm:$0xe] }
 0x1a5   : > { %v2598_v17 = vor.u32 %v2597_v48, %v2594_v46  ;;  %v2733_v29 = vrot.slane %v7048_v19, 5  ;;  %v2731_v34 = vsel %vm5186_vm11, %v4404_v43, %v2730_v3  ;;  %v2732_v22 = vrot.slane %v2730_v3, 4  ;;  %v4858_v37 = vld [vmem:[#allocation2 + $0x94] sm:$0xf]  ;;  %s4873_s9 = scalar_lea.vmem %s7381_s5, 2048 }
 0x1a6   : > { %3429 = vrot.lane.b32.xlu0 %v4532_v2, %s4959_s10  ;;  %v2608_v57 = vor.u32 %v2607_v14, %v2603_v42  ;;  %v4411_v20 = vrot.slane %v2629_v11, 9  ;;  %v2781_v61 = vrot.slane %v2779_v28, 4  ;;  %v2782_v27 = vrot.slane %v7013_v5, 5  ;;  %v7111_v44 = vpop.permute.xlu1 %3265  ;;  %p4874_p12 = scmp.ne.s32.totalorder %s7381_s5, %s4873_s9 }
 0x1a7   : > { %v2599_v41 = vrot.slane %v2598_v17, 4  ;;  %v2786_v49 = vrot.slane %v7074_v4, 5  ;;  %v2734_v19 = vsel %vm5186_vm11, %v2732_v22, %v2733_v29  ;;  %v7118_v4 = vpop.permute.xlu0 %3249  ;;  %v4412_v55 = vrot.slane %v2630_v47, 9  ;;  %v4859_v17 = vld [vmem:[#allocation2 + $0x30] sm:$0xf] }
 0x1a8   : > { %3443 = vrot.lane.b32.xlu1 %v4539_v39, %s4959_s10  ;;  %v2609_v15 = vrot.slane %v2608_v57, 4  ;;  %v4548_v54 = vcombine.low %v2731_v34, %v2734_v19  ;;  %v2780_v0 = vsel %vm5186_vm11, %v4411_v20, %v2779_v28  ;;  %v2783_v5 = vsel %vm5186_vm11, %v2781_v61, %v2782_v27  ;;  %v4860_v28 = vld [vmem:[#allocation2 + $0x34] sm:$0xf]  ;;  %v4861_v22 = vld [vmem:[#allocation2 + $0x9c] sm:$0xf]  ;;  %p4875_p13 = pnand %p4874_p12, %p5025_p4 }
 0x1a9   : > { %v2604_v24 = vsel %vm5298_vm14, %v2599_v41, %v2603_v42  ;;  %v2788_v51 = vrot.slane %v2786_v49, 4  ;;  %v4555_v48 = vcombine.low %v2780_v0, %v2783_v5  ;;  %v2787_v52 = vsel %vm5186_vm11, %v4412_v55, %v2786_v49  ;;  %v4864_v61 = vld [vmem:[#allocation2 + $0x40] sm:$0xf] }
 0x1aa   : > { %3507 = vrot.lane.b32.xlu0 %v4547_v53, %s4960_s11  ;;  %v3360_v39 = vpop.permute.xlu1 %3359  ;;  %v4425_v38 = vcombine.low %v4857_v8, %v4858_v37  ;;  %v4417_v26 = vcombine.low %v4859_v17, %v4860_v28  ;;  %vm7477_vm2 = vcmask 72704   ;;  %vm7479_vm6 = vcmask 97280   ;;  %p4876_p0 = pneg %p4875_p13 }
 0x1ab   : > { %v2230_v18 = vld [vmem:[#allocation2 + $0xd4] sm:$0x1]  ;;  %v3344_v42 = vpop.permute.xlu0 %3343  ;;  %vm7478_vm4 = vmmov %vm7477_vm2  ;;  %vm7481_vm8 = vcmask 146432  }
 0x1ac   : > { %v2611_v21 = vshll.u32 %v2230_v18, 16  ;;  %v2789_v6 = vrot.slane %v2230_v18, 5  ;;  %v3566_v32 = vsel %vm3527_vm15, %v4425_v38, %v6834_v63  ;;  %v3542_v57 = vsel %vm3527_vm15, %v4417_v26, %v6840_v35  ;;  %v4862_v18 = vld [vmem:[#allocation2 + $0xa0] sm:$0xf]  ;;  %vm7480_vm7 = vmmov %vm7479_vm6 }
 0x1ad   : > { %v3602_v11 = vsel %vm3576_vm0, %v3566_v32, %v6922_v40  ;;  %v3586_v53 = vsel %vm3576_vm0, %v3542_v57, %v6928_v7  ;;  %v4426_v35 = vcombine.low %v4861_v22, %v4862_v18  ;;  %v4863_v7 = vld [vmem:[#allocation2 + $0x3c] sm:$0xf]  ;;  %vm7485_vm10 = vmmov %vm7477_vm2 }
 0x1ae   : > { %v2613_v23 = vrot.slane %v2611_v21, 5  ;;  %3509 = vrot.lane.b32.xlu0 %v4548_v54, %s4960_s11  ;;  %v2790_v59 = vsel %vm5186_vm11, %v2788_v51, %v2789_v6  ;;  %v3635_v3 = vsel %vm7477_vm2, %v3602_v11, %v7002_v10  ;;  %v3619_v41 = vsel %vm7478_vm4, %v3586_v53, %v7007_v30  ;;  %vm7482_vm11 = vmmov %vm7481_vm8  ;;  %v4865_v11 = vld [vmem:[#allocation2 + $0x48] sm:$0xf]  ;;  %v4866_v53 = vld [vmem:[#allocation2 + $0x4c] sm:$0xf] }
 0x1af   : > { %v4556_v14 = vcombine.low %v2787_v52, %v2790_v59  ;;  %v3668_v34 = vsel %vm7479_vm6, %v3635_v3, %v7059_v31  ;;  %v3652_v40 = vsel %vm7480_vm7, %v3619_v41, %v7062_v9  ;;  %v4418_v27 = vcombine.low %v4863_v7, %v4864_v61  ;;  %vm7487_vm3 = vmmov %vm7479_vm6  ;;  %v4867_v7 = vld [vmem:[#allocation2 + $0x54] sm:$0xf]  ;;  %v4868_v61 = vld [vmem:[#allocation2 + $0x58] sm:$0xf] }
 0x1b0   : > { %v2614_v25 = vsel %vm5298_vm14, %v2609_v15, %v2613_v23  ;;  %v3701_v20 = vsel %vm3675_vm5, %v3668_v34, %v3264_v45  ;;  %v3685_v10 = vsel %vm3675_vm5, %v3652_v40, %v7100_v36  ;;  %vm7483_vm14 = vmmov %vm7475_vm1  ;;  %v3569_v45 = vsel %vm3527_vm15, %v4426_v35, %v6891_v33 }
 0x1b1   : > { %v4540_v46 = vcombine.low %v2604_v24, %v2614_v25  ;;  %v3734_v30 = vsel %vm7481_vm8, %v3701_v20, %v3360_v39  ;;  %v3718_v15 = vsel %vm7482_vm11, %v3685_v10, %v3344_v42  ;;  %v3545_v36 = vsel %vm3527_vm15, %v4418_v27, %v6895_v12  ;;  %vm7486_vm1 = vmmov %vm7477_vm2 }
 0x1b2   : > { %v3604_v54 = vsel %vm3576_vm0, %v3569_v45, %v6964_v60  ;;  %v3588_v24 = vsel %vm3576_vm0, %v3545_v36, %v6973_v13  ;;  %vm7488_vm2 = vmmov %vm7487_vm3  ;;  %v4419_v3 = vcombine.low %v4865_v11, %v4866_v53  ;;  %v4420_v27 = vcombine.low %v4867_v7, %v4868_v61 }
 0x1b3   : > { %3445 = vrot.lane.b32.xlu1 %v4540_v46, %s4959_s10  ;;  %v3362_v16 = vpop.permute.xlu1 %3361  ;;  %v3637_v23 = vsel %vm7485_vm10, %v3604_v54, %v7027_v58  ;;  %v3621_v33 = vsel %vm7486_vm1, %v3588_v24, %v7032_v56  ;;  %vm7489_vm4 = vmmov %vm7481_vm8  ;;  %vm4190_vm11 = vcmask 257024   ;;  %s4962_s10 = smov [#allocation3]  }
 0x1b4   : > { %v3346_v2 = vpop.permute.xlu0 %3345  ;;  %v3670_v5 = vsel %vm7487_vm3, %v3637_v23, %v7081_v50  ;;  %v3654_v60 = vsel %vm7488_vm2, %v3621_v33, %v7087_v62  ;;  %vm7490_vm6 = vmmov %vm7489_vm4 }
 0x1b5   : > { %v3703_v25 = vsel %vm3675_vm5, %v3670_v5, %v7111_v44  ;;  %v3687_v13 = vsel %vm3675_vm5, %v3654_v60, %v7118_v4  ;;  %vm7491_vm7 = vmmov %vm7484_vm9 }
 0x1b6   : > { %v3736_v58 = vsel %vm7489_vm4, %v3703_v25, %v3362_v16  ;;  %v3720_v55 = vsel %vm7490_vm6, %v3687_v13, %v3346_v2  ;;  %vm7492_vm8 = vmmov %vm7491_vm7 }
 0x1b7   : > { %3523 = vrot.lane.b32.xlu1 %v4555_v48, %s4960_s11  ;;  %v3440_v1 = vpop.permute.xlu1 %3439  ;;  %vm7495_vm10 = vmmov %vm7489_vm4 }
 0x1b8   : > { %v3424_v43 = vpop.permute.xlu0 %3423  ;;  %v3767_v31 = vsel %vm7483_vm14, %v3734_v30, %v3440_v1  ;;  %vm7493_vm14 = vmmov %vm7486_vm1 }
 0x1b9   : > { %v3751_v49 = vsel %vm7484_vm9, %v3718_v15, %v3424_v43  ;;  %vm7494_vm9 = vmmov %vm7488_vm2 }
 0x1ba   : > { %vm7496_vm1 = vmmov %vm7491_vm7 }
 0x1bb   : > { %3525 = vrot.lane.b32.xlu1 %v4556_v14, %s4960_s11  ;;  %vm7497_vm3 = vmmov %vm7493_vm14  ;;  %s4877_s11 = sshll.u32 %s4962_s10, 4  ;;  %s4878_s11 = int_to_ptr.vmem [resolvable:$false] %s4877_s11 }
 0x1bc   : > { %vm7498_vm6 = vmmov %vm7496_vm1  ;;  %s4879_s18 = scalar_lea.vmem %s4878_s11, 4096  ;;  %p4880_p1 = scmp.lt.s32.totalorder %s7381_s5, %s4878_s11 }
 0x1bd   : > { %p4881_p2 = scmp.lt.s32.totalorder %s4879_s18, %s4873_s9 }
 0x1bf   : > { %p4882_p3 = por %p4881_p2, %p4880_p1 }
 0x1c1   : > { %p4883_p5 = pnand %p4882_p3, %p4876_p0 }
 0x1c6   : > { %v3442_v29 = vpop.permute.xlu1 %3441 }
 0x1c7   : > { %v3426_v63 = vpop.permute.xlu0 %3425  ;;  %v3769_v51 = vsel %vm7491_vm7, %v3736_v58, %v3442_v29  ;;  %v7220_v29 = vld [vmem:[%s7439_s2] ss:$0 sm:$0xff]  ;;  %vm7499_vm7 = vmmov %vm7497_vm3 }
 0x1c8   : > { %v3753_v6 = vsel %vm7492_vm8, %v3720_v55, %v3426_v63  ;;  %vm7500_vm8 = vmmov %vm7488_vm2 }
 0x1ca   : > { %v3520_v21 = vpop.permute.xlu1 %3519 }
 0x1cb   : > { %v3800_v19 = vsel %vm3774_vm12, %v3767_v31, %v3520_v21  ;;  %v3504_v9 = vpop.permute.xlu0 %3503 }
 0x1cc   : > { %v3784_v47 = vsel %vm3774_vm12, %v3751_v49, %v3504_v9  ;;  %4729 = vmatprep.mubr.msk.bf16.mxu1 %vm3829_vm13, %v3800_v19 }
 0x1cd   : > { %4713 = vmatprep.mubr.msk.bf16.mxu0 %vm3829_vm13, %v3784_v47 }
 0x1ce   : > { %v7166_v0 = vpop.permute.xlu1 %2931 }
 0x1cf   : > { %v2916_v12 = vpop.permute.xlu0 %2915 }
 0x1d0   : > { %v3548_v20 = vsel %vm3527_vm15, %v4419_v3, %v2916_v12 }
 0x1d2   : > { %v3522_v56 = vpop.permute.xlu1 %3521 }
 0x1d3   : > { %v3802_v50 = vsel %vm3774_vm12, %v3769_v51, %v3522_v56  ;;  %v3506_v46 = vpop.permute.xlu0 %3505 }
 0x1d4   : > { %v3786_v62 = vsel %vm3774_vm12, %v3753_v6, %v3506_v46  ;;  %4730 = vmatmul.mubr.msk.bf16.gmra.mrb[8].mxu1 %vm3829_vm13, %v3802_v50 }
 0x1d5   : > { %4714 = vmatmul.mubr.msk.bf16.gmra.mrb[8].mxu0 %vm3829_vm13, %v3786_v62 }
 0x1d7   : > { %v7188_v48 = vpop.permute.xlu1 %2933 }
 0x1d9   : > { %v7186_v44 = vpop.permute.xlu0 %2917 }
 0x1da   : > { %v3551_v11 = vsel %vm3527_vm15, %v4420_v27, %v7186_v44 }
 0x1db   : > { %v7192_v59 = vpop.permute.xlu1 %3011 }
 0x1dd   : > { %v2996_v4 = vpop.permute.xlu0 %2995 }
 0x1de   : > { %v3590_v47 = vsel %vm3576_vm0, %v3548_v20, %v2996_v4 }
 0x1df   : > { %v7194_v42 = vpop.permute.xlu1 %3013 }
 0x1e1   : > { %v7190_v52 = vpop.permute.xlu0 %2997 }
 0x1e3   : > { %v7198_v16 = vpop.permute.xlu1 %3107 }
 0x1e5   : > { %v3092_v39 = vpop.permute.xlu0 %3091 }
 0x1e6   : > { %v3623_v33 = vsel %vm7493_vm14, %v3590_v47, %v3092_v39  ;;  %vm7501_vm14 = vmmov %vm7489_vm4 }
 0x1e9   : > { %v7196_v14 = vpop.permute.xlu0 %3093 }
 0x1f2   : > { %v3172_v2 = vpop.permute.xlu0 %3171 }
 0x1f3   : > { %v7200_v8 = vpop.permute.xlu1 %3109  ;;  %v3656_v56 = vsel %vm7494_vm9, %v3623_v33, %v3172_v2  ;;  %vm7502_vm9 = vmmov %vm7497_vm3 }
 0x1f6   : > { %v7202_v37 = vpop.permute.xlu0 %3173 }
 0x1f7   : > { %v7204_v1 = vpop.permute.xlu1 %3187 }
 0x1fa   : > { %v3252_v38 = vpop.permute.xlu0 %3251 }
 0x1fb   : > { %v3689_v62 = vsel %vm3675_vm5, %v3656_v56, %v3252_v38 }
 0x1fe   : > { %v7206_v17 = vpop.permute.xlu0 %3253 }
 0x202   : > { %v3348_v43 = vpop.permute.xlu0 %3347 }
 0x203   : > { %v7208_v28 = vpop.permute.xlu1 %3189  ;;  %v3722_v53 = vsel %vm7495_vm10, %v3689_v62, %v3348_v43  ;;  %vm7503_vm10 = vmmov %vm7496_vm1 }
 0x206   : > { %v7214_v57 = vpop.permute.xlu0 %3349 }
 0x207   : > { %v7210_v26 = vpop.permute.xlu1 %3267 }
 0x20b   : > { %v7212_v32 = vpop.permute.xlu1 %3269 }
 0x20f   : > { %v7222_v41 = vpop.permute.xlu1 %3363 }
 0x213   : > { %v4707_v34 = vpop.f32.mrb[0].mxu0  ;;  %v4723_v63 = vpop.f32.mrb[0].mxu1 }
 0x214   : > { %v3428_v22 = vpop.permute.xlu0 %3427  ;;  %v3912_v18 = vadd.f32 %v4707_v34, %v7220_v29  ;;  %v3976_v35 = vadd.f32 %v4723_v63, %v7220_v29  ;;  %v3903_v40 = vpop.f32.mrb[1].mxu0  ;;  %v3592_v34 = vsel %vm3576_vm0, %v3551_v11, %v7190_v52  ;;  %v4869_v52 = vld [vmem:[#allocation2 + $0xa8] sm:$0xf] }
 0x215   : > { %v3904_v10 = vadd.f32 %v7220_v29, %v3903_v40  ;;  %v3967_v30 = vpop.f32.mrb[1].mxu1  ;;  %v4708_v15 = vpop.f32.mrb[2].mxu0  ;;  %v3755_v63 = vsel %vm7496_vm1, %v3722_v53, %v3428_v22  ;;  %v3625_v44 = vsel %vm7497_vm3, %v3592_v34, %v7196_v14  ;;  %v4870_v22 = vld [vmem:[#allocation2 + $0xac] sm:$0xf]  ;;  %vm7504_vm1 = vmmov %vm7488_vm2 }
 0x216   : > { %v4032_v31 = vmax.f32 %v3912_v18, 0.0  ;;  %v4048_v21 = vmax.f32 %v3976_v35, 0.0  ;;  %v3968_v49 = vadd.f32 %v7220_v29, %v3967_v30  ;;  %v3915_v19 = vadd.f32 %v4708_v15, %v7220_v29  ;;  %v4724_v9 = vpop.f32.mrb[2].mxu1  ;;  %v3906_v45 = vpop.f32.mrb[3].mxu0  ;;  %v4871_v30 = vld [vmem:[#allocation2 + $0xb4] sm:$0xf] }
 0x217   : > { %v4030_v36 = vmax.f32 %v3904_v10, 0.0  ;;  %v3979_v54 = vadd.f32 %v4724_v9, %v7220_v29  ;;  %v3907_v24 = vadd.f32 %v7220_v29, %v3906_v45  ;;  %v3970_v23 = vpop.f32.mrb[3].mxu1  ;;  %v3366_v6 = vpop.permute.xlu1 %3365  ;;  %v3658_v35 = vsel %vm7488_vm2, %v3625_v44, %v7202_v37  ;;  %v4872_v15 = vld [vmem:[#allocation2 + $0xb8] sm:$0xf] }
 0x218   : > { %v4652_v5 = vpack.c.bf16 %v4032_v31, %v4032_v31  ;;  %v4668_v12 = vpack.c.bf16 %v4048_v21, %v4048_v21  ;;  %v4046_v60 = vmax.f32 %v3968_v49, 0.0  ;;  %v3430_v25 = vpop.permute.xlu0 %3429  ;;  %v4033_v58 = vmax.f32 %v3915_v19, 0.0 }
 0x219   : > { %v4650_v13 = vpack.c.bf16 %v4030_v36, %v4030_v36  ;;  %v4049_v55 = vmax.f32 %v3979_v54, 0.0  ;;  %v4031_v51 = vmax.f32 %v3907_v24, 0.0  ;;  %v3971_v46 = vadd.f32 %v7220_v29, %v3970_v23 }
 0x21a   : > { %4193 = vst.msk [vmem:[%s7240_s30 + $0x8] sm:$0xf] %vm4190_vm11, %v4652_v5  ;;  %4209 = vst.msk [vmem:[%s7240_s30 + $0x48] sm:$0xf] %vm4190_vm11, %v4668_v12  ;;  %v4666_v50 = vpack.c.bf16 %v4046_v60, %v4046_v60  ;;  %v4653_v4 = vpack.c.bf16 %v4033_v58, %v4033_v58  ;;  %v4427_v40 = vcombine.low %v4869_v52, %v4870_v22 }
 0x21b   : > { %4191 = vst.msk [vmem:[%s7240_s30] sm:$0xf] %vm4190_vm11, %v4650_v13  ;;  %v4669_v39 = vpack.c.bf16 %v4049_v55, %v4049_v55  ;;  %v4651_v2 = vpack.c.bf16 %v4031_v51, %v4031_v51  ;;  %v4047_v3 = vmax.f32 %v3971_v46, 0.0  ;;  %v3691_v20 = vsel %vm3675_vm5, %v3658_v35, %v7206_v17  ;;  %v3444_v7 = vpop.permute.xlu1 %3443 }
 0x21c   : > { %4207 = vst.msk [vmem:[%s7240_s30 + $0x40] sm:$0xf] %vm4190_vm11, %v4666_v50  ;;  %v3508_v38 = vpop.permute.xlu0 %3507  ;;  %4194 = vst.msk [vmem:[%s7240_s30 + $0xc] sm:$0xf] %vm4190_vm11, %v4653_v4  ;;  %v3724_v14 = vsel %vm7489_vm4, %v3691_v20, %v7214_v57  ;;  %v3572_v37 = vsel %vm3527_vm15, %v4427_v40, %v7166_v0  ;;  %v4428_v31 = vcombine.low %v4871_v30, %v4872_v15 }
 0x21d   : > { %4210 = vst.msk [vmem:[%s7240_s30 + $0x4c] sm:$0xf] %vm4190_vm11, %v4669_v39  ;;  %4192 = vst.msk [vmem:[%s7240_s30 + $0x4] sm:$0xf] %vm4190_vm11, %v4651_v2  ;;  %v3788_v43 = vsel %vm3774_vm12, %v3755_v63, %v3508_v38  ;;  %v4667_v18 = vpack.c.bf16 %v4047_v3, %v4047_v3  ;;  %v3757_v61 = vsel %vm7498_vm6, %v3724_v14, %v3430_v25 }
 0x21e   : > { %4717 = vmatprep.mubr.msk.bf16.mxu0 %vm3829_vm13, %v3788_v43  ;;  %v3606_v17 = vsel %vm3576_vm0, %v3572_v37, %v7192_v59  ;;  %v3575_v19 = vsel %vm3527_vm15, %v4428_v31, %v7188_v48  ;;  %vm7505_vm15 = vmmov %vm7489_vm4 }
 0x21f   : > { %4208 = vst.msk [vmem:[%s7240_s30 + $0x44] sm:$0xf] %vm4190_vm11, %v4667_v18  ;;  %v3639_v21 = vsel %vm7499_vm7, %v3606_v17, %v7198_v16  ;;  %v3608_v9 = vsel %vm3576_vm0, %v3575_v19, %v7194_v42  ;;  %vm7506_vm0 = vmmov %vm7498_vm6 }
 0x220   : > { %v3510_v27 = vpop.permute.xlu0 %3509  ;;  %v3672_v49 = vsel %vm7500_vm8, %v3639_v21, %v7204_v1  ;;  %v3641_v59 = vsel %vm7502_vm9, %v3608_v9, %v7200_v8 }
 0x221   : > { %v3790_v10 = vsel %vm3774_vm12, %v3757_v61, %v3510_v27  ;;  %v3705_v0 = vsel %vm3675_vm5, %v3672_v49, %v7210_v26  ;;  %v3674_v1 = vsel %vm7504_vm1, %v3641_v59, %v7208_v28 }
 0x222   : > { %4718 = vmatmul.mubr.msk.bf16.gmra.mrb[12].mxu0 %vm3829_vm13, %v3790_v10  ;;  %v3738_v45 = vsel %vm7501_vm14, %v3705_v0, %v7222_v41  ;;  %v3707_v26 = vsel %vm3675_vm5, %v3674_v1, %v7212_v32 }
 0x223   : > { %v3771_v16 = vsel %vm7503_vm10, %v3738_v45, %v3444_v7  ;;  %v3740_v42 = vsel %vm7505_vm15, %v3707_v26, %v3366_v6 }
 0x225   : > { %v3446_v57 = vpop.permute.xlu1 %3445 }
 0x226   : > { %v3773_v41 = vsel %vm7506_vm0, %v3740_v42, %v3446_v57 }
 0x229   : > { %v3524_v47 = vpop.permute.xlu1 %3523 }
 0x22a   : > { %v3804_v48 = vsel %vm3774_vm12, %v3771_v16, %v3524_v47 }
 0x22b   : > { %4733 = vmatprep.mubr.msk.bf16.mxu1 %vm3829_vm13, %v3804_v48 }
 0x22d   : > { %v3526_v36 = vpop.permute.xlu1 %3525 }
 0x22e   : > { %v3806_v8 = vsel %vm3774_vm12, %v3773_v41, %v3526_v36 }
 0x22f   : > { %4734 = vmatmul.mubr.msk.bf16.gmra.mrb[12].mxu1 %vm3829_vm13, %v3806_v8 }
 0x26d   : > { %v4711_v54 = vpop.f32.mrb[4].mxu0  ;;  %v4727_v24 = vpop.f32.mrb[4].mxu1 }
 0x26e   : > { %v3928_v28 = vadd.f32 %v4711_v54, %v7220_v29  ;;  %v3992_v23 = vadd.f32 %v4727_v24, %v7220_v29  ;;  %v3919_v33 = vpop.f32.mrb[5].mxu0  ;;  %v3983_v5 = vpop.f32.mrb[5].mxu1 }
 0x26f   : > { %v3920_v32 = vadd.f32 %v7220_v29, %v3919_v33  ;;  %v3984_v12 = vadd.f32 %v7220_v29, %v3983_v5  ;;  %v4712_v60 = vpop.f32.mrb[6].mxu0  ;;  %v4728_v25 = vpop.f32.mrb[6].mxu1 }
 0x270   : > { %v4036_v13 = vmax.f32 %v3928_v28, 0.0  ;;  %v4052_v58 = vmax.f32 %v3992_v23, 0.0  ;;  %v3931_v55 = vadd.f32 %v4712_v60, %v7220_v29  ;;  %v3995_v51 = vadd.f32 %v4728_v25, %v7220_v29  ;;  %v3922_v56 = vpop.f32.mrb[7].mxu0  ;;  %v3986_v6 = vpop.f32.mrb[7].mxu1 }
 0x271   : > { %v4034_v50 = vmax.f32 %v3920_v32, 0.0  ;;  %v4050_v46 = vmax.f32 %v3984_v12, 0.0  ;;  %v3923_v62 = vadd.f32 %v7220_v29, %v3922_v56  ;;  %v3987_v4 = vadd.f32 %v7220_v29, %v3986_v6 }
 0x272   : > { %v4656_v39 = vpack.c.bf16 %v4036_v13, %v4036_v13  ;;  %v4672_v2 = vpack.c.bf16 %v4052_v58, %v4052_v58  ;;  %v4037_v11 = vmax.f32 %v3931_v55, 0.0  ;;  %v4053_v53 = vmax.f32 %v3995_v51, 0.0 }
 0x273   : > { %v4654_v3 = vpack.c.bf16 %v4034_v50, %v4034_v50  ;;  %v4670_v34 = vpack.c.bf16 %v4050_v46, %v4050_v46  ;;  %v4035_v63 = vmax.f32 %v3923_v62, 0.0  ;;  %v4051_v38 = vmax.f32 %v3987_v4, 0.0 }
 0x274   : > { %4197 = vst.msk [vmem:[%s7240_s30 + $0x18] sm:$0xf] %vm4190_vm11, %v4656_v39  ;;  %4213 = vst.msk [vmem:[%s7240_s30 + $0x58] sm:$0xf] %vm4190_vm11, %v4672_v2  ;;  %v4657_v44 = vpack.c.bf16 %v4037_v11, %v4037_v11  ;;  %v4673_v43 = vpack.c.bf16 %v4053_v53, %v4053_v53 }
 0x275   : > { %4195 = vst.msk [vmem:[%s7240_s30 + $0x10] sm:$0xf] %vm4190_vm11, %v4654_v3  ;;  %4211 = vst.msk [vmem:[%s7240_s30 + $0x50] sm:$0xf] %vm4190_vm11, %v4670_v34  ;;  %v4655_v18 = vpack.c.bf16 %v4035_v63, %v4035_v63  ;;  %v4671_v35 = vpack.c.bf16 %v4051_v38, %v4051_v38 }
 0x276   : > { %4198 = vst.msk [vmem:[%s7240_s30 + $0x1c] sm:$0xf] %vm4190_vm11, %v4657_v44  ;;  %4214 = vst.msk [vmem:[%s7240_s30 + $0x5c] sm:$0xf] %vm4190_vm11, %v4673_v43 }
 0x277   : > { %4196 = vst.msk [vmem:[%s7240_s30 + $0x14] sm:$0xf] %vm4190_vm11, %v4655_v18  ;;  %4212 = vst.msk [vmem:[%s7240_s30 + $0x54] sm:$0xf] %vm4190_vm11, %v4671_v35 }
 0x2a7   : > { %v4731_v52 = vpop.f32.mrb[8].mxu1 }
 0x2a8   : > { %v4715_v22 = vpop.f32.mrb[8].mxu0  ;;  %v4008_v40 = vadd.f32 %v4731_v52, %v7220_v29  ;;  %v3999_v20 = vpop.f32.mrb[9].mxu1 }
 0x2a9   : > { %v3944_v7 = vadd.f32 %v4715_v22, %v7220_v29  ;;  %v3935_v14 = vpop.f32.mrb[9].mxu0  ;;  %v4000_v61 = vadd.f32 %v7220_v29, %v3999_v20  ;;  %v4732_v27 = vpop.f32.mrb[10].mxu1 }
 0x2aa   : > { %v4056_v10 = vmax.f32 %v4008_v40, 0.0  ;;  %v3936_v37 = vadd.f32 %v7220_v29, %v3935_v14  ;;  %v4716_v30 = vpop.f32.mrb[10].mxu0  ;;  %v4011_v15 = vadd.f32 %v4732_v27, %v7220_v29  ;;  %v4002_v31 = vpop.f32.mrb[11].mxu1 }
 0x2ab   : > { %v4040_v17 = vmax.f32 %v3944_v7, 0.0  ;;  %v4054_v21 = vmax.f32 %v4000_v61, 0.0  ;;  %v3947_v57 = vadd.f32 %v4716_v30, %v7220_v29  ;;  %v3938_v49 = vpop.f32.mrb[11].mxu0  ;;  %v4003_v19 = vadd.f32 %v7220_v29, %v4002_v31 }
 0x2ac   : > { %v4676_v0 = vpack.c.bf16 %v4056_v10, %v4056_v10  ;;  %v4038_v9 = vmax.f32 %v3936_v37, 0.0  ;;  %v4057_v45 = vmax.f32 %v4011_v15, 0.0  ;;  %v3939_v59 = vadd.f32 %v7220_v29, %v3938_v49 }
 0x2ad   : > { %v4660_v16 = vpack.c.bf16 %v4040_v17, %v4040_v17  ;;  %v4674_v47 = vpack.c.bf16 %v4054_v21, %v4054_v21  ;;  %v4041_v1 = vmax.f32 %v3947_v57, 0.0  ;;  %v4055_v48 = vmax.f32 %v4003_v19, 0.0 }
 0x2ae   : > { %4217 = vst.msk [vmem:[%s7240_s30 + $0x68] sm:$0xf] %vm4190_vm11, %v4676_v0  ;;  %v4658_v26 = vpack.c.bf16 %v4038_v9, %v4038_v9  ;;  %v4677_v42 = vpack.c.bf16 %v4057_v45, %v4057_v45  ;;  %v4039_v41 = vmax.f32 %v3939_v59, 0.0 }
 0x2af   : > { %4201 = vst.msk [vmem:[%s7240_s30 + $0x28] sm:$0xf] %vm4190_vm11, %v4660_v16  ;;  %4215 = vst.msk [vmem:[%s7240_s30 + $0x60] sm:$0xf] %vm4190_vm11, %v4674_v47  ;;  %v4661_v36 = vpack.c.bf16 %v4041_v1, %v4041_v1  ;;  %v4675_v8 = vpack.c.bf16 %v4055_v48, %v4055_v48 }
 0x2b0   : > { %4199 = vst.msk [vmem:[%s7240_s30 + $0x20] sm:$0xf] %vm4190_vm11, %v4658_v26  ;;  %4218 = vst.msk [vmem:[%s7240_s30 + $0x6c] sm:$0xf] %vm4190_vm11, %v4677_v42  ;;  %v4659_v54 = vpack.c.bf16 %v4039_v41, %v4039_v41 }
 0x2b1   : > { %4202 = vst.msk [vmem:[%s7240_s30 + $0x2c] sm:$0xf] %vm4190_vm11, %v4661_v36  ;;  %4216 = vst.msk [vmem:[%s7240_s30 + $0x64] sm:$0xf] %vm4190_vm11, %v4675_v8 }
 0x2b2   : > { %4200 = vst.msk [vmem:[%s7240_s30 + $0x24] sm:$0xf] %vm4190_vm11, %v4659_v54 }
 0x2f5   : > { %v4719_v24 = vpop.f32.mrb[12].mxu0 }
 0x2f6   : > { %v3960_v28 = vadd.f32 %v4719_v24, %v7220_v29  ;;  %v3951_v23 = vpop.f32.mrb[13].mxu0 }
 0x2f7   : > { %v3952_v33 = vadd.f32 %v7220_v29, %v3951_v23  ;;  %v4720_v5 = vpop.f32.mrb[14].mxu0 }
 0x2f8   : > { %v4044_v32 = vmax.f32 %v3960_v28, 0.0  ;;  %v3963_v12 = vadd.f32 %v4720_v5, %v7220_v29  ;;  %v3954_v60 = vpop.f32.mrb[15].mxu0 }
 0x2f9   : > { %v4042_v25 = vmax.f32 %v3952_v33, 0.0  ;;  %v3955_v13 = vadd.f32 %v7220_v29, %v3954_v60 }
 0x2fa   : > { %v4664_v58 = vpack.c.bf16 %v4044_v32, %v4044_v32  ;;  %v4045_v55 = vmax.f32 %v3963_v12, 0.0 }
 0x2fb   : > { %v4662_v51 = vpack.c.bf16 %v4042_v25, %v4042_v25  ;;  %v4043_v56 = vmax.f32 %v3955_v13, 0.0 }
 0x2fc   : > { %4205 = vst.msk [vmem:[%s7240_s30 + $0x38] sm:$0xf] %vm4190_vm11, %v4664_v58  ;;  %v4665_v6 = vpack.c.bf16 %v4045_v55, %v4045_v55 }
 0x2fd   : > { %4203 = vst.msk [vmem:[%s7240_s30 + $0x30] sm:$0xf] %vm4190_vm11, %v4662_v51  ;;  %v4663_v50 = vpack.c.bf16 %v4043_v56, %v4043_v56 }
 0x2fe   : > { %4206 = vst.msk [vmem:[%s7240_s30 + $0x3c] sm:$0xf] %vm4190_vm11, %v4665_v6 }
 0x2ff   : > { %4204 = vst.msk [vmem:[%s7240_s30 + $0x34] sm:$0xf] %vm4190_vm11, %v4663_v50 }
 0x302   : > { %v4735_v46 = vpop.f32.mrb[12].mxu1 }
 0x303   : > { %v4024_v62 = vadd.f32 %v4735_v46, %v7220_v29  ;;  %v4015_v4 = vpop.f32.mrb[13].mxu1 }
 0x304   : > { %v4016_v39 = vadd.f32 %v7220_v29, %v4015_v4  ;;  %v4736_v2 = vpop.f32.mrb[14].mxu1 }
 0x305   : > { %v4060_v11 = vmax.f32 %v4024_v62, 0.0  ;;  %v4027_v53 = vadd.f32 %v4736_v2, %v7220_v29  ;;  %v4018_v3 = vpop.f32.mrb[15].mxu1 }
 0x306   : > { %v4058_v34 = vmax.f32 %v4016_v39, 0.0  ;;  %v4019_v63 = vadd.f32 %v7220_v29, %v4018_v3 }
 0x307   : > { %v4680_v38 = vpack.c.bf16 %v4060_v11, %v4060_v11  ;;  %v4061_v44 = vmax.f32 %v4027_v53, 0.0 }
 0x308   : > { %v4678_v43 = vpack.c.bf16 %v4058_v34, %v4058_v34  ;;  %v4059_v18 = vmax.f32 %v4019_v63, 0.0 }
 0x309   : > { %4221 = vst.msk [vmem:[%s7240_s30 + $0x78] sm:$0xf] %vm4190_vm11, %v4680_v38  ;;  %v4681_v35 = vpack.c.bf16 %v4061_v44, %v4061_v44 }
 0x30a   : > { %4219 = vst.msk [vmem:[%s7240_s30 + $0x70] sm:$0xf] %vm4190_vm11, %v4678_v43  ;;  %v4679_v29 = vpack.c.bf16 %v4059_v18, %v4059_v18 }
 0x30b   : > { %4222 = vst.msk [vmem:[%s7240_s30 + $0x7c] sm:$0xf] %vm4190_vm11, %v4681_v35 }
 0x30c   : > { %4220 = vst.msk [vmem:[%s7240_s30 + $0x74] sm:$0xf] %vm4190_vm11, %v4679_v29 }
 0x30d   : > { %4886 = shalt.err (!%p4883_p5)
}
 0x30e   : > { %s4887_s19 = scalar_lea.hbm %s7379_s8, 2048  ;;  %s4891_s26 = scalar_lea.hbm %s7440_s3, 4096 }
 0x30f   : > { %p4888_p6 = scmp.ne.s32.totalorder %s7379_s8, %s4887_s19  ;;  %p4892_p10 = scmp.lt.u32.totalorder %s7379_s8, %s7440_s3 }
 0x310   : > { %p4893_p11 = scmp.lt.u32.totalorder %s4891_s26, %s4887_s19  ;;  %p4895_p13 = scmp.lt.u32.totalorder %s4887_s19, %s7379_s8 }
 0x311   : > { %p4889_p7 = pnand %p4888_p6, %p5025_p4 }
 0x312   : > { %p4894_p12 = por %p4893_p11, %p4892_p10 }
 0x313   : > { %p4890_p9 = pneg %p4889_p7 }
 0x314   : > { %p4896_p0 = por %p4895_p13, %p4894_p12 }
 0x316   : > { %p4897_p1 = pnand %p4896_p0, %p4890_p9 }
 0x318   : > { %4900 = shalt.err (!%p4897_p1)
}
 0x319   : > { %s4963_s29 = smov 64   ;;  %s4964_s30 = smov 4  }
 0x31a   : > { %4741 = dma.vmem_to_hbm [thread:$0]  (%p5025_p4), %s7381_s5, 2048, %s7379_s8, %s7391_s15, %s4963_s29, %s4963_s29, %s4964_s30  }
 0x31b PF: > { %p4747_p2 = scmp.ge.s32.totalorder %s4951_s17, 2  ;;  %s4255_s4 = sand.u32 1, %s4931_s12  }
 0x31c   : > { %s4256_s6 = scalar_lea.sflag [#allocation4], %s4255_s4 }
 0x31d   : > { %p4744_p3 = pnand %p4747_p2, %p5032_p8 }
 0x31f   : > { %4926 = dma.done.wait (!%p4744_p3), %s4256_s6, 2048  }
 0x320   : > { %4928 = vsyncadd (!%p4744_p3), %s4256_s6, 4294965248  ;;  %s16_s17 = sadd.s32 1, %s4951_s17   ;;  %s7507_s12 = smov %s4935_s13 }
 0x321   : > { %p13_p5 = scmp.ge.s32.totalorder %s16_s17, 4   ;;  %s7508_s13 = smov %s4939_s14 }
 0x322   : > { %s7509_s14 = smov %s5038_s25  ;;  %s7510_s15 = smov %s4947_s16 }
 0x323   : > { %s7511_s16 = smov %s7513_s20  ;;  %15 = sbr.rel (!%p13_p5) target bundleno = 4 (0x4), region = 73 }
 0x32a   :  { %4261 = vsyncpa [#allocation4], 1 }
 0x32b   :  { %4263 = vsyncpa [#allocation4 + $0x1], 1 }

</bundles_post_ra>
